<compile_context>
chip_gen: v7x
topology: tpu7x:2x2x1
jax: 0.10.0
libtpu: 0.0.40
codegen_flags: <defaults>
</compile_context>

<pallas_src>
import math

import jax
import jax.numpy as jnp
from jax import lax
from jax.experimental import pallas as pl
from jax.experimental.pallas import tpu as pltpu


# ----------------------------------------------------------------------------- kernel
def make_kernel(T, B_real, B, Y, H, L):
    """Single-invocation Pallas kernel (no grid; whole problem resident in VMEM)."""

    def kernel(data_ref, gt_ref, wi0b_ref, wi0f_ref, wrec_ref,
               brz_ref, bni_ref, bnh_ref,
               decw_ref, decb_ref, meanw_ref, meanb_ref, out_ref):
        f32 = jnp.float32

        # ---- hoisted layer-0 input projections (batched over all time steps,
        #      no bias: the full GRU biases are carried in the b_* slabs below)
        gt_all = gt_ref[...]                                              # [T, B, Y]
        gi0_b = jnp.dot(data_ref[...].reshape(T * B, Y + 1), wi0b_ref[...],
                        preferred_element_type=f32).reshape(T, B, 3 * H)
        gi0_f = jnp.dot(gt_all.reshape(T * B, Y), wi0f_ref[...],
                        preferred_element_type=f32).reshape(T, B, 3 * H)

        # ---- unpack per-(direction, layer) weights / biases once (hoisted)
        def dir_weights(base):
            wh = [wrec_ref[base + l] for l in range(L)]                   # [H, 3H]
            wi = [None] + [wrec_ref[base + L + l - 1] for l in range(1, L)]
            return wh, wi

        wh_b, wi_b = dir_weights(0)
        wh_f, wi_f = dir_weights(2 * L - 1)

        brz_all = brz_ref[...]          # [2L, 2H]
        bni_all = bni_ref[...]          # [2L, H]
        bnh_all = bnh_ref[...]          # [2L, H]

        def dir_biases(d):
            return [(brz_all[d * L + l:d * L + l + 1],
                     bni_all[d * L + l:d * L + l + 1],
                     bnh_all[d * L + l:d * L + l + 1]) for l in range(L)]

        bias_b = dir_biases(0)
        bias_f = dir_biases(1)

        def cell(gi, h, w_h, b):
            # gi = x @ Wi (bias-free, precomputed for layer 0); b = (b_rz, b_ni, b_nh)
            b_rz, b_ni, b_nh = b
            gh = jnp.dot(h, w_h, preferred_element_type=f32)              # [B, 3H]
            rz = jax.nn.sigmoid(gi[:, :2 * H] + gh[:, :2 * H] + b_rz)
            r = rz[:, :H]
            z = rz[:, H:]
            n = jnp.tanh(gi[:, 2 * H:] + b_ni + r * (gh[:, 2 * H:] + b_nh))
            return (1.0 - z) * n + z * h

        # ---- interleaved, fully-unrolled forward + backward recurrences
        zero_h = jnp.zeros((B, H), f32)
        h_b = [zero_h for _ in range(L)]
        h_f = [zero_h for _ in range(L)]
        hb_snap = {}          # hb_snap[t+1] = top backward state BEFORE back-step at t
        hf_steps = []         # top forward state AFTER forward step t, t = 0..T-2
        for k in range(T - 1):
            tb = T - 1 - k    # backward time index: T-1 .. 1
            tf = k            # forward  time index: 0 .. T-2
            hb_snap[tb + 1] = h_b[L - 1]
            xb = None
            xf = None
            for l in range(L):
                gib = gi0_b[tb] if l == 0 else jnp.dot(
                    xb, wi_b[l], preferred_element_type=f32)
                h_b[l] = cell(gib, h_b[l], wh_b[l], bias_b[l])
                xb = h_b[l]
                gif = gi0_f[tf] if l == 0 else jnp.dot(
                    xf, wi_f[l], preferred_element_type=f32)
                h_f[l] = cell(gif, h_f[l], wh_f[l], bias_f[l])
                xf = h_f[l]
            hf_steps.append(h_f[L - 1])

        # ---- deferred batched decoder + squared-error loss (off the serial chain)
        hb_steps = [hb_snap[t + 2] for t in range(T - 1)]
        Hf = jnp.stack(hf_steps, axis=0).reshape((T - 1) * B, H)
        Hb = jnp.stack(hb_steps, axis=0).reshape((T - 1) * B, H)
        dec = jnp.maximum(
            jnp.dot(Hf, decw_ref[:H, :], preferred_element_type=f32)
            + jnp.dot(Hb, decw_ref[H:, :], preferred_element_type=f32)
            + decb_ref[...],
            0.0)
        mean = jnp.dot(dec, meanw_ref[...], preferred_element_type=f32) + meanb_ref[...]

        diff = mean.reshape(T - 1, B, Y) - gt_all[1:]
        sq = diff * diff
        if B_real != B:   # mask padded batch rows (divisor stays at real B)
            bidx = lax.broadcasted_iota(jnp.int32, (T - 1, B, Y), 1)
            sq = jnp.where(bidx < B_real, sq, 0.0)
        out_ref[...] = (jnp.sum(sq.reshape((T - 1) * B, Y), keepdims=True)
                        * (1.0 / ((T - 1) * B_real)))

    return kernel


# ----------------------------------------------------------------------------- wrapper
def single_res_loss(data, ground_truth, params):
    T, B, _ = data.shape
    Y = ground_truth.shape[-1]
    back, fwd, dec_w, dec_b, mean_w, mean_b = params
    L = len(back)
    H = back[0][1].shape[0]

    # pad batch to a multiple of 8 sublanes (padded rows masked out of the loss)
    B_pad = ((B + 7) // 8) * 8
    if B_pad != B:
        pad = ((0, 0), (0, B_pad - B), (0, 0))
        data = jnp.pad(data, pad)
        ground_truth = jnp.pad(ground_truth, pad)

    # layer-0 input-projection weights (consumed by the hoisted batched matmuls)
    wi0_back = back[0][0]            # [Y+1, 3H]
    wi0_fwd = fwd[0][0]              # [Y,   3H]

    # stacked in-loop weights: per direction [Wh_0..Wh_{L-1}, Wi_1..Wi_{L-1}]
    rec = []
    for layers in (back, fwd):
        for l in range(L):
            rec.append(layers[l][1])
        for l in range(1, L):
            rec.append(layers[l][0])
    w_rec = jnp.stack(rec, axis=0)   # [2*(2L-1), H, 3H]

    # bias slabs, row index = dir*L + layer (dir 0 = backward, 1 = forward)
    brz, bni, bnh = [], [], []
    for layers in (back, fwd):
        for (_, _, b_i, b_h) in layers:
            brz.append(b_i[0, :2 * H] + b_h[0, :2 * H])   # pre-combined r/z bias
            bni.append(b_i[0, 2 * H:])                    # input n-gate bias
            bnh.append(b_h[0, 2 * H:])                    # hidden n-gate bias
    brz = jnp.stack(brz, axis=0)     # [2L, 2H]
    bni = jnp.stack(bni, axis=0)     # [2L, H]
    bnh = jnp.stack(bnh, axis=0)     # [2L, H]

    vmem = pl.BlockSpec(memory_space=pltpu.MemorySpace.VMEM)
    out = pl.pallas_call(
        make_kernel(T, B, B_pad, Y, H, L),
        out_shape=jax.ShapeDtypeStruct((1, 1), jnp.float32),
        in_specs=[vmem] * 12,
        out_specs=vmem,
    )(data, ground_truth, wi0_back, wi0_fwd, w_rec, brz, bni, bnh,
      dec_w, dec_b, mean_w, mean_b)
    return out[0, 0]


# ----------------------------------------------------------------------------- params
def init_params(key, Y, H, DEC, L):
    def uni(k, shape, bound):
        return jax.random.uniform(k, shape, jnp.float32, -bound, bound)

    keys = iter(jax.random.split(key, 8 * L + 8))
    bH = 1.0 / math.sqrt(H)

    def gru_layer(in_dim):
        return (
            uni(next(keys), (in_dim, 3 * H), bH),   # w_i (r|z|n)
            uni(next(keys), (H, 3 * H), bH),        # w_h
            uni(next(keys), (1, 3 * H), bH),        # b_i
            uni(next(keys), (1, 3 * H), bH),        # b_h
        )

    back = [gru_layer(Y + 1 if l == 0 else H) for l in range(L)]
    fwd = [gru_layer(Y if l == 0 else H) for l in range(L)]

    b_dec = 1.0 / math.sqrt(2 * H)
    dec_w = uni(next(keys), (2 * H, DEC), b_dec)
    dec_b = uni(next(keys), (1, DEC), b_dec)

    b_mean = 1.0 / math.sqrt(DEC)
    mean_w = uni(next(keys), (DEC, Y), b_mean)
    mean_b = uni(next(keys), (1, Y), b_mean)
    return (back, fwd, dec_w, dec_b, mean_w, mean_b)


# ----------------------------------------------------------------------------- pure-JAX reference
def ref_forward(data, gt, params):
    T, B, _ = data.shape
    back, fwd, dec_w, dec_b, mean_w, mean_b = params
    L = len(back)
    H = back[0][1].shape[0]

    def cell(x, h, p):
        w_i, w_h, b_i, b_h = p
        gi = x @ w_i + b_i
        gh = h @ w_h + b_h
        r = jax.nn.sigmoid(gi[:, :H] + gh[:, :H])
        z = jax.nn.sigmoid(gi[:, H:2 * H] + gh[:, H:2 * H])
        n = jnp.tanh(gi[:, 2 * H:] + r * gh[:, 2 * H:])
        return (1.0 - z) * n + z * h

    h_back = [jnp.zeros((B, H), jnp.float32) for _ in range(L)]
    hb_dict = {}
    for t in range(T - 1, 0, -1):
        hb_dict[t + 1] = h_back[-1]
        inp = data[t]
        for l in range(L):
            h_back[l] = cell(inp, h_back[l], back[l])
            inp = h_back[l]

    h = [jnp.zeros((B, H), jnp.float32) for _ in range(L)]
    loss = 0.0
    for t in range(T - 1):
        inp = gt[t]
        for l in range(L):
            h[l] = cell(inp, h[l], fwd[l])
            inp = h[l]
        hb = hb_dict[t + 2]
        dec = jax.nn.relu(jnp.concatenate([h[-1], hb], axis=-1) @ dec_w + dec_b[0])
        mean = dec @ mean_w + mean_b[0]
        loss = loss + jnp.sum((mean - gt[t + 1]) ** 2)
    return loss / (T - 1) / B


# ----------------------------------------------------------------------------- main
if __name__ == "__main__":
    # params = {'task': 'billiards', 'y_dim': 8, 'rnn_dim': 32, 'dec1_dim': 64,
    #           'n_layers': 2, 'batch': 4, 'cuda': False}
    T, B, Y, H, DEC, L = 8, 4, 8, 32, 64, 2

    key = jax.random.PRNGKey(0)
    k_p, k_gt, k_noise = jax.random.split(key, 3)

    params = init_params(k_p, Y, H, DEC, L)
    ground_truth = jax.random.normal(k_gt, (T, B, Y), jnp.float32)
    # data = [has_value flag, observed state]  (y_dim + 1 features)
    data = jnp.concatenate(
        [jnp.ones((T, B, 1), jnp.float32),
         ground_truth + 0.01 * jax.random.normal(k_noise, (T, B, Y), jnp.float32)],
        axis=-1,
    )

    loss_kernel = jax.block_until_ready(single_res_loss(data, ground_truth, params))
    loss_ref = jax.block_until_ready(ref_forward(data, ground_truth, params))

    assert jnp.isfinite(loss_kernel)
    assert abs(float(loss_kernel) - float(loss_ref)) <= 1e-3 * max(1.0, abs(float(loss_ref))), (
        float(loss_kernel), float(loss_ref))
    print("KERNEL_OK")
</pallas_src>

<mosaic_0001>
module attributes {stable_mosaic.version = 11 : i64} {
  func.func @kernel(%arg0: memref<8x8x9xf32, #tpu.memory_space<vmem>>, %arg1: memref<8x8x8xf32, #tpu.memory_space<vmem>>, %arg2: memref<9x96xf32, #tpu.memory_space<vmem>>, %arg3: memref<8x96xf32, #tpu.memory_space<vmem>>, %arg4: memref<6x32x96xf32, #tpu.memory_space<vmem>>, %arg5: memref<4x64xf32, #tpu.memory_space<vmem>>, %arg6: memref<4x32xf32, #tpu.memory_space<vmem>>, %arg7: memref<4x32xf32, #tpu.memory_space<vmem>>, %arg8: memref<64x64xf32, #tpu.memory_space<vmem>>, %arg9: memref<1x64xf32, #tpu.memory_space<vmem>>, %arg10: memref<64x8xf32, #tpu.memory_space<vmem>>, %arg11: memref<1x8xf32, #tpu.memory_space<vmem>>, %arg12: memref<1x1xf32, #tpu.memory_space<vmem>>) attributes {dimension_semantics = [], scalar_prefetch = 0 : i64, scratch_operands = 0 : i64, tpu.core_type = #tpu.core_type<tc>} {
    %c0 = arith.constant 0 : index
    %c0_0 = arith.constant 0 : index
    %c0_1 = arith.constant 0 : index
    %0 = vector.load %arg1[%c0, %c0_0, %c0_1] : memref<8x8x8xf32, #tpu.memory_space<vmem>>, vector<8x8x8xf32>
    %c0_2 = arith.constant 0 : index
    %c0_3 = arith.constant 0 : index
    %c0_4 = arith.constant 0 : index
    %1 = vector.load %arg0[%c0_2, %c0_3, %c0_4] : memref<8x8x9xf32, #tpu.memory_space<vmem>>, vector<8x8x9xf32>
    %2 = vector.shape_cast %1 : vector<8x8x9xf32> to vector<64x9xf32>
    %c0_5 = arith.constant 0 : index
    %c0_6 = arith.constant 0 : index
    %3 = vector.load %arg2[%c0_5, %c0_6] : memref<9x96xf32, #tpu.memory_space<vmem>>, vector<9x96xf32>
    %cst = arith.constant dense<0.000000e+00> : vector<64x96xf32>
    %4 = tpu.matmul %2, %3, %cst {dimension_numbers = #tpu.dot_dimension_numbers<[1], [0], [0], [1], [0, 0, 1, 1], [], []>} : vector<64x9xf32>, vector<9x96xf32>, vector<64x96xf32> -> vector<64x96xf32>
    %5 = vector.shape_cast %4 : vector<64x96xf32> to vector<8x8x96xf32>
    %6 = vector.shape_cast %0 : vector<8x8x8xf32> to vector<64x8xf32>
    %c0_7 = arith.constant 0 : index
    %c0_8 = arith.constant 0 : index
    %7 = vector.load %arg3[%c0_7, %c0_8] : memref<8x96xf32, #tpu.memory_space<vmem>>, vector<8x96xf32>
    %cst_9 = arith.constant dense<0.000000e+00> : vector<64x96xf32>
    %8 = tpu.matmul %6, %7, %cst_9 {dimension_numbers = #tpu.dot_dimension_numbers<[1], [0], [0], [1], [0, 0, 1, 1], [], []>} : vector<64x8xf32>, vector<8x96xf32>, vector<64x96xf32> -> vector<64x96xf32>
    %9 = vector.shape_cast %8 : vector<64x96xf32> to vector<8x8x96xf32>
    %c0_10 = arith.constant 0 : index
    %c0_11 = arith.constant 0 : index
    %c0_12 = arith.constant 0 : index
    %10 = vector.load %arg4[%c0_10, %c0_11, %c0_12] : memref<6x32x96xf32, #tpu.memory_space<vmem>>, vector<1x32x96xf32>
    %11 = vector.shape_cast %10 : vector<1x32x96xf32> to vector<32x96xf32>
    %c1 = arith.constant 1 : index
    %c0_13 = arith.constant 0 : index
    %c0_14 = arith.constant 0 : index
    %12 = vector.load %arg4[%c1, %c0_13, %c0_14] : memref<6x32x96xf32, #tpu.memory_space<vmem>>, vector<1x32x96xf32>
    %13 = vector.shape_cast %12 : vector<1x32x96xf32> to vector<32x96xf32>
    %c2 = arith.constant 2 : index
    %c0_15 = arith.constant 0 : index
    %c0_16 = arith.constant 0 : index
    %14 = vector.load %arg4[%c2, %c0_15, %c0_16] : memref<6x32x96xf32, #tpu.memory_space<vmem>>, vector<1x32x96xf32>
    %15 = vector.shape_cast %14 : vector<1x32x96xf32> to vector<32x96xf32>
    %c3 = arith.constant 3 : index
    %c0_17 = arith.constant 0 : index
    %c0_18 = arith.constant 0 : index
    %16 = vector.load %arg4[%c3, %c0_17, %c0_18] : memref<6x32x96xf32, #tpu.memory_space<vmem>>, vector<1x32x96xf32>
    %17 = vector.shape_cast %16 : vector<1x32x96xf32> to vector<32x96xf32>
    %c4 = arith.constant 4 : index
    %c0_19 = arith.constant 0 : index
    %c0_20 = arith.constant 0 : index
    %18 = vector.load %arg4[%c4, %c0_19, %c0_20] : memref<6x32x96xf32, #tpu.memory_space<vmem>>, vector<1x32x96xf32>
    %19 = vector.shape_cast %18 : vector<1x32x96xf32> to vector<32x96xf32>
    %c5 = arith.constant 5 : index
    %c0_21 = arith.constant 0 : index
    %c0_22 = arith.constant 0 : index
    %20 = vector.load %arg4[%c5, %c0_21, %c0_22] : memref<6x32x96xf32, #tpu.memory_space<vmem>>, vector<1x32x96xf32>
    %21 = vector.shape_cast %20 : vector<1x32x96xf32> to vector<32x96xf32>
    %c0_23 = arith.constant 0 : index
    %c0_24 = arith.constant 0 : index
    %22 = vector.load %arg5[%c0_23, %c0_24] : memref<4x64xf32, #tpu.memory_space<vmem>>, vector<4x64xf32>
    %c0_25 = arith.constant 0 : index
    %c0_26 = arith.constant 0 : index
    %23 = vector.load %arg6[%c0_25, %c0_26] : memref<4x32xf32, #tpu.memory_space<vmem>>, vector<4x32xf32>
    %c0_27 = arith.constant 0 : index
    %c0_28 = arith.constant 0 : index
    %24 = vector.load %arg7[%c0_27, %c0_28] : memref<4x32xf32, #tpu.memory_space<vmem>>, vector<4x32xf32>
    %25 = vector.extract_strided_slice %22 {offsets = [0, 0], sizes = [1, 64], strides = [1, 1]} : vector<4x64xf32> to vector<1x64xf32>
    %26 = vector.extract_strided_slice %23 {offsets = [0, 0], sizes = [1, 32], strides = [1, 1]} : vector<4x32xf32> to vector<1x32xf32>
    %27 = vector.extract_strided_slice %24 {offsets = [0, 0], sizes = [1, 32], strides = [1, 1]} : vector<4x32xf32> to vector<1x32xf32>
    %28 = vector.extract_strided_slice %22 {offsets = [1, 0], sizes = [1, 64], strides = [1, 1]} : vector<4x64xf32> to vector<1x64xf32>
    %29 = vector.extract_strided_slice %23 {offsets = [1, 0], sizes = [1, 32], strides = [1, 1]} : vector<4x32xf32> to vector<1x32xf32>
    %30 = vector.extract_strided_slice %24 {offsets = [1, 0], sizes = [1, 32], strides = [1, 1]} : vector<4x32xf32> to vector<1x32xf32>
    %31 = vector.extract_strided_slice %22 {offsets = [2, 0], sizes = [1, 64], strides = [1, 1]} : vector<4x64xf32> to vector<1x64xf32>
    %32 = vector.extract_strided_slice %23 {offsets = [2, 0], sizes = [1, 32], strides = [1, 1]} : vector<4x32xf32> to vector<1x32xf32>
    %33 = vector.extract_strided_slice %24 {offsets = [2, 0], sizes = [1, 32], strides = [1, 1]} : vector<4x32xf32> to vector<1x32xf32>
    %34 = vector.extract_strided_slice %22 {offsets = [3, 0], sizes = [1, 64], strides = [1, 1]} : vector<4x64xf32> to vector<1x64xf32>
    %35 = vector.extract_strided_slice %23 {offsets = [3, 0], sizes = [1, 32], strides = [1, 1]} : vector<4x32xf32> to vector<1x32xf32>
    %36 = vector.extract_strided_slice %24 {offsets = [3, 0], sizes = [1, 32], strides = [1, 1]} : vector<4x32xf32> to vector<1x32xf32>
    %cst_29 = arith.constant 0.000000e+00 : f32
    %37 = vector.broadcast %cst_29 : f32 to vector<8x32xf32>
    %38 = vector.extract_strided_slice %5 {offsets = [7, 0, 0], sizes = [1, 8, 96], strides = [1, 1, 1]} : vector<8x8x96xf32> to vector<1x8x96xf32>
    %39 = vector.shape_cast %38 : vector<1x8x96xf32> to vector<8x96xf32>
    %cst_30 = arith.constant dense<0.000000e+00> : vector<8x96xf32>
    %40 = tpu.matmul %37, %11, %cst_30 {dimension_numbers = #tpu.dot_dimension_numbers<[1], [0], [0], [1], [0, 0, 1, 1], [], []>} : vector<8x32xf32>, vector<32x96xf32>, vector<8x96xf32> -> vector<8x96xf32>
    %41 = vector.extract_strided_slice %39 {offsets = [0, 0], sizes = [8, 64], strides = [1, 1]} : vector<8x96xf32> to vector<8x64xf32>
    %42 = vector.extract_strided_slice %40 {offsets = [0, 0], sizes = [8, 64], strides = [1, 1]} : vector<8x96xf32> to vector<8x64xf32>
    %43 = arith.addf %41, %42 : vector<8x64xf32>
    %44 = vector.broadcast %25 : vector<1x64xf32> to vector<8x64xf32>
    %45 = arith.addf %43, %44 : vector<8x64xf32>
    %46 = arith.negf %45 : vector<8x64xf32>
    %47 = math.exp %46 : vector<8x64xf32>
    %cst_31 = arith.constant 1.000000e+00 : f32
    %48 = vector.broadcast %cst_31 : f32 to vector<8x64xf32>
    %49 = arith.addf %48, %47 : vector<8x64xf32>
    %50 = arith.divf %48, %49 : vector<8x64xf32>
    %51 = vector.extract_strided_slice %50 {offsets = [0, 0], sizes = [8, 32], strides = [1, 1]} : vector<8x64xf32> to vector<8x32xf32>
    %52 = vector.extract_strided_slice %50 {offsets = [0, 32], sizes = [8, 32], strides = [1, 1]} : vector<8x64xf32> to vector<8x32xf32>
    %53 = vector.extract_strided_slice %39 {offsets = [0, 64], sizes = [8, 32], strides = [1, 1]} : vector<8x96xf32> to vector<8x32xf32>
    %54 = vector.broadcast %26 : vector<1x32xf32> to vector<8x32xf32>
    %55 = arith.addf %53, %54 : vector<8x32xf32>
    %56 = vector.extract_strided_slice %40 {offsets = [0, 64], sizes = [8, 32], strides = [1, 1]} : vector<8x96xf32> to vector<8x32xf32>
    %57 = vector.broadcast %27 : vector<1x32xf32> to vector<8x32xf32>
    %58 = arith.addf %56, %57 : vector<8x32xf32>
    %59 = arith.mulf %51, %58 : vector<8x32xf32>
    %60 = arith.addf %55, %59 : vector<8x32xf32>
    %61 = math.tanh %60 : vector<8x32xf32>
    %cst_32 = arith.constant 1.000000e+00 : f32
    %62 = vector.broadcast %cst_32 : f32 to vector<8x32xf32>
    %63 = arith.subf %62, %52 : vector<8x32xf32>
    %64 = arith.mulf %63, %61 : vector<8x32xf32>
    %65 = arith.mulf %52, %37 : vector<8x32xf32>
    %66 = arith.addf %64, %65 : vector<8x32xf32>
    %67 = vector.extract_strided_slice %9 {offsets = [0, 0, 0], sizes = [1, 8, 96], strides = [1, 1, 1]} : vector<8x8x96xf32> to vector<1x8x96xf32>
    %68 = vector.shape_cast %67 : vector<1x8x96xf32> to vector<8x96xf32>
    %cst_33 = arith.constant dense<0.000000e+00> : vector<8x96xf32>
    %69 = tpu.matmul %37, %17, %cst_33 {dimension_numbers = #tpu.dot_dimension_numbers<[1], [0], [0], [1], [0, 0, 1, 1], [], []>} : vector<8x32xf32>, vector<32x96xf32>, vector<8x96xf32> -> vector<8x96xf32>
    %70 = vector.extract_strided_slice %68 {offsets = [0, 0], sizes = [8, 64], strides = [1, 1]} : vector<8x96xf32> to vector<8x64xf32>
    %71 = vector.extract_strided_slice %69 {offsets = [0, 0], sizes = [8, 64], strides = [1, 1]} : vector<8x96xf32> to vector<8x64xf32>
    %72 = arith.addf %70, %71 : vector<8x64xf32>
    %73 = vector.broadcast %31 : vector<1x64xf32> to vector<8x64xf32>
    %74 = arith.addf %72, %73 : vector<8x64xf32>
    %75 = arith.negf %74 : vector<8x64xf32>
    %76 = math.exp %75 : vector<8x64xf32>
    %cst_34 = arith.constant 1.000000e+00 : f32
    %77 = vector.broadcast %cst_34 : f32 to vector<8x64xf32>
    %78 = arith.addf %77, %76 : vector<8x64xf32>
    %79 = arith.divf %77, %78 : vector<8x64xf32>
    %80 = vector.extract_strided_slice %79 {offsets = [0, 0], sizes = [8, 32], strides = [1, 1]} : vector<8x64xf32> to vector<8x32xf32>
    %81 = vector.extract_strided_slice %79 {offsets = [0, 32], sizes = [8, 32], strides = [1, 1]} : vector<8x64xf32> to vector<8x32xf32>
    %82 = vector.extract_strided_slice %68 {offsets = [0, 64], sizes = [8, 32], strides = [1, 1]} : vector<8x96xf32> to vector<8x32xf32>
    %83 = vector.broadcast %32 : vector<1x32xf32> to vector<8x32xf32>
    %84 = arith.addf %82, %83 : vector<8x32xf32>
    %85 = vector.extract_strided_slice %69 {offsets = [0, 64], sizes = [8, 32], strides = [1, 1]} : vector<8x96xf32> to vector<8x32xf32>
    %86 = vector.broadcast %33 : vector<1x32xf32> to vector<8x32xf32>
    %87 = arith.addf %85, %86 : vector<8x32xf32>
    %88 = arith.mulf %80, %87 : vector<8x32xf32>
    %89 = arith.addf %84, %88 : vector<8x32xf32>
    %90 = math.tanh %89 : vector<8x32xf32>
    %cst_35 = arith.constant 1.000000e+00 : f32
    %91 = vector.broadcast %cst_35 : f32 to vector<8x32xf32>
    %92 = arith.subf %91, %81 : vector<8x32xf32>
    %93 = arith.mulf %92, %90 : vector<8x32xf32>
    %94 = arith.mulf %81, %37 : vector<8x32xf32>
    %95 = arith.addf %93, %94 : vector<8x32xf32>
    %cst_36 = arith.constant dense<0.000000e+00> : vector<8x96xf32>
    %96 = tpu.matmul %66, %15, %cst_36 {dimension_numbers = #tpu.dot_dimension_numbers<[1], [0], [0], [1], [0, 0, 1, 1], [], []>} : vector<8x32xf32>, vector<32x96xf32>, vector<8x96xf32> -> vector<8x96xf32>
    %cst_37 = arith.constant dense<0.000000e+00> : vector<8x96xf32>
    %97 = tpu.matmul %37, %13, %cst_37 {dimension_numbers = #tpu.dot_dimension_numbers<[1], [0], [0], [1], [0, 0, 1, 1], [], []>} : vector<8x32xf32>, vector<32x96xf32>, vector<8x96xf32> -> vector<8x96xf32>
    %98 = vector.extract_strided_slice %96 {offsets = [0, 0], sizes = [8, 64], strides = [1, 1]} : vector<8x96xf32> to vector<8x64xf32>
    %99 = vector.extract_strided_slice %97 {offsets = [0, 0], sizes = [8, 64], strides = [1, 1]} : vector<8x96xf32> to vector<8x64xf32>
    %100 = arith.addf %98, %99 : vector<8x64xf32>
    %101 = vector.broadcast %28 : vector<1x64xf32> to vector<8x64xf32>
    %102 = arith.addf %100, %101 : vector<8x64xf32>
    %103 = arith.negf %102 : vector<8x64xf32>
    %104 = math.exp %103 : vector<8x64xf32>
    %cst_38 = arith.constant 1.000000e+00 : f32
    %105 = vector.broadcast %cst_38 : f32 to vector<8x64xf32>
    %106 = arith.addf %105, %104 : vector<8x64xf32>
    %107 = arith.divf %105, %106 : vector<8x64xf32>
    %108 = vector.extract_strided_slice %107 {offsets = [0, 0], sizes = [8, 32], strides = [1, 1]} : vector<8x64xf32> to vector<8x32xf32>
    %109 = vector.extract_strided_slice %107 {offsets = [0, 32], sizes = [8, 32], strides = [1, 1]} : vector<8x64xf32> to vector<8x32xf32>
    %110 = vector.extract_strided_slice %96 {offsets = [0, 64], sizes = [8, 32], strides = [1, 1]} : vector<8x96xf32> to vector<8x32xf32>
    %111 = vector.broadcast %29 : vector<1x32xf32> to vector<8x32xf32>
    %112 = arith.addf %110, %111 : vector<8x32xf32>
    %113 = vector.extract_strided_slice %97 {offsets = [0, 64], sizes = [8, 32], strides = [1, 1]} : vector<8x96xf32> to vector<8x32xf32>
    %114 = vector.broadcast %30 : vector<1x32xf32> to vector<8x32xf32>
    %115 = arith.addf %113, %114 : vector<8x32xf32>
    %116 = arith.mulf %108, %115 : vector<8x32xf32>
    %117 = arith.addf %112, %116 : vector<8x32xf32>
    %118 = math.tanh %117 : vector<8x32xf32>
    %cst_39 = arith.constant 1.000000e+00 : f32
    %119 = vector.broadcast %cst_39 : f32 to vector<8x32xf32>
    %120 = arith.subf %119, %109 : vector<8x32xf32>
    %121 = arith.mulf %120, %118 : vector<8x32xf32>
    %122 = arith.mulf %109, %37 : vector<8x32xf32>
    %123 = arith.addf %121, %122 : vector<8x32xf32>
    %cst_40 = arith.constant dense<0.000000e+00> : vector<8x96xf32>
    %124 = tpu.matmul %95, %21, %cst_40 {dimension_numbers = #tpu.dot_dimension_numbers<[1], [0], [0], [1], [0, 0, 1, 1], [], []>} : vector<8x32xf32>, vector<32x96xf32>, vector<8x96xf32> -> vector<8x96xf32>
    %cst_41 = arith.constant dense<0.000000e+00> : vector<8x96xf32>
    %125 = tpu.matmul %37, %19, %cst_41 {dimension_numbers = #tpu.dot_dimension_numbers<[1], [0], [0], [1], [0, 0, 1, 1], [], []>} : vector<8x32xf32>, vector<32x96xf32>, vector<8x96xf32> -> vector<8x96xf32>
    %126 = vector.extract_strided_slice %124 {offsets = [0, 0], sizes = [8, 64], strides = [1, 1]} : vector<8x96xf32> to vector<8x64xf32>
    %127 = vector.extract_strided_slice %125 {offsets = [0, 0], sizes = [8, 64], strides = [1, 1]} : vector<8x96xf32> to vector<8x64xf32>
    %128 = arith.addf %126, %127 : vector<8x64xf32>
    %129 = vector.broadcast %34 : vector<1x64xf32> to vector<8x64xf32>
    %130 = arith.addf %128, %129 : vector<8x64xf32>
    %131 = arith.negf %130 : vector<8x64xf32>
    %132 = math.exp %131 : vector<8x64xf32>
    %cst_42 = arith.constant 1.000000e+00 : f32
    %133 = vector.broadcast %cst_42 : f32 to vector<8x64xf32>
    %134 = arith.addf %133, %132 : vector<8x64xf32>
    %135 = arith.divf %133, %134 : vector<8x64xf32>
    %136 = vector.extract_strided_slice %135 {offsets = [0, 0], sizes = [8, 32], strides = [1, 1]} : vector<8x64xf32> to vector<8x32xf32>
    %137 = vector.extract_strided_slice %135 {offsets = [0, 32], sizes = [8, 32], strides = [1, 1]} : vector<8x64xf32> to vector<8x32xf32>
    %138 = vector.extract_strided_slice %124 {offsets = [0, 64], sizes = [8, 32], strides = [1, 1]} : vector<8x96xf32> to vector<8x32xf32>
    %139 = vector.broadcast %35 : vector<1x32xf32> to vector<8x32xf32>
    %140 = arith.addf %138, %139 : vector<8x32xf32>
    %141 = vector.extract_strided_slice %125 {offsets = [0, 64], sizes = [8, 32], strides = [1, 1]} : vector<8x96xf32> to vector<8x32xf32>
    %142 = vector.broadcast %36 : vector<1x32xf32> to vector<8x32xf32>
    %143 = arith.addf %141, %142 : vector<8x32xf32>
    %144 = arith.mulf %136, %143 : vector<8x32xf32>
    %145 = arith.addf %140, %144 : vector<8x32xf32>
    %146 = math.tanh %145 : vector<8x32xf32>
    %cst_43 = arith.constant 1.000000e+00 : f32
    %147 = vector.broadcast %cst_43 : f32 to vector<8x32xf32>
    %148 = arith.subf %147, %137 : vector<8x32xf32>
    %149 = arith.mulf %148, %146 : vector<8x32xf32>
    %150 = arith.mulf %137, %37 : vector<8x32xf32>
    %151 = arith.addf %149, %150 : vector<8x32xf32>
    %152 = vector.extract_strided_slice %5 {offsets = [6, 0, 0], sizes = [1, 8, 96], strides = [1, 1, 1]} : vector<8x8x96xf32> to vector<1x8x96xf32>
    %153 = vector.shape_cast %152 : vector<1x8x96xf32> to vector<8x96xf32>
    %cst_44 = arith.constant dense<0.000000e+00> : vector<8x96xf32>
    %154 = tpu.matmul %66, %11, %cst_44 {dimension_numbers = #tpu.dot_dimension_numbers<[1], [0], [0], [1], [0, 0, 1, 1], [], []>} : vector<8x32xf32>, vector<32x96xf32>, vector<8x96xf32> -> vector<8x96xf32>
    %155 = vector.extract_strided_slice %153 {offsets = [0, 0], sizes = [8, 64], strides = [1, 1]} : vector<8x96xf32> to vector<8x64xf32>
    %156 = vector.extract_strided_slice %154 {offsets = [0, 0], sizes = [8, 64], strides = [1, 1]} : vector<8x96xf32> to vector<8x64xf32>
    %157 = arith.addf %155, %156 : vector<8x64xf32>
    %158 = vector.broadcast %25 : vector<1x64xf32> to vector<8x64xf32>
    %159 = arith.addf %157, %158 : vector<8x64xf32>
    %160 = arith.negf %159 : vector<8x64xf32>
    %161 = math.exp %160 : vector<8x64xf32>
    %cst_45 = arith.constant 1.000000e+00 : f32
    %162 = vector.broadcast %cst_45 : f32 to vector<8x64xf32>
    %163 = arith.addf %162, %161 : vector<8x64xf32>
    %164 = arith.divf %162, %163 : vector<8x64xf32>
    %165 = vector.extract_strided_slice %164 {offsets = [0, 0], sizes = [8, 32], strides = [1, 1]} : vector<8x64xf32> to vector<8x32xf32>
    %166 = vector.extract_strided_slice %164 {offsets = [0, 32], sizes = [8, 32], strides = [1, 1]} : vector<8x64xf32> to vector<8x32xf32>
    %167 = vector.extract_strided_slice %153 {offsets = [0, 64], sizes = [8, 32], strides = [1, 1]} : vector<8x96xf32> to vector<8x32xf32>
    %168 = vector.broadcast %26 : vector<1x32xf32> to vector<8x32xf32>
    %169 = arith.addf %167, %168 : vector<8x32xf32>
    %170 = vector.extract_strided_slice %154 {offsets = [0, 64], sizes = [8, 32], strides = [1, 1]} : vector<8x96xf32> to vector<8x32xf32>
    %171 = vector.broadcast %27 : vector<1x32xf32> to vector<8x32xf32>
    %172 = arith.addf %170, %171 : vector<8x32xf32>
    %173 = arith.mulf %165, %172 : vector<8x32xf32>
    %174 = arith.addf %169, %173 : vector<8x32xf32>
    %175 = math.tanh %174 : vector<8x32xf32>
    %cst_46 = arith.constant 1.000000e+00 : f32
    %176 = vector.broadcast %cst_46 : f32 to vector<8x32xf32>
    %177 = arith.subf %176, %166 : vector<8x32xf32>
    %178 = arith.mulf %177, %175 : vector<8x32xf32>
    %179 = arith.mulf %166, %66 : vector<8x32xf32>
    %180 = arith.addf %178, %179 : vector<8x32xf32>
    %181 = vector.extract_strided_slice %9 {offsets = [1, 0, 0], sizes = [1, 8, 96], strides = [1, 1, 1]} : vector<8x8x96xf32> to vector<1x8x96xf32>
    %182 = vector.shape_cast %181 : vector<1x8x96xf32> to vector<8x96xf32>
    %cst_47 = arith.constant dense<0.000000e+00> : vector<8x96xf32>
    %183 = tpu.matmul %95, %17, %cst_47 {dimension_numbers = #tpu.dot_dimension_numbers<[1], [0], [0], [1], [0, 0, 1, 1], [], []>} : vector<8x32xf32>, vector<32x96xf32>, vector<8x96xf32> -> vector<8x96xf32>
    %184 = vector.extract_strided_slice %182 {offsets = [0, 0], sizes = [8, 64], strides = [1, 1]} : vector<8x96xf32> to vector<8x64xf32>
    %185 = vector.extract_strided_slice %183 {offsets = [0, 0], sizes = [8, 64], strides = [1, 1]} : vector<8x96xf32> to vector<8x64xf32>
    %186 = arith.addf %184, %185 : vector<8x64xf32>
    %187 = vector.broadcast %31 : vector<1x64xf32> to vector<8x64xf32>
    %188 = arith.addf %186, %187 : vector<8x64xf32>
    %189 = arith.negf %188 : vector<8x64xf32>
    %190 = math.exp %189 : vector<8x64xf32>
    %cst_48 = arith.constant 1.000000e+00 : f32
    %191 = vector.broadcast %cst_48 : f32 to vector<8x64xf32>
    %192 = arith.addf %191, %190 : vector<8x64xf32>
    %193 = arith.divf %191, %192 : vector<8x64xf32>
    %194 = vector.extract_strided_slice %193 {offsets = [0, 0], sizes = [8, 32], strides = [1, 1]} : vector<8x64xf32> to vector<8x32xf32>
    %195 = vector.extract_strided_slice %193 {offsets = [0, 32], sizes = [8, 32], strides = [1, 1]} : vector<8x64xf32> to vector<8x32xf32>
    %196 = vector.extract_strided_slice %182 {offsets = [0, 64], sizes = [8, 32], strides = [1, 1]} : vector<8x96xf32> to vector<8x32xf32>
    %197 = vector.broadcast %32 : vector<1x32xf32> to vector<8x32xf32>
    %198 = arith.addf %196, %197 : vector<8x32xf32>
    %199 = vector.extract_strided_slice %183 {offsets = [0, 64], sizes = [8, 32], strides = [1, 1]} : vector<8x96xf32> to vector<8x32xf32>
    %200 = vector.broadcast %33 : vector<1x32xf32> to vector<8x32xf32>
    %201 = arith.addf %199, %200 : vector<8x32xf32>
    %202 = arith.mulf %194, %201 : vector<8x32xf32>
    %203 = arith.addf %198, %202 : vector<8x32xf32>
    %204 = math.tanh %203 : vector<8x32xf32>
    %cst_49 = arith.constant 1.000000e+00 : f32
    %205 = vector.broadcast %cst_49 : f32 to vector<8x32xf32>
    %206 = arith.subf %205, %195 : vector<8x32xf32>
    %207 = arith.mulf %206, %204 : vector<8x32xf32>
    %208 = arith.mulf %195, %95 : vector<8x32xf32>
    %209 = arith.addf %207, %208 : vector<8x32xf32>
    %cst_50 = arith.constant dense<0.000000e+00> : vector<8x96xf32>
    %210 = tpu.matmul %180, %15, %cst_50 {dimension_numbers = #tpu.dot_dimension_numbers<[1], [0], [0], [1], [0, 0, 1, 1], [], []>} : vector<8x32xf32>, vector<32x96xf32>, vector<8x96xf32> -> vector<8x96xf32>
    %cst_51 = arith.constant dense<0.000000e+00> : vector<8x96xf32>
    %211 = tpu.matmul %123, %13, %cst_51 {dimension_numbers = #tpu.dot_dimension_numbers<[1], [0], [0], [1], [0, 0, 1, 1], [], []>} : vector<8x32xf32>, vector<32x96xf32>, vector<8x96xf32> -> vector<8x96xf32>
    %212 = vector.extract_strided_slice %210 {offsets = [0, 0], sizes = [8, 64], strides = [1, 1]} : vector<8x96xf32> to vector<8x64xf32>
    %213 = vector.extract_strided_slice %211 {offsets = [0, 0], sizes = [8, 64], strides = [1, 1]} : vector<8x96xf32> to vector<8x64xf32>
    %214 = arith.addf %212, %213 : vector<8x64xf32>
    %215 = vector.broadcast %28 : vector<1x64xf32> to vector<8x64xf32>
    %216 = arith.addf %214, %215 : vector<8x64xf32>
    %217 = arith.negf %216 : vector<8x64xf32>
    %218 = math.exp %217 : vector<8x64xf32>
    %cst_52 = arith.constant 1.000000e+00 : f32
    %219 = vector.broadcast %cst_52 : f32 to vector<8x64xf32>
    %220 = arith.addf %219, %218 : vector<8x64xf32>
    %221 = arith.divf %219, %220 : vector<8x64xf32>
    %222 = vector.extract_strided_slice %221 {offsets = [0, 0], sizes = [8, 32], strides = [1, 1]} : vector<8x64xf32> to vector<8x32xf32>
    %223 = vector.extract_strided_slice %221 {offsets = [0, 32], sizes = [8, 32], strides = [1, 1]} : vector<8x64xf32> to vector<8x32xf32>
    %224 = vector.extract_strided_slice %210 {offsets = [0, 64], sizes = [8, 32], strides = [1, 1]} : vector<8x96xf32> to vector<8x32xf32>
    %225 = vector.broadcast %29 : vector<1x32xf32> to vector<8x32xf32>
    %226 = arith.addf %224, %225 : vector<8x32xf32>
    %227 = vector.extract_strided_slice %211 {offsets = [0, 64], sizes = [8, 32], strides = [1, 1]} : vector<8x96xf32> to vector<8x32xf32>
    %228 = vector.broadcast %30 : vector<1x32xf32> to vector<8x32xf32>
    %229 = arith.addf %227, %228 : vector<8x32xf32>
    %230 = arith.mulf %222, %229 : vector<8x32xf32>
    %231 = arith.addf %226, %230 : vector<8x32xf32>
    %232 = math.tanh %231 : vector<8x32xf32>
    %cst_53 = arith.constant 1.000000e+00 : f32
    %233 = vector.broadcast %cst_53 : f32 to vector<8x32xf32>
    %234 = arith.subf %233, %223 : vector<8x32xf32>
    %235 = arith.mulf %234, %232 : vector<8x32xf32>
    %236 = arith.mulf %223, %123 : vector<8x32xf32>
    %237 = arith.addf %235, %236 : vector<8x32xf32>
    %cst_54 = arith.constant dense<0.000000e+00> : vector<8x96xf32>
    %238 = tpu.matmul %209, %21, %cst_54 {dimension_numbers = #tpu.dot_dimension_numbers<[1], [0], [0], [1], [0, 0, 1, 1], [], []>} : vector<8x32xf32>, vector<32x96xf32>, vector<8x96xf32> -> vector<8x96xf32>
    %cst_55 = arith.constant dense<0.000000e+00> : vector<8x96xf32>
    %239 = tpu.matmul %151, %19, %cst_55 {dimension_numbers = #tpu.dot_dimension_numbers<[1], [0], [0], [1], [0, 0, 1, 1], [], []>} : vector<8x32xf32>, vector<32x96xf32>, vector<8x96xf32> -> vector<8x96xf32>
    %240 = vector.extract_strided_slice %238 {offsets = [0, 0], sizes = [8, 64], strides = [1, 1]} : vector<8x96xf32> to vector<8x64xf32>
    %241 = vector.extract_strided_slice %239 {offsets = [0, 0], sizes = [8, 64], strides = [1, 1]} : vector<8x96xf32> to vector<8x64xf32>
    %242 = arith.addf %240, %241 : vector<8x64xf32>
    %243 = vector.broadcast %34 : vector<1x64xf32> to vector<8x64xf32>
    %244 = arith.addf %242, %243 : vector<8x64xf32>
    %245 = arith.negf %244 : vector<8x64xf32>
    %246 = math.exp %245 : vector<8x64xf32>
    %cst_56 = arith.constant 1.000000e+00 : f32
    %247 = vector.broadcast %cst_56 : f32 to vector<8x64xf32>
    %248 = arith.addf %247, %246 : vector<8x64xf32>
    %249 = arith.divf %247, %248 : vector<8x64xf32>
    %250 = vector.extract_strided_slice %249 {offsets = [0, 0], sizes = [8, 32], strides = [1, 1]} : vector<8x64xf32> to vector<8x32xf32>
    %251 = vector.extract_strided_slice %249 {offsets = [0, 32], sizes = [8, 32], strides = [1, 1]} : vector<8x64xf32> to vector<8x32xf32>
    %252 = vector.extract_strided_slice %238 {offsets = [0, 64], sizes = [8, 32], strides = [1, 1]} : vector<8x96xf32> to vector<8x32xf32>
    %253 = vector.broadcast %35 : vector<1x32xf32> to vector<8x32xf32>
    %254 = arith.addf %252, %253 : vector<8x32xf32>
    %255 = vector.extract_strided_slice %239 {offsets = [0, 64], sizes = [8, 32], strides = [1, 1]} : vector<8x96xf32> to vector<8x32xf32>
    %256 = vector.broadcast %36 : vector<1x32xf32> to vector<8x32xf32>
    %257 = arith.addf %255, %256 : vector<8x32xf32>
    %258 = arith.mulf %250, %257 : vector<8x32xf32>
    %259 = arith.addf %254, %258 : vector<8x32xf32>
    %260 = math.tanh %259 : vector<8x32xf32>
    %cst_57 = arith.constant 1.000000e+00 : f32
    %261 = vector.broadcast %cst_57 : f32 to vector<8x32xf32>
    %262 = arith.subf %261, %251 : vector<8x32xf32>
    %263 = arith.mulf %262, %260 : vector<8x32xf32>
    %264 = arith.mulf %251, %151 : vector<8x32xf32>
    %265 = arith.addf %263, %264 : vector<8x32xf32>
    %266 = vector.extract_strided_slice %5 {offsets = [5, 0, 0], sizes = [1, 8, 96], strides = [1, 1, 1]} : vector<8x8x96xf32> to vector<1x8x96xf32>
    %267 = vector.shape_cast %266 : vector<1x8x96xf32> to vector<8x96xf32>
    %cst_58 = arith.constant dense<0.000000e+00> : vector<8x96xf32>
    %268 = tpu.matmul %180, %11, %cst_58 {dimension_numbers = #tpu.dot_dimension_numbers<[1], [0], [0], [1], [0, 0, 1, 1], [], []>} : vector<8x32xf32>, vector<32x96xf32>, vector<8x96xf32> -> vector<8x96xf32>
    %269 = vector.extract_strided_slice %267 {offsets = [0, 0], sizes = [8, 64], strides = [1, 1]} : vector<8x96xf32> to vector<8x64xf32>
    %270 = vector.extract_strided_slice %268 {offsets = [0, 0], sizes = [8, 64], strides = [1, 1]} : vector<8x96xf32> to vector<8x64xf32>
    %271 = arith.addf %269, %270 : vector<8x64xf32>
    %272 = vector.broadcast %25 : vector<1x64xf32> to vector<8x64xf32>
    %273 = arith.addf %271, %272 : vector<8x64xf32>
    %274 = arith.negf %273 : vector<8x64xf32>
    %275 = math.exp %274 : vector<8x64xf32>
    %cst_59 = arith.constant 1.000000e+00 : f32
    %276 = vector.broadcast %cst_59 : f32 to vector<8x64xf32>
    %277 = arith.addf %276, %275 : vector<8x64xf32>
    %278 = arith.divf %276, %277 : vector<8x64xf32>
    %279 = vector.extract_strided_slice %278 {offsets = [0, 0], sizes = [8, 32], strides = [1, 1]} : vector<8x64xf32> to vector<8x32xf32>
    %280 = vector.extract_strided_slice %278 {offsets = [0, 32], sizes = [8, 32], strides = [1, 1]} : vector<8x64xf32> to vector<8x32xf32>
    %281 = vector.extract_strided_slice %267 {offsets = [0, 64], sizes = [8, 32], strides = [1, 1]} : vector<8x96xf32> to vector<8x32xf32>
    %282 = vector.broadcast %26 : vector<1x32xf32> to vector<8x32xf32>
    %283 = arith.addf %281, %282 : vector<8x32xf32>
    %284 = vector.extract_strided_slice %268 {offsets = [0, 64], sizes = [8, 32], strides = [1, 1]} : vector<8x96xf32> to vector<8x32xf32>
    %285 = vector.broadcast %27 : vector<1x32xf32> to vector<8x32xf32>
    %286 = arith.addf %284, %285 : vector<8x32xf32>
    %287 = arith.mulf %279, %286 : vector<8x32xf32>
    %288 = arith.addf %283, %287 : vector<8x32xf32>
    %289 = math.tanh %288 : vector<8x32xf32>
    %cst_60 = arith.constant 1.000000e+00 : f32
    %290 = vector.broadcast %cst_60 : f32 to vector<8x32xf32>
    %291 = arith.subf %290, %280 : vector<8x32xf32>
    %292 = arith.mulf %291, %289 : vector<8x32xf32>
    %293 = arith.mulf %280, %180 : vector<8x32xf32>
    %294 = arith.addf %292, %293 : vector<8x32xf32>
    %295 = vector.extract_strided_slice %9 {offsets = [2, 0, 0], sizes = [1, 8, 96], strides = [1, 1, 1]} : vector<8x8x96xf32> to vector<1x8x96xf32>
    %296 = vector.shape_cast %295 : vector<1x8x96xf32> to vector<8x96xf32>
    %cst_61 = arith.constant dense<0.000000e+00> : vector<8x96xf32>
    %297 = tpu.matmul %209, %17, %cst_61 {dimension_numbers = #tpu.dot_dimension_numbers<[1], [0], [0], [1], [0, 0, 1, 1], [], []>} : vector<8x32xf32>, vector<32x96xf32>, vector<8x96xf32> -> vector<8x96xf32>
    %298 = vector.extract_strided_slice %296 {offsets = [0, 0], sizes = [8, 64], strides = [1, 1]} : vector<8x96xf32> to vector<8x64xf32>
    %299 = vector.extract_strided_slice %297 {offsets = [0, 0], sizes = [8, 64], strides = [1, 1]} : vector<8x96xf32> to vector<8x64xf32>
    %300 = arith.addf %298, %299 : vector<8x64xf32>
    %301 = vector.broadcast %31 : vector<1x64xf32> to vector<8x64xf32>
    %302 = arith.addf %300, %301 : vector<8x64xf32>
    %303 = arith.negf %302 : vector<8x64xf32>
    %304 = math.exp %303 : vector<8x64xf32>
    %cst_62 = arith.constant 1.000000e+00 : f32
    %305 = vector.broadcast %cst_62 : f32 to vector<8x64xf32>
    %306 = arith.addf %305, %304 : vector<8x64xf32>
    %307 = arith.divf %305, %306 : vector<8x64xf32>
    %308 = vector.extract_strided_slice %307 {offsets = [0, 0], sizes = [8, 32], strides = [1, 1]} : vector<8x64xf32> to vector<8x32xf32>
    %309 = vector.extract_strided_slice %307 {offsets = [0, 32], sizes = [8, 32], strides = [1, 1]} : vector<8x64xf32> to vector<8x32xf32>
    %310 = vector.extract_strided_slice %296 {offsets = [0, 64], sizes = [8, 32], strides = [1, 1]} : vector<8x96xf32> to vector<8x32xf32>
    %311 = vector.broadcast %32 : vector<1x32xf32> to vector<8x32xf32>
    %312 = arith.addf %310, %311 : vector<8x32xf32>
    %313 = vector.extract_strided_slice %297 {offsets = [0, 64], sizes = [8, 32], strides = [1, 1]} : vector<8x96xf32> to vector<8x32xf32>
    %314 = vector.broadcast %33 : vector<1x32xf32> to vector<8x32xf32>
    %315 = arith.addf %313, %314 : vector<8x32xf32>
    %316 = arith.mulf %308, %315 : vector<8x32xf32>
    %317 = arith.addf %312, %316 : vector<8x32xf32>
    %318 = math.tanh %317 : vector<8x32xf32>
    %cst_63 = arith.constant 1.000000e+00 : f32
    %319 = vector.broadcast %cst_63 : f32 to vector<8x32xf32>
    %320 = arith.subf %319, %309 : vector<8x32xf32>
    %321 = arith.mulf %320, %318 : vector<8x32xf32>
    %322 = arith.mulf %309, %209 : vector<8x32xf32>
    %323 = arith.addf %321, %322 : vector<8x32xf32>
    %cst_64 = arith.constant dense<0.000000e+00> : vector<8x96xf32>
    %324 = tpu.matmul %294, %15, %cst_64 {dimension_numbers = #tpu.dot_dimension_numbers<[1], [0], [0], [1], [0, 0, 1, 1], [], []>} : vector<8x32xf32>, vector<32x96xf32>, vector<8x96xf32> -> vector<8x96xf32>
    %cst_65 = arith.constant dense<0.000000e+00> : vector<8x96xf32>
    %325 = tpu.matmul %237, %13, %cst_65 {dimension_numbers = #tpu.dot_dimension_numbers<[1], [0], [0], [1], [0, 0, 1, 1], [], []>} : vector<8x32xf32>, vector<32x96xf32>, vector<8x96xf32> -> vector<8x96xf32>
    %326 = vector.extract_strided_slice %324 {offsets = [0, 0], sizes = [8, 64], strides = [1, 1]} : vector<8x96xf32> to vector<8x64xf32>
    %327 = vector.extract_strided_slice %325 {offsets = [0, 0], sizes = [8, 64], strides = [1, 1]} : vector<8x96xf32> to vector<8x64xf32>
    %328 = arith.addf %326, %327 : vector<8x64xf32>
    %329 = vector.broadcast %28 : vector<1x64xf32> to vector<8x64xf32>
    %330 = arith.addf %328, %329 : vector<8x64xf32>
    %331 = arith.negf %330 : vector<8x64xf32>
    %332 = math.exp %331 : vector<8x64xf32>
    %cst_66 = arith.constant 1.000000e+00 : f32
    %333 = vector.broadcast %cst_66 : f32 to vector<8x64xf32>
    %334 = arith.addf %333, %332 : vector<8x64xf32>
    %335 = arith.divf %333, %334 : vector<8x64xf32>
    %336 = vector.extract_strided_slice %335 {offsets = [0, 0], sizes = [8, 32], strides = [1, 1]} : vector<8x64xf32> to vector<8x32xf32>
    %337 = vector.extract_strided_slice %335 {offsets = [0, 32], sizes = [8, 32], strides = [1, 1]} : vector<8x64xf32> to vector<8x32xf32>
    %338 = vector.extract_strided_slice %324 {offsets = [0, 64], sizes = [8, 32], strides = [1, 1]} : vector<8x96xf32> to vector<8x32xf32>
    %339 = vector.broadcast %29 : vector<1x32xf32> to vector<8x32xf32>
    %340 = arith.addf %338, %339 : vector<8x32xf32>
    %341 = vector.extract_strided_slice %325 {offsets = [0, 64], sizes = [8, 32], strides = [1, 1]} : vector<8x96xf32> to vector<8x32xf32>
    %342 = vector.broadcast %30 : vector<1x32xf32> to vector<8x32xf32>
    %343 = arith.addf %341, %342 : vector<8x32xf32>
    %344 = arith.mulf %336, %343 : vector<8x32xf32>
    %345 = arith.addf %340, %344 : vector<8x32xf32>
    %346 = math.tanh %345 : vector<8x32xf32>
    %cst_67 = arith.constant 1.000000e+00 : f32
    %347 = vector.broadcast %cst_67 : f32 to vector<8x32xf32>
    %348 = arith.subf %347, %337 : vector<8x32xf32>
    %349 = arith.mulf %348, %346 : vector<8x32xf32>
    %350 = arith.mulf %337, %237 : vector<8x32xf32>
    %351 = arith.addf %349, %350 : vector<8x32xf32>
    %cst_68 = arith.constant dense<0.000000e+00> : vector<8x96xf32>
    %352 = tpu.matmul %323, %21, %cst_68 {dimension_numbers = #tpu.dot_dimension_numbers<[1], [0], [0], [1], [0, 0, 1, 1], [], []>} : vector<8x32xf32>, vector<32x96xf32>, vector<8x96xf32> -> vector<8x96xf32>
    %cst_69 = arith.constant dense<0.000000e+00> : vector<8x96xf32>
    %353 = tpu.matmul %265, %19, %cst_69 {dimension_numbers = #tpu.dot_dimension_numbers<[1], [0], [0], [1], [0, 0, 1, 1], [], []>} : vector<8x32xf32>, vector<32x96xf32>, vector<8x96xf32> -> vector<8x96xf32>
    %354 = vector.extract_strided_slice %352 {offsets = [0, 0], sizes = [8, 64], strides = [1, 1]} : vector<8x96xf32> to vector<8x64xf32>
    %355 = vector.extract_strided_slice %353 {offsets = [0, 0], sizes = [8, 64], strides = [1, 1]} : vector<8x96xf32> to vector<8x64xf32>
    %356 = arith.addf %354, %355 : vector<8x64xf32>
    %357 = vector.broadcast %34 : vector<1x64xf32> to vector<8x64xf32>
    %358 = arith.addf %356, %357 : vector<8x64xf32>
    %359 = arith.negf %358 : vector<8x64xf32>
    %360 = math.exp %359 : vector<8x64xf32>
    %cst_70 = arith.constant 1.000000e+00 : f32
    %361 = vector.broadcast %cst_70 : f32 to vector<8x64xf32>
    %362 = arith.addf %361, %360 : vector<8x64xf32>
    %363 = arith.divf %361, %362 : vector<8x64xf32>
    %364 = vector.extract_strided_slice %363 {offsets = [0, 0], sizes = [8, 32], strides = [1, 1]} : vector<8x64xf32> to vector<8x32xf32>
    %365 = vector.extract_strided_slice %363 {offsets = [0, 32], sizes = [8, 32], strides = [1, 1]} : vector<8x64xf32> to vector<8x32xf32>
    %366 = vector.extract_strided_slice %352 {offsets = [0, 64], sizes = [8, 32], strides = [1, 1]} : vector<8x96xf32> to vector<8x32xf32>
    %367 = vector.broadcast %35 : vector<1x32xf32> to vector<8x32xf32>
    %368 = arith.addf %366, %367 : vector<8x32xf32>
    %369 = vector.extract_strided_slice %353 {offsets = [0, 64], sizes = [8, 32], strides = [1, 1]} : vector<8x96xf32> to vector<8x32xf32>
    %370 = vector.broadcast %36 : vector<1x32xf32> to vector<8x32xf32>
    %371 = arith.addf %369, %370 : vector<8x32xf32>
    %372 = arith.mulf %364, %371 : vector<8x32xf32>
    %373 = arith.addf %368, %372 : vector<8x32xf32>
    %374 = math.tanh %373 : vector<8x32xf32>
    %cst_71 = arith.constant 1.000000e+00 : f32
    %375 = vector.broadcast %cst_71 : f32 to vector<8x32xf32>
    %376 = arith.subf %375, %365 : vector<8x32xf32>
    %377 = arith.mulf %376, %374 : vector<8x32xf32>
    %378 = arith.mulf %365, %265 : vector<8x32xf32>
    %379 = arith.addf %377, %378 : vector<8x32xf32>
    %380 = vector.extract_strided_slice %5 {offsets = [4, 0, 0], sizes = [1, 8, 96], strides = [1, 1, 1]} : vector<8x8x96xf32> to vector<1x8x96xf32>
    %381 = vector.shape_cast %380 : vector<1x8x96xf32> to vector<8x96xf32>
    %cst_72 = arith.constant dense<0.000000e+00> : vector<8x96xf32>
    %382 = tpu.matmul %294, %11, %cst_72 {dimension_numbers = #tpu.dot_dimension_numbers<[1], [0], [0], [1], [0, 0, 1, 1], [], []>} : vector<8x32xf32>, vector<32x96xf32>, vector<8x96xf32> -> vector<8x96xf32>
    %383 = vector.extract_strided_slice %381 {offsets = [0, 0], sizes = [8, 64], strides = [1, 1]} : vector<8x96xf32> to vector<8x64xf32>
    %384 = vector.extract_strided_slice %382 {offsets = [0, 0], sizes = [8, 64], strides = [1, 1]} : vector<8x96xf32> to vector<8x64xf32>
    %385 = arith.addf %383, %384 : vector<8x64xf32>
    %386 = vector.broadcast %25 : vector<1x64xf32> to vector<8x64xf32>
    %387 = arith.addf %385, %386 : vector<8x64xf32>
    %388 = arith.negf %387 : vector<8x64xf32>
    %389 = math.exp %388 : vector<8x64xf32>
    %cst_73 = arith.constant 1.000000e+00 : f32
    %390 = vector.broadcast %cst_73 : f32 to vector<8x64xf32>
    %391 = arith.addf %390, %389 : vector<8x64xf32>
    %392 = arith.divf %390, %391 : vector<8x64xf32>
    %393 = vector.extract_strided_slice %392 {offsets = [0, 0], sizes = [8, 32], strides = [1, 1]} : vector<8x64xf32> to vector<8x32xf32>
    %394 = vector.extract_strided_slice %392 {offsets = [0, 32], sizes = [8, 32], strides = [1, 1]} : vector<8x64xf32> to vector<8x32xf32>
    %395 = vector.extract_strided_slice %381 {offsets = [0, 64], sizes = [8, 32], strides = [1, 1]} : vector<8x96xf32> to vector<8x32xf32>
    %396 = vector.broadcast %26 : vector<1x32xf32> to vector<8x32xf32>
    %397 = arith.addf %395, %396 : vector<8x32xf32>
    %398 = vector.extract_strided_slice %382 {offsets = [0, 64], sizes = [8, 32], strides = [1, 1]} : vector<8x96xf32> to vector<8x32xf32>
    %399 = vector.broadcast %27 : vector<1x32xf32> to vector<8x32xf32>
    %400 = arith.addf %398, %399 : vector<8x32xf32>
    %401 = arith.mulf %393, %400 : vector<8x32xf32>
    %402 = arith.addf %397, %401 : vector<8x32xf32>
    %403 = math.tanh %402 : vector<8x32xf32>
    %cst_74 = arith.constant 1.000000e+00 : f32
    %404 = vector.broadcast %cst_74 : f32 to vector<8x32xf32>
    %405 = arith.subf %404, %394 : vector<8x32xf32>
    %406 = arith.mulf %405, %403 : vector<8x32xf32>
    %407 = arith.mulf %394, %294 : vector<8x32xf32>
    %408 = arith.addf %406, %407 : vector<8x32xf32>
    %409 = vector.extract_strided_slice %9 {offsets = [3, 0, 0], sizes = [1, 8, 96], strides = [1, 1, 1]} : vector<8x8x96xf32> to vector<1x8x96xf32>
    %410 = vector.shape_cast %409 : vector<1x8x96xf32> to vector<8x96xf32>
    %cst_75 = arith.constant dense<0.000000e+00> : vector<8x96xf32>
    %411 = tpu.matmul %323, %17, %cst_75 {dimension_numbers = #tpu.dot_dimension_numbers<[1], [0], [0], [1], [0, 0, 1, 1], [], []>} : vector<8x32xf32>, vector<32x96xf32>, vector<8x96xf32> -> vector<8x96xf32>
    %412 = vector.extract_strided_slice %410 {offsets = [0, 0], sizes = [8, 64], strides = [1, 1]} : vector<8x96xf32> to vector<8x64xf32>
    %413 = vector.extract_strided_slice %411 {offsets = [0, 0], sizes = [8, 64], strides = [1, 1]} : vector<8x96xf32> to vector<8x64xf32>
    %414 = arith.addf %412, %413 : vector<8x64xf32>
    %415 = vector.broadcast %31 : vector<1x64xf32> to vector<8x64xf32>
    %416 = arith.addf %414, %415 : vector<8x64xf32>
    %417 = arith.negf %416 : vector<8x64xf32>
    %418 = math.exp %417 : vector<8x64xf32>
    %cst_76 = arith.constant 1.000000e+00 : f32
    %419 = vector.broadcast %cst_76 : f32 to vector<8x64xf32>
    %420 = arith.addf %419, %418 : vector<8x64xf32>
    %421 = arith.divf %419, %420 : vector<8x64xf32>
    %422 = vector.extract_strided_slice %421 {offsets = [0, 0], sizes = [8, 32], strides = [1, 1]} : vector<8x64xf32> to vector<8x32xf32>
    %423 = vector.extract_strided_slice %421 {offsets = [0, 32], sizes = [8, 32], strides = [1, 1]} : vector<8x64xf32> to vector<8x32xf32>
    %424 = vector.extract_strided_slice %410 {offsets = [0, 64], sizes = [8, 32], strides = [1, 1]} : vector<8x96xf32> to vector<8x32xf32>
    %425 = vector.broadcast %32 : vector<1x32xf32> to vector<8x32xf32>
    %426 = arith.addf %424, %425 : vector<8x32xf32>
    %427 = vector.extract_strided_slice %411 {offsets = [0, 64], sizes = [8, 32], strides = [1, 1]} : vector<8x96xf32> to vector<8x32xf32>
    %428 = vector.broadcast %33 : vector<1x32xf32> to vector<8x32xf32>
    %429 = arith.addf %427, %428 : vector<8x32xf32>
    %430 = arith.mulf %422, %429 : vector<8x32xf32>
    %431 = arith.addf %426, %430 : vector<8x32xf32>
    %432 = math.tanh %431 : vector<8x32xf32>
    %cst_77 = arith.constant 1.000000e+00 : f32
    %433 = vector.broadcast %cst_77 : f32 to vector<8x32xf32>
    %434 = arith.subf %433, %423 : vector<8x32xf32>
    %435 = arith.mulf %434, %432 : vector<8x32xf32>
    %436 = arith.mulf %423, %323 : vector<8x32xf32>
    %437 = arith.addf %435, %436 : vector<8x32xf32>
    %cst_78 = arith.constant dense<0.000000e+00> : vector<8x96xf32>
    %438 = tpu.matmul %408, %15, %cst_78 {dimension_numbers = #tpu.dot_dimension_numbers<[1], [0], [0], [1], [0, 0, 1, 1], [], []>} : vector<8x32xf32>, vector<32x96xf32>, vector<8x96xf32> -> vector<8x96xf32>
    %cst_79 = arith.constant dense<0.000000e+00> : vector<8x96xf32>
    %439 = tpu.matmul %351, %13, %cst_79 {dimension_numbers = #tpu.dot_dimension_numbers<[1], [0], [0], [1], [0, 0, 1, 1], [], []>} : vector<8x32xf32>, vector<32x96xf32>, vector<8x96xf32> -> vector<8x96xf32>
    %440 = vector.extract_strided_slice %438 {offsets = [0, 0], sizes = [8, 64], strides = [1, 1]} : vector<8x96xf32> to vector<8x64xf32>
    %441 = vector.extract_strided_slice %439 {offsets = [0, 0], sizes = [8, 64], strides = [1, 1]} : vector<8x96xf32> to vector<8x64xf32>
    %442 = arith.addf %440, %441 : vector<8x64xf32>
    %443 = vector.broadcast %28 : vector<1x64xf32> to vector<8x64xf32>
    %444 = arith.addf %442, %443 : vector<8x64xf32>
    %445 = arith.negf %444 : vector<8x64xf32>
    %446 = math.exp %445 : vector<8x64xf32>
    %cst_80 = arith.constant 1.000000e+00 : f32
    %447 = vector.broadcast %cst_80 : f32 to vector<8x64xf32>
    %448 = arith.addf %447, %446 : vector<8x64xf32>
    %449 = arith.divf %447, %448 : vector<8x64xf32>
    %450 = vector.extract_strided_slice %449 {offsets = [0, 0], sizes = [8, 32], strides = [1, 1]} : vector<8x64xf32> to vector<8x32xf32>
    %451 = vector.extract_strided_slice %449 {offsets = [0, 32], sizes = [8, 32], strides = [1, 1]} : vector<8x64xf32> to vector<8x32xf32>
    %452 = vector.extract_strided_slice %438 {offsets = [0, 64], sizes = [8, 32], strides = [1, 1]} : vector<8x96xf32> to vector<8x32xf32>
    %453 = vector.broadcast %29 : vector<1x32xf32> to vector<8x32xf32>
    %454 = arith.addf %452, %453 : vector<8x32xf32>
    %455 = vector.extract_strided_slice %439 {offsets = [0, 64], sizes = [8, 32], strides = [1, 1]} : vector<8x96xf32> to vector<8x32xf32>
    %456 = vector.broadcast %30 : vector<1x32xf32> to vector<8x32xf32>
    %457 = arith.addf %455, %456 : vector<8x32xf32>
    %458 = arith.mulf %450, %457 : vector<8x32xf32>
    %459 = arith.addf %454, %458 : vector<8x32xf32>
    %460 = math.tanh %459 : vector<8x32xf32>
    %cst_81 = arith.constant 1.000000e+00 : f32
    %461 = vector.broadcast %cst_81 : f32 to vector<8x32xf32>
    %462 = arith.subf %461, %451 : vector<8x32xf32>
    %463 = arith.mulf %462, %460 : vector<8x32xf32>
    %464 = arith.mulf %451, %351 : vector<8x32xf32>
    %465 = arith.addf %463, %464 : vector<8x32xf32>
    %cst_82 = arith.constant dense<0.000000e+00> : vector<8x96xf32>
    %466 = tpu.matmul %437, %21, %cst_82 {dimension_numbers = #tpu.dot_dimension_numbers<[1], [0], [0], [1], [0, 0, 1, 1], [], []>} : vector<8x32xf32>, vector<32x96xf32>, vector<8x96xf32> -> vector<8x96xf32>
    %cst_83 = arith.constant dense<0.000000e+00> : vector<8x96xf32>
    %467 = tpu.matmul %379, %19, %cst_83 {dimension_numbers = #tpu.dot_dimension_numbers<[1], [0], [0], [1], [0, 0, 1, 1], [], []>} : vector<8x32xf32>, vector<32x96xf32>, vector<8x96xf32> -> vector<8x96xf32>
    %468 = vector.extract_strided_slice %466 {offsets = [0, 0], sizes = [8, 64], strides = [1, 1]} : vector<8x96xf32> to vector<8x64xf32>
    %469 = vector.extract_strided_slice %467 {offsets = [0, 0], sizes = [8, 64], strides = [1, 1]} : vector<8x96xf32> to vector<8x64xf32>
    %470 = arith.addf %468, %469 : vector<8x64xf32>
    %471 = vector.broadcast %34 : vector<1x64xf32> to vector<8x64xf32>
    %472 = arith.addf %470, %471 : vector<8x64xf32>
    %473 = arith.negf %472 : vector<8x64xf32>
    %474 = math.exp %473 : vector<8x64xf32>
    %cst_84 = arith.constant 1.000000e+00 : f32
    %475 = vector.broadcast %cst_84 : f32 to vector<8x64xf32>
    %476 = arith.addf %475, %474 : vector<8x64xf32>
    %477 = arith.divf %475, %476 : vector<8x64xf32>
    %478 = vector.extract_strided_slice %477 {offsets = [0, 0], sizes = [8, 32], strides = [1, 1]} : vector<8x64xf32> to vector<8x32xf32>
    %479 = vector.extract_strided_slice %477 {offsets = [0, 32], sizes = [8, 32], strides = [1, 1]} : vector<8x64xf32> to vector<8x32xf32>
    %480 = vector.extract_strided_slice %466 {offsets = [0, 64], sizes = [8, 32], strides = [1, 1]} : vector<8x96xf32> to vector<8x32xf32>
    %481 = vector.broadcast %35 : vector<1x32xf32> to vector<8x32xf32>
    %482 = arith.addf %480, %481 : vector<8x32xf32>
    %483 = vector.extract_strided_slice %467 {offsets = [0, 64], sizes = [8, 32], strides = [1, 1]} : vector<8x96xf32> to vector<8x32xf32>
    %484 = vector.broadcast %36 : vector<1x32xf32> to vector<8x32xf32>
    %485 = arith.addf %483, %484 : vector<8x32xf32>
    %486 = arith.mulf %478, %485 : vector<8x32xf32>
    %487 = arith.addf %482, %486 : vector<8x32xf32>
    %488 = math.tanh %487 : vector<8x32xf32>
    %cst_85 = arith.constant 1.000000e+00 : f32
    %489 = vector.broadcast %cst_85 : f32 to vector<8x32xf32>
    %490 = arith.subf %489, %479 : vector<8x32xf32>
    %491 = arith.mulf %490, %488 : vector<8x32xf32>
    %492 = arith.mulf %479, %379 : vector<8x32xf32>
    %493 = arith.addf %491, %492 : vector<8x32xf32>
    %494 = vector.extract_strided_slice %5 {offsets = [3, 0, 0], sizes = [1, 8, 96], strides = [1, 1, 1]} : vector<8x8x96xf32> to vector<1x8x96xf32>
    %495 = vector.shape_cast %494 : vector<1x8x96xf32> to vector<8x96xf32>
    %cst_86 = arith.constant dense<0.000000e+00> : vector<8x96xf32>
    %496 = tpu.matmul %408, %11, %cst_86 {dimension_numbers = #tpu.dot_dimension_numbers<[1], [0], [0], [1], [0, 0, 1, 1], [], []>} : vector<8x32xf32>, vector<32x96xf32>, vector<8x96xf32> -> vector<8x96xf32>
    %497 = vector.extract_strided_slice %495 {offsets = [0, 0], sizes = [8, 64], strides = [1, 1]} : vector<8x96xf32> to vector<8x64xf32>
    %498 = vector.extract_strided_slice %496 {offsets = [0, 0], sizes = [8, 64], strides = [1, 1]} : vector<8x96xf32> to vector<8x64xf32>
    %499 = arith.addf %497, %498 : vector<8x64xf32>
    %500 = vector.broadcast %25 : vector<1x64xf32> to vector<8x64xf32>
    %501 = arith.addf %499, %500 : vector<8x64xf32>
    %502 = arith.negf %501 : vector<8x64xf32>
    %503 = math.exp %502 : vector<8x64xf32>
    %cst_87 = arith.constant 1.000000e+00 : f32
    %504 = vector.broadcast %cst_87 : f32 to vector<8x64xf32>
    %505 = arith.addf %504, %503 : vector<8x64xf32>
    %506 = arith.divf %504, %505 : vector<8x64xf32>
    %507 = vector.extract_strided_slice %506 {offsets = [0, 0], sizes = [8, 32], strides = [1, 1]} : vector<8x64xf32> to vector<8x32xf32>
    %508 = vector.extract_strided_slice %506 {offsets = [0, 32], sizes = [8, 32], strides = [1, 1]} : vector<8x64xf32> to vector<8x32xf32>
    %509 = vector.extract_strided_slice %495 {offsets = [0, 64], sizes = [8, 32], strides = [1, 1]} : vector<8x96xf32> to vector<8x32xf32>
    %510 = vector.broadcast %26 : vector<1x32xf32> to vector<8x32xf32>
    %511 = arith.addf %509, %510 : vector<8x32xf32>
    %512 = vector.extract_strided_slice %496 {offsets = [0, 64], sizes = [8, 32], strides = [1, 1]} : vector<8x96xf32> to vector<8x32xf32>
    %513 = vector.broadcast %27 : vector<1x32xf32> to vector<8x32xf32>
    %514 = arith.addf %512, %513 : vector<8x32xf32>
    %515 = arith.mulf %507, %514 : vector<8x32xf32>
    %516 = arith.addf %511, %515 : vector<8x32xf32>
    %517 = math.tanh %516 : vector<8x32xf32>
    %cst_88 = arith.constant 1.000000e+00 : f32
    %518 = vector.broadcast %cst_88 : f32 to vector<8x32xf32>
    %519 = arith.subf %518, %508 : vector<8x32xf32>
    %520 = arith.mulf %519, %517 : vector<8x32xf32>
    %521 = arith.mulf %508, %408 : vector<8x32xf32>
    %522 = arith.addf %520, %521 : vector<8x32xf32>
    %523 = vector.extract_strided_slice %9 {offsets = [4, 0, 0], sizes = [1, 8, 96], strides = [1, 1, 1]} : vector<8x8x96xf32> to vector<1x8x96xf32>
    %524 = vector.shape_cast %523 : vector<1x8x96xf32> to vector<8x96xf32>
    %cst_89 = arith.constant dense<0.000000e+00> : vector<8x96xf32>
    %525 = tpu.matmul %437, %17, %cst_89 {dimension_numbers = #tpu.dot_dimension_numbers<[1], [0], [0], [1], [0, 0, 1, 1], [], []>} : vector<8x32xf32>, vector<32x96xf32>, vector<8x96xf32> -> vector<8x96xf32>
    %526 = vector.extract_strided_slice %524 {offsets = [0, 0], sizes = [8, 64], strides = [1, 1]} : vector<8x96xf32> to vector<8x64xf32>
    %527 = vector.extract_strided_slice %525 {offsets = [0, 0], sizes = [8, 64], strides = [1, 1]} : vector<8x96xf32> to vector<8x64xf32>
    %528 = arith.addf %526, %527 : vector<8x64xf32>
    %529 = vector.broadcast %31 : vector<1x64xf32> to vector<8x64xf32>
    %530 = arith.addf %528, %529 : vector<8x64xf32>
    %531 = arith.negf %530 : vector<8x64xf32>
    %532 = math.exp %531 : vector<8x64xf32>
    %cst_90 = arith.constant 1.000000e+00 : f32
    %533 = vector.broadcast %cst_90 : f32 to vector<8x64xf32>
    %534 = arith.addf %533, %532 : vector<8x64xf32>
    %535 = arith.divf %533, %534 : vector<8x64xf32>
    %536 = vector.extract_strided_slice %535 {offsets = [0, 0], sizes = [8, 32], strides = [1, 1]} : vector<8x64xf32> to vector<8x32xf32>
    %537 = vector.extract_strided_slice %535 {offsets = [0, 32], sizes = [8, 32], strides = [1, 1]} : vector<8x64xf32> to vector<8x32xf32>
    %538 = vector.extract_strided_slice %524 {offsets = [0, 64], sizes = [8, 32], strides = [1, 1]} : vector<8x96xf32> to vector<8x32xf32>
    %539 = vector.broadcast %32 : vector<1x32xf32> to vector<8x32xf32>
    %540 = arith.addf %538, %539 : vector<8x32xf32>
    %541 = vector.extract_strided_slice %525 {offsets = [0, 64], sizes = [8, 32], strides = [1, 1]} : vector<8x96xf32> to vector<8x32xf32>
    %542 = vector.broadcast %33 : vector<1x32xf32> to vector<8x32xf32>
    %543 = arith.addf %541, %542 : vector<8x32xf32>
    %544 = arith.mulf %536, %543 : vector<8x32xf32>
    %545 = arith.addf %540, %544 : vector<8x32xf32>
    %546 = math.tanh %545 : vector<8x32xf32>
    %cst_91 = arith.constant 1.000000e+00 : f32
    %547 = vector.broadcast %cst_91 : f32 to vector<8x32xf32>
    %548 = arith.subf %547, %537 : vector<8x32xf32>
    %549 = arith.mulf %548, %546 : vector<8x32xf32>
    %550 = arith.mulf %537, %437 : vector<8x32xf32>
    %551 = arith.addf %549, %550 : vector<8x32xf32>
    %cst_92 = arith.constant dense<0.000000e+00> : vector<8x96xf32>
    %552 = tpu.matmul %522, %15, %cst_92 {dimension_numbers = #tpu.dot_dimension_numbers<[1], [0], [0], [1], [0, 0, 1, 1], [], []>} : vector<8x32xf32>, vector<32x96xf32>, vector<8x96xf32> -> vector<8x96xf32>
    %cst_93 = arith.constant dense<0.000000e+00> : vector<8x96xf32>
    %553 = tpu.matmul %465, %13, %cst_93 {dimension_numbers = #tpu.dot_dimension_numbers<[1], [0], [0], [1], [0, 0, 1, 1], [], []>} : vector<8x32xf32>, vector<32x96xf32>, vector<8x96xf32> -> vector<8x96xf32>
    %554 = vector.extract_strided_slice %552 {offsets = [0, 0], sizes = [8, 64], strides = [1, 1]} : vector<8x96xf32> to vector<8x64xf32>
    %555 = vector.extract_strided_slice %553 {offsets = [0, 0], sizes = [8, 64], strides = [1, 1]} : vector<8x96xf32> to vector<8x64xf32>
    %556 = arith.addf %554, %555 : vector<8x64xf32>
    %557 = vector.broadcast %28 : vector<1x64xf32> to vector<8x64xf32>
    %558 = arith.addf %556, %557 : vector<8x64xf32>
    %559 = arith.negf %558 : vector<8x64xf32>
    %560 = math.exp %559 : vector<8x64xf32>
    %cst_94 = arith.constant 1.000000e+00 : f32
    %561 = vector.broadcast %cst_94 : f32 to vector<8x64xf32>
    %562 = arith.addf %561, %560 : vector<8x64xf32>
    %563 = arith.divf %561, %562 : vector<8x64xf32>
    %564 = vector.extract_strided_slice %563 {offsets = [0, 0], sizes = [8, 32], strides = [1, 1]} : vector<8x64xf32> to vector<8x32xf32>
    %565 = vector.extract_strided_slice %563 {offsets = [0, 32], sizes = [8, 32], strides = [1, 1]} : vector<8x64xf32> to vector<8x32xf32>
    %566 = vector.extract_strided_slice %552 {offsets = [0, 64], sizes = [8, 32], strides = [1, 1]} : vector<8x96xf32> to vector<8x32xf32>
    %567 = vector.broadcast %29 : vector<1x32xf32> to vector<8x32xf32>
    %568 = arith.addf %566, %567 : vector<8x32xf32>
    %569 = vector.extract_strided_slice %553 {offsets = [0, 64], sizes = [8, 32], strides = [1, 1]} : vector<8x96xf32> to vector<8x32xf32>
    %570 = vector.broadcast %30 : vector<1x32xf32> to vector<8x32xf32>
    %571 = arith.addf %569, %570 : vector<8x32xf32>
    %572 = arith.mulf %564, %571 : vector<8x32xf32>
    %573 = arith.addf %568, %572 : vector<8x32xf32>
    %574 = math.tanh %573 : vector<8x32xf32>
    %cst_95 = arith.constant 1.000000e+00 : f32
    %575 = vector.broadcast %cst_95 : f32 to vector<8x32xf32>
    %576 = arith.subf %575, %565 : vector<8x32xf32>
    %577 = arith.mulf %576, %574 : vector<8x32xf32>
    %578 = arith.mulf %565, %465 : vector<8x32xf32>
    %579 = arith.addf %577, %578 : vector<8x32xf32>
    %cst_96 = arith.constant dense<0.000000e+00> : vector<8x96xf32>
    %580 = tpu.matmul %551, %21, %cst_96 {dimension_numbers = #tpu.dot_dimension_numbers<[1], [0], [0], [1], [0, 0, 1, 1], [], []>} : vector<8x32xf32>, vector<32x96xf32>, vector<8x96xf32> -> vector<8x96xf32>
    %cst_97 = arith.constant dense<0.000000e+00> : vector<8x96xf32>
    %581 = tpu.matmul %493, %19, %cst_97 {dimension_numbers = #tpu.dot_dimension_numbers<[1], [0], [0], [1], [0, 0, 1, 1], [], []>} : vector<8x32xf32>, vector<32x96xf32>, vector<8x96xf32> -> vector<8x96xf32>
    %582 = vector.extract_strided_slice %580 {offsets = [0, 0], sizes = [8, 64], strides = [1, 1]} : vector<8x96xf32> to vector<8x64xf32>
    %583 = vector.extract_strided_slice %581 {offsets = [0, 0], sizes = [8, 64], strides = [1, 1]} : vector<8x96xf32> to vector<8x64xf32>
    %584 = arith.addf %582, %583 : vector<8x64xf32>
    %585 = vector.broadcast %34 : vector<1x64xf32> to vector<8x64xf32>
    %586 = arith.addf %584, %585 : vector<8x64xf32>
    %587 = arith.negf %586 : vector<8x64xf32>
    %588 = math.exp %587 : vector<8x64xf32>
    %cst_98 = arith.constant 1.000000e+00 : f32
    %589 = vector.broadcast %cst_98 : f32 to vector<8x64xf32>
    %590 = arith.addf %589, %588 : vector<8x64xf32>
    %591 = arith.divf %589, %590 : vector<8x64xf32>
    %592 = vector.extract_strided_slice %591 {offsets = [0, 0], sizes = [8, 32], strides = [1, 1]} : vector<8x64xf32> to vector<8x32xf32>
    %593 = vector.extract_strided_slice %591 {offsets = [0, 32], sizes = [8, 32], strides = [1, 1]} : vector<8x64xf32> to vector<8x32xf32>
    %594 = vector.extract_strided_slice %580 {offsets = [0, 64], sizes = [8, 32], strides = [1, 1]} : vector<8x96xf32> to vector<8x32xf32>
    %595 = vector.broadcast %35 : vector<1x32xf32> to vector<8x32xf32>
    %596 = arith.addf %594, %595 : vector<8x32xf32>
    %597 = vector.extract_strided_slice %581 {offsets = [0, 64], sizes = [8, 32], strides = [1, 1]} : vector<8x96xf32> to vector<8x32xf32>
    %598 = vector.broadcast %36 : vector<1x32xf32> to vector<8x32xf32>
    %599 = arith.addf %597, %598 : vector<8x32xf32>
    %600 = arith.mulf %592, %599 : vector<8x32xf32>
    %601 = arith.addf %596, %600 : vector<8x32xf32>
    %602 = math.tanh %601 : vector<8x32xf32>
    %cst_99 = arith.constant 1.000000e+00 : f32
    %603 = vector.broadcast %cst_99 : f32 to vector<8x32xf32>
    %604 = arith.subf %603, %593 : vector<8x32xf32>
    %605 = arith.mulf %604, %602 : vector<8x32xf32>
    %606 = arith.mulf %593, %493 : vector<8x32xf32>
    %607 = arith.addf %605, %606 : vector<8x32xf32>
    %608 = vector.extract_strided_slice %5 {offsets = [2, 0, 0], sizes = [1, 8, 96], strides = [1, 1, 1]} : vector<8x8x96xf32> to vector<1x8x96xf32>
    %609 = vector.shape_cast %608 : vector<1x8x96xf32> to vector<8x96xf32>
    %cst_100 = arith.constant dense<0.000000e+00> : vector<8x96xf32>
    %610 = tpu.matmul %522, %11, %cst_100 {dimension_numbers = #tpu.dot_dimension_numbers<[1], [0], [0], [1], [0, 0, 1, 1], [], []>} : vector<8x32xf32>, vector<32x96xf32>, vector<8x96xf32> -> vector<8x96xf32>
    %611 = vector.extract_strided_slice %609 {offsets = [0, 0], sizes = [8, 64], strides = [1, 1]} : vector<8x96xf32> to vector<8x64xf32>
    %612 = vector.extract_strided_slice %610 {offsets = [0, 0], sizes = [8, 64], strides = [1, 1]} : vector<8x96xf32> to vector<8x64xf32>
    %613 = arith.addf %611, %612 : vector<8x64xf32>
    %614 = vector.broadcast %25 : vector<1x64xf32> to vector<8x64xf32>
    %615 = arith.addf %613, %614 : vector<8x64xf32>
    %616 = arith.negf %615 : vector<8x64xf32>
    %617 = math.exp %616 : vector<8x64xf32>
    %cst_101 = arith.constant 1.000000e+00 : f32
    %618 = vector.broadcast %cst_101 : f32 to vector<8x64xf32>
    %619 = arith.addf %618, %617 : vector<8x64xf32>
    %620 = arith.divf %618, %619 : vector<8x64xf32>
    %621 = vector.extract_strided_slice %620 {offsets = [0, 0], sizes = [8, 32], strides = [1, 1]} : vector<8x64xf32> to vector<8x32xf32>
    %622 = vector.extract_strided_slice %620 {offsets = [0, 32], sizes = [8, 32], strides = [1, 1]} : vector<8x64xf32> to vector<8x32xf32>
    %623 = vector.extract_strided_slice %609 {offsets = [0, 64], sizes = [8, 32], strides = [1, 1]} : vector<8x96xf32> to vector<8x32xf32>
    %624 = vector.broadcast %26 : vector<1x32xf32> to vector<8x32xf32>
    %625 = arith.addf %623, %624 : vector<8x32xf32>
    %626 = vector.extract_strided_slice %610 {offsets = [0, 64], sizes = [8, 32], strides = [1, 1]} : vector<8x96xf32> to vector<8x32xf32>
    %627 = vector.broadcast %27 : vector<1x32xf32> to vector<8x32xf32>
    %628 = arith.addf %626, %627 : vector<8x32xf32>
    %629 = arith.mulf %621, %628 : vector<8x32xf32>
    %630 = arith.addf %625, %629 : vector<8x32xf32>
    %631 = math.tanh %630 : vector<8x32xf32>
    %cst_102 = arith.constant 1.000000e+00 : f32
    %632 = vector.broadcast %cst_102 : f32 to vector<8x32xf32>
    %633 = arith.subf %632, %622 : vector<8x32xf32>
    %634 = arith.mulf %633, %631 : vector<8x32xf32>
    %635 = arith.mulf %622, %522 : vector<8x32xf32>
    %636 = arith.addf %634, %635 : vector<8x32xf32>
    %637 = vector.extract_strided_slice %9 {offsets = [5, 0, 0], sizes = [1, 8, 96], strides = [1, 1, 1]} : vector<8x8x96xf32> to vector<1x8x96xf32>
    %638 = vector.shape_cast %637 : vector<1x8x96xf32> to vector<8x96xf32>
    %cst_103 = arith.constant dense<0.000000e+00> : vector<8x96xf32>
    %639 = tpu.matmul %551, %17, %cst_103 {dimension_numbers = #tpu.dot_dimension_numbers<[1], [0], [0], [1], [0, 0, 1, 1], [], []>} : vector<8x32xf32>, vector<32x96xf32>, vector<8x96xf32> -> vector<8x96xf32>
    %640 = vector.extract_strided_slice %638 {offsets = [0, 0], sizes = [8, 64], strides = [1, 1]} : vector<8x96xf32> to vector<8x64xf32>
    %641 = vector.extract_strided_slice %639 {offsets = [0, 0], sizes = [8, 64], strides = [1, 1]} : vector<8x96xf32> to vector<8x64xf32>
    %642 = arith.addf %640, %641 : vector<8x64xf32>
    %643 = vector.broadcast %31 : vector<1x64xf32> to vector<8x64xf32>
    %644 = arith.addf %642, %643 : vector<8x64xf32>
    %645 = arith.negf %644 : vector<8x64xf32>
    %646 = math.exp %645 : vector<8x64xf32>
    %cst_104 = arith.constant 1.000000e+00 : f32
    %647 = vector.broadcast %cst_104 : f32 to vector<8x64xf32>
    %648 = arith.addf %647, %646 : vector<8x64xf32>
    %649 = arith.divf %647, %648 : vector<8x64xf32>
    %650 = vector.extract_strided_slice %649 {offsets = [0, 0], sizes = [8, 32], strides = [1, 1]} : vector<8x64xf32> to vector<8x32xf32>
    %651 = vector.extract_strided_slice %649 {offsets = [0, 32], sizes = [8, 32], strides = [1, 1]} : vector<8x64xf32> to vector<8x32xf32>
    %652 = vector.extract_strided_slice %638 {offsets = [0, 64], sizes = [8, 32], strides = [1, 1]} : vector<8x96xf32> to vector<8x32xf32>
    %653 = vector.broadcast %32 : vector<1x32xf32> to vector<8x32xf32>
    %654 = arith.addf %652, %653 : vector<8x32xf32>
    %655 = vector.extract_strided_slice %639 {offsets = [0, 64], sizes = [8, 32], strides = [1, 1]} : vector<8x96xf32> to vector<8x32xf32>
    %656 = vector.broadcast %33 : vector<1x32xf32> to vector<8x32xf32>
    %657 = arith.addf %655, %656 : vector<8x32xf32>
    %658 = arith.mulf %650, %657 : vector<8x32xf32>
    %659 = arith.addf %654, %658 : vector<8x32xf32>
    %660 = math.tanh %659 : vector<8x32xf32>
    %cst_105 = arith.constant 1.000000e+00 : f32
    %661 = vector.broadcast %cst_105 : f32 to vector<8x32xf32>
    %662 = arith.subf %661, %651 : vector<8x32xf32>
    %663 = arith.mulf %662, %660 : vector<8x32xf32>
    %664 = arith.mulf %651, %551 : vector<8x32xf32>
    %665 = arith.addf %663, %664 : vector<8x32xf32>
    %cst_106 = arith.constant dense<0.000000e+00> : vector<8x96xf32>
    %666 = tpu.matmul %636, %15, %cst_106 {dimension_numbers = #tpu.dot_dimension_numbers<[1], [0], [0], [1], [0, 0, 1, 1], [], []>} : vector<8x32xf32>, vector<32x96xf32>, vector<8x96xf32> -> vector<8x96xf32>
    %cst_107 = arith.constant dense<0.000000e+00> : vector<8x96xf32>
    %667 = tpu.matmul %579, %13, %cst_107 {dimension_numbers = #tpu.dot_dimension_numbers<[1], [0], [0], [1], [0, 0, 1, 1], [], []>} : vector<8x32xf32>, vector<32x96xf32>, vector<8x96xf32> -> vector<8x96xf32>
    %668 = vector.extract_strided_slice %666 {offsets = [0, 0], sizes = [8, 64], strides = [1, 1]} : vector<8x96xf32> to vector<8x64xf32>
    %669 = vector.extract_strided_slice %667 {offsets = [0, 0], sizes = [8, 64], strides = [1, 1]} : vector<8x96xf32> to vector<8x64xf32>
    %670 = arith.addf %668, %669 : vector<8x64xf32>
    %671 = vector.broadcast %28 : vector<1x64xf32> to vector<8x64xf32>
    %672 = arith.addf %670, %671 : vector<8x64xf32>
    %673 = arith.negf %672 : vector<8x64xf32>
    %674 = math.exp %673 : vector<8x64xf32>
    %cst_108 = arith.constant 1.000000e+00 : f32
    %675 = vector.broadcast %cst_108 : f32 to vector<8x64xf32>
    %676 = arith.addf %675, %674 : vector<8x64xf32>
    %677 = arith.divf %675, %676 : vector<8x64xf32>
    %678 = vector.extract_strided_slice %677 {offsets = [0, 0], sizes = [8, 32], strides = [1, 1]} : vector<8x64xf32> to vector<8x32xf32>
    %679 = vector.extract_strided_slice %677 {offsets = [0, 32], sizes = [8, 32], strides = [1, 1]} : vector<8x64xf32> to vector<8x32xf32>
    %680 = vector.extract_strided_slice %666 {offsets = [0, 64], sizes = [8, 32], strides = [1, 1]} : vector<8x96xf32> to vector<8x32xf32>
    %681 = vector.broadcast %29 : vector<1x32xf32> to vector<8x32xf32>
    %682 = arith.addf %680, %681 : vector<8x32xf32>
    %683 = vector.extract_strided_slice %667 {offsets = [0, 64], sizes = [8, 32], strides = [1, 1]} : vector<8x96xf32> to vector<8x32xf32>
    %684 = vector.broadcast %30 : vector<1x32xf32> to vector<8x32xf32>
    %685 = arith.addf %683, %684 : vector<8x32xf32>
    %686 = arith.mulf %678, %685 : vector<8x32xf32>
    %687 = arith.addf %682, %686 : vector<8x32xf32>
    %688 = math.tanh %687 : vector<8x32xf32>
    %cst_109 = arith.constant 1.000000e+00 : f32
    %689 = vector.broadcast %cst_109 : f32 to vector<8x32xf32>
    %690 = arith.subf %689, %679 : vector<8x32xf32>
    %691 = arith.mulf %690, %688 : vector<8x32xf32>
    %692 = arith.mulf %679, %579 : vector<8x32xf32>
    %693 = arith.addf %691, %692 : vector<8x32xf32>
    %cst_110 = arith.constant dense<0.000000e+00> : vector<8x96xf32>
    %694 = tpu.matmul %665, %21, %cst_110 {dimension_numbers = #tpu.dot_dimension_numbers<[1], [0], [0], [1], [0, 0, 1, 1], [], []>} : vector<8x32xf32>, vector<32x96xf32>, vector<8x96xf32> -> vector<8x96xf32>
    %cst_111 = arith.constant dense<0.000000e+00> : vector<8x96xf32>
    %695 = tpu.matmul %607, %19, %cst_111 {dimension_numbers = #tpu.dot_dimension_numbers<[1], [0], [0], [1], [0, 0, 1, 1], [], []>} : vector<8x32xf32>, vector<32x96xf32>, vector<8x96xf32> -> vector<8x96xf32>
    %696 = vector.extract_strided_slice %694 {offsets = [0, 0], sizes = [8, 64], strides = [1, 1]} : vector<8x96xf32> to vector<8x64xf32>
    %697 = vector.extract_strided_slice %695 {offsets = [0, 0], sizes = [8, 64], strides = [1, 1]} : vector<8x96xf32> to vector<8x64xf32>
    %698 = arith.addf %696, %697 : vector<8x64xf32>
    %699 = vector.broadcast %34 : vector<1x64xf32> to vector<8x64xf32>
    %700 = arith.addf %698, %699 : vector<8x64xf32>
    %701 = arith.negf %700 : vector<8x64xf32>
    %702 = math.exp %701 : vector<8x64xf32>
    %cst_112 = arith.constant 1.000000e+00 : f32
    %703 = vector.broadcast %cst_112 : f32 to vector<8x64xf32>
    %704 = arith.addf %703, %702 : vector<8x64xf32>
    %705 = arith.divf %703, %704 : vector<8x64xf32>
    %706 = vector.extract_strided_slice %705 {offsets = [0, 0], sizes = [8, 32], strides = [1, 1]} : vector<8x64xf32> to vector<8x32xf32>
    %707 = vector.extract_strided_slice %705 {offsets = [0, 32], sizes = [8, 32], strides = [1, 1]} : vector<8x64xf32> to vector<8x32xf32>
    %708 = vector.extract_strided_slice %694 {offsets = [0, 64], sizes = [8, 32], strides = [1, 1]} : vector<8x96xf32> to vector<8x32xf32>
    %709 = vector.broadcast %35 : vector<1x32xf32> to vector<8x32xf32>
    %710 = arith.addf %708, %709 : vector<8x32xf32>
    %711 = vector.extract_strided_slice %695 {offsets = [0, 64], sizes = [8, 32], strides = [1, 1]} : vector<8x96xf32> to vector<8x32xf32>
    %712 = vector.broadcast %36 : vector<1x32xf32> to vector<8x32xf32>
    %713 = arith.addf %711, %712 : vector<8x32xf32>
    %714 = arith.mulf %706, %713 : vector<8x32xf32>
    %715 = arith.addf %710, %714 : vector<8x32xf32>
    %716 = math.tanh %715 : vector<8x32xf32>
    %cst_113 = arith.constant 1.000000e+00 : f32
    %717 = vector.broadcast %cst_113 : f32 to vector<8x32xf32>
    %718 = arith.subf %717, %707 : vector<8x32xf32>
    %719 = arith.mulf %718, %716 : vector<8x32xf32>
    %720 = arith.mulf %707, %607 : vector<8x32xf32>
    %721 = arith.addf %719, %720 : vector<8x32xf32>
    %722 = vector.extract_strided_slice %9 {offsets = [6, 0, 0], sizes = [1, 8, 96], strides = [1, 1, 1]} : vector<8x8x96xf32> to vector<1x8x96xf32>
    %723 = vector.shape_cast %722 : vector<1x8x96xf32> to vector<8x96xf32>
    %cst_114 = arith.constant dense<0.000000e+00> : vector<8x96xf32>
    %724 = tpu.matmul %665, %17, %cst_114 {dimension_numbers = #tpu.dot_dimension_numbers<[1], [0], [0], [1], [0, 0, 1, 1], [], []>} : vector<8x32xf32>, vector<32x96xf32>, vector<8x96xf32> -> vector<8x96xf32>
    %725 = vector.extract_strided_slice %723 {offsets = [0, 0], sizes = [8, 64], strides = [1, 1]} : vector<8x96xf32> to vector<8x64xf32>
    %726 = vector.extract_strided_slice %724 {offsets = [0, 0], sizes = [8, 64], strides = [1, 1]} : vector<8x96xf32> to vector<8x64xf32>
    %727 = arith.addf %725, %726 : vector<8x64xf32>
    %728 = vector.broadcast %31 : vector<1x64xf32> to vector<8x64xf32>
    %729 = arith.addf %727, %728 : vector<8x64xf32>
    %730 = arith.negf %729 : vector<8x64xf32>
    %731 = math.exp %730 : vector<8x64xf32>
    %cst_115 = arith.constant 1.000000e+00 : f32
    %732 = vector.broadcast %cst_115 : f32 to vector<8x64xf32>
    %733 = arith.addf %732, %731 : vector<8x64xf32>
    %734 = arith.divf %732, %733 : vector<8x64xf32>
    %735 = vector.extract_strided_slice %734 {offsets = [0, 0], sizes = [8, 32], strides = [1, 1]} : vector<8x64xf32> to vector<8x32xf32>
    %736 = vector.extract_strided_slice %734 {offsets = [0, 32], sizes = [8, 32], strides = [1, 1]} : vector<8x64xf32> to vector<8x32xf32>
    %737 = vector.extract_strided_slice %723 {offsets = [0, 64], sizes = [8, 32], strides = [1, 1]} : vector<8x96xf32> to vector<8x32xf32>
    %738 = vector.broadcast %32 : vector<1x32xf32> to vector<8x32xf32>
    %739 = arith.addf %737, %738 : vector<8x32xf32>
    %740 = vector.extract_strided_slice %724 {offsets = [0, 64], sizes = [8, 32], strides = [1, 1]} : vector<8x96xf32> to vector<8x32xf32>
    %741 = vector.broadcast %33 : vector<1x32xf32> to vector<8x32xf32>
    %742 = arith.addf %740, %741 : vector<8x32xf32>
    %743 = arith.mulf %735, %742 : vector<8x32xf32>
    %744 = arith.addf %739, %743 : vector<8x32xf32>
    %745 = math.tanh %744 : vector<8x32xf32>
    %cst_116 = arith.constant 1.000000e+00 : f32
    %746 = vector.broadcast %cst_116 : f32 to vector<8x32xf32>
    %747 = arith.subf %746, %736 : vector<8x32xf32>
    %748 = arith.mulf %747, %745 : vector<8x32xf32>
    %749 = arith.mulf %736, %665 : vector<8x32xf32>
    %750 = arith.addf %748, %749 : vector<8x32xf32>
    %cst_117 = arith.constant dense<0.000000e+00> : vector<8x96xf32>
    %751 = tpu.matmul %750, %21, %cst_117 {dimension_numbers = #tpu.dot_dimension_numbers<[1], [0], [0], [1], [0, 0, 1, 1], [], []>} : vector<8x32xf32>, vector<32x96xf32>, vector<8x96xf32> -> vector<8x96xf32>
    %cst_118 = arith.constant dense<0.000000e+00> : vector<8x96xf32>
    %752 = tpu.matmul %721, %19, %cst_118 {dimension_numbers = #tpu.dot_dimension_numbers<[1], [0], [0], [1], [0, 0, 1, 1], [], []>} : vector<8x32xf32>, vector<32x96xf32>, vector<8x96xf32> -> vector<8x96xf32>
    %753 = vector.extract_strided_slice %751 {offsets = [0, 0], sizes = [8, 64], strides = [1, 1]} : vector<8x96xf32> to vector<8x64xf32>
    %754 = vector.extract_strided_slice %752 {offsets = [0, 0], sizes = [8, 64], strides = [1, 1]} : vector<8x96xf32> to vector<8x64xf32>
    %755 = arith.addf %753, %754 : vector<8x64xf32>
    %756 = vector.broadcast %34 : vector<1x64xf32> to vector<8x64xf32>
    %757 = arith.addf %755, %756 : vector<8x64xf32>
    %758 = arith.negf %757 : vector<8x64xf32>
    %759 = math.exp %758 : vector<8x64xf32>
    %cst_119 = arith.constant 1.000000e+00 : f32
    %760 = vector.broadcast %cst_119 : f32 to vector<8x64xf32>
    %761 = arith.addf %760, %759 : vector<8x64xf32>
    %762 = arith.divf %760, %761 : vector<8x64xf32>
    %763 = vector.extract_strided_slice %762 {offsets = [0, 0], sizes = [8, 32], strides = [1, 1]} : vector<8x64xf32> to vector<8x32xf32>
    %764 = vector.extract_strided_slice %762 {offsets = [0, 32], sizes = [8, 32], strides = [1, 1]} : vector<8x64xf32> to vector<8x32xf32>
    %765 = vector.extract_strided_slice %751 {offsets = [0, 64], sizes = [8, 32], strides = [1, 1]} : vector<8x96xf32> to vector<8x32xf32>
    %766 = vector.broadcast %35 : vector<1x32xf32> to vector<8x32xf32>
    %767 = arith.addf %765, %766 : vector<8x32xf32>
    %768 = vector.extract_strided_slice %752 {offsets = [0, 64], sizes = [8, 32], strides = [1, 1]} : vector<8x96xf32> to vector<8x32xf32>
    %769 = vector.broadcast %36 : vector<1x32xf32> to vector<8x32xf32>
    %770 = arith.addf %768, %769 : vector<8x32xf32>
    %771 = arith.mulf %763, %770 : vector<8x32xf32>
    %772 = arith.addf %767, %771 : vector<8x32xf32>
    %773 = math.tanh %772 : vector<8x32xf32>
    %cst_120 = arith.constant 1.000000e+00 : f32
    %774 = vector.broadcast %cst_120 : f32 to vector<8x32xf32>
    %775 = arith.subf %774, %764 : vector<8x32xf32>
    %776 = arith.mulf %775, %773 : vector<8x32xf32>
    %777 = arith.mulf %764, %721 : vector<8x32xf32>
    %778 = arith.addf %776, %777 : vector<8x32xf32>
    %779 = vector.shape_cast %151 : vector<8x32xf32> to vector<1x8x32xf32>
    %780 = vector.shape_cast %265 : vector<8x32xf32> to vector<1x8x32xf32>
    %781 = vector.shape_cast %379 : vector<8x32xf32> to vector<1x8x32xf32>
    %782 = vector.shape_cast %493 : vector<8x32xf32> to vector<1x8x32xf32>
    %783 = vector.shape_cast %607 : vector<8x32xf32> to vector<1x8x32xf32>
    %784 = vector.shape_cast %721 : vector<8x32xf32> to vector<1x8x32xf32>
    %785 = vector.shape_cast %778 : vector<8x32xf32> to vector<1x8x32xf32>
    %786 = tpu.concatenate %779, %780, %781, %782, %783, %784, %785 in 0 : vector<1x8x32xf32>, vector<1x8x32xf32>, vector<1x8x32xf32>, vector<1x8x32xf32>, vector<1x8x32xf32>, vector<1x8x32xf32>, vector<1x8x32xf32> -> vector<7x8x32xf32>
    %787 = vector.shape_cast %786 : vector<7x8x32xf32> to vector<56x32xf32>
    %788 = vector.shape_cast %693 : vector<8x32xf32> to vector<1x8x32xf32>
    %789 = vector.shape_cast %579 : vector<8x32xf32> to vector<1x8x32xf32>
    %790 = vector.shape_cast %465 : vector<8x32xf32> to vector<1x8x32xf32>
    %791 = vector.shape_cast %351 : vector<8x32xf32> to vector<1x8x32xf32>
    %792 = vector.shape_cast %237 : vector<8x32xf32> to vector<1x8x32xf32>
    %793 = vector.shape_cast %123 : vector<8x32xf32> to vector<1x8x32xf32>
    %794 = vector.shape_cast %37 : vector<8x32xf32> to vector<1x8x32xf32>
    %795 = tpu.concatenate %788, %789, %790, %791, %792, %793, %794 in 0 : vector<1x8x32xf32>, vector<1x8x32xf32>, vector<1x8x32xf32>, vector<1x8x32xf32>, vector<1x8x32xf32>, vector<1x8x32xf32>, vector<1x8x32xf32> -> vector<7x8x32xf32>
    %796 = vector.shape_cast %795 : vector<7x8x32xf32> to vector<56x32xf32>
    %c0_121 = arith.constant 0 : index
    %c0_122 = arith.constant 0 : index
    %797 = vector.load %arg8[%c0_121, %c0_122] : memref<64x64xf32, #tpu.memory_space<vmem>>, vector<32x64xf32>
    %cst_123 = arith.constant dense<0.000000e+00> : vector<56x64xf32>
    %798 = tpu.matmul %787, %797, %cst_123 {dimension_numbers = #tpu.dot_dimension_numbers<[1], [0], [0], [1], [0, 0, 1, 1], [], []>} : vector<56x32xf32>, vector<32x64xf32>, vector<56x64xf32> -> vector<56x64xf32>
    %c32 = arith.constant 32 : index
    %c0_124 = arith.constant 0 : index
    %799 = vector.load %arg8[%c32, %c0_124] : memref<64x64xf32, #tpu.memory_space<vmem>>, vector<32x64xf32>
    %cst_125 = arith.constant dense<0.000000e+00> : vector<56x64xf32>
    %800 = tpu.matmul %796, %799, %cst_125 {dimension_numbers = #tpu.dot_dimension_numbers<[1], [0], [0], [1], [0, 0, 1, 1], [], []>} : vector<56x32xf32>, vector<32x64xf32>, vector<56x64xf32> -> vector<56x64xf32>
    %801 = arith.addf %798, %800 : vector<56x64xf32>
    %c0_126 = arith.constant 0 : index
    %c0_127 = arith.constant 0 : index
    %802 = vector.load %arg9[%c0_126, %c0_127] : memref<1x64xf32, #tpu.memory_space<vmem>>, vector<1x64xf32>
    %803 = vector.broadcast %802 : vector<1x64xf32> to vector<56x64xf32>
    %804 = arith.addf %801, %803 : vector<56x64xf32>
    %cst_128 = arith.constant 0.000000e+00 : f32
    %805 = vector.broadcast %cst_128 : f32 to vector<56x64xf32>
    %806 = arith.maximumf %804, %805 : vector<56x64xf32>
    %c0_129 = arith.constant 0 : index
    %c0_130 = arith.constant 0 : index
    %807 = vector.load %arg10[%c0_129, %c0_130] : memref<64x8xf32, #tpu.memory_space<vmem>>, vector<64x8xf32>
    %cst_131 = arith.constant dense<0.000000e+00> : vector<56x8xf32>
    %808 = tpu.matmul %806, %807, %cst_131 {dimension_numbers = #tpu.dot_dimension_numbers<[1], [0], [0], [1], [0, 0, 1, 1], [], []>} : vector<56x64xf32>, vector<64x8xf32>, vector<56x8xf32> -> vector<56x8xf32>
    %c0_132 = arith.constant 0 : index
    %c0_133 = arith.constant 0 : index
    %809 = vector.load %arg11[%c0_132, %c0_133] : memref<1x8xf32, #tpu.memory_space<vmem>>, vector<1x8xf32>
    %810 = vector.broadcast %809 : vector<1x8xf32> to vector<56x8xf32>
    %811 = arith.addf %808, %810 : vector<56x8xf32>
    %812 = vector.shape_cast %811 : vector<56x8xf32> to vector<7x8x8xf32>
    %813 = vector.extract_strided_slice %0 {offsets = [1, 0, 0], sizes = [7, 8, 8], strides = [1, 1, 1]} : vector<8x8x8xf32> to vector<7x8x8xf32>
    %814 = arith.subf %812, %813 : vector<7x8x8xf32>
    %815 = arith.mulf %814, %814 : vector<7x8x8xf32>
    %816 = tpu.iota {dimensions = array<i32: 1>} : vector<7x8x8xi32>
    %c4_i32 = arith.constant 4 : i32
    %817 = vector.broadcast %c4_i32 : i32 to vector<7x8x8xi32>
    %818 = arith.cmpi slt, %816, %817 : vector<7x8x8xi32>
    %cst_134 = arith.constant 0.000000e+00 : f32
    %819 = vector.broadcast %cst_134 : f32 to vector<7x8x8xf32>
    %820 = arith.select %818, %815, %819 : vector<7x8x8xi1>, vector<7x8x8xf32>
    %821 = vector.shape_cast %820 : vector<7x8x8xf32> to vector<56x8xf32>
    %822 = vector.shape_cast %821 : vector<56x8xf32> to vector<1x56x8xf32>
    %cst_135 = arith.constant dense<0.000000e+00> : vector<1xf32>
    %823 = vector.multi_reduction <add>, %822, %cst_135 [1, 2] : vector<1x56x8xf32> to vector<1xf32>
    %824 = vector.shape_cast %823 : vector<1xf32> to vector<1x1x1xf32>
    %825 = vector.extract %824[0, 0, 0] : f32 from vector<1x1x1xf32>
    %826 = vector.broadcast %825 : f32 to vector<1x1xf32>
    %cst_136 = arith.constant 0.0357142873 : f32
    %827 = vector.broadcast %cst_136 : f32 to vector<1x1xf32>
    %828 = arith.mulf %826, %827 : vector<1x1xf32>
    %c0_137 = arith.constant 0 : index
    %c0_138 = arith.constant 0 : index
    %829 = vector.load %arg12[%c0_137, %c0_138] : memref<1x1xf32, #tpu.memory_space<vmem>>, vector<1x1xf32>
    tpu.vector_store %arg12[%c0_137, %c0_138], %828 {strides = array<i32>} : memref<1x1xf32, #tpu.memory_space<vmem>>, vector<1x1xf32>,
    return
  }
}

</mosaic_0001>

<bundles_post_ra>
// kernel: tpu_custom_call.1
= control target key start
LH: loop header
LB: loop body
LE: loop exit
PB: predicated region body
PF: predicated region fallthrough
CT: control target
= control target key end

     0   :  { %17 = vsyncpa [#allocation3], 0  ;;  %s7143_s0 = inlined_call_operand.vmem [shape: f32[8,8,9], index: 0, kind: input, shape index: {}]   ;;  %s7144_s1 = inlined_call_operand.hbm [shape: f32[8,8,8], index: 1, kind: input, shape index: {}]   ;;  %s7145_s2 = inlined_call_operand.hbm [shape: f32[9,96], index: 2, kind: input, shape index: {}]   ;;  %s7146_s3 = inlined_call_operand.vmem [shape: f32[8,96], index: 3, kind: input, shape index: {}]   ;;  %s7147_s4 = inlined_call_operand.hbm [shape: f32[6,32,96], index: 4, kind: input, shape index: {}]   ;;  %s7148_s5 = inlined_call_operand.vmem [shape: f32[4,64], index: 5, kind: input, shape index: {}]   ;;  %s7149_s6 = inlined_call_operand.vmem [shape: f32[4,32], index: 6, kind: input, shape index: {}]   ;;  %s7150_s7 = inlined_call_operand.vmem [shape: f32[4,32], index: 7, kind: input, shape index: {}]   ;;  %s7151_s8 = inlined_call_operand.hbm [shape: f32[64,64], index: 8, kind: input, shape index: {}]   ;;  %s7152_s9 = inlined_call_operand.vmem [shape: f32[1,64], index: 9, kind: input, shape index: {}]   ;;  %s7153_s10 = inlined_call_operand.vmem [shape: f32[64,8], index: 10, kind: input, shape index: {}]   ;;  %s7154_s11 = inlined_call_operand.vmem [shape: f32[1,8], index: 11, kind: input, shape index: {}]   ;;  %s7155_s12 = inlined_call_operand.hbm [shape: f32[1,1], index: 12, kind: output, shape index: {}]  }
   0x1   :  { %18 = vsyncpa [#allocation6], 0 }
   0x2   :  { %19 = vsyncpa [#allocation9], 0 }
   0x3   :  { %20 = vsyncpa [#allocation4], 0  ;;  %s6014_s21 = smov [#allocation5]   ;;  %s6015_s23 = smov [#allocation2]  }
   0x4   :  { %s40_s22 = sshll.u32 %s6014_s21, 4  ;;  %s28_s24 = sshll.u32 %s6015_s23, 4  ;;  %s41_s22 = int_to_ptr.vmem [resolvable:$true] %s40_s22  ;;  %s6092_s24 = int_to_ptr.vmem [resolvable:$true] %s28_s24 }
   0x5   :  { %s5896_s27 = scalar_lea.hbm %s7145_s2, 256 }
   0x6   :  { %p5897_p0 = scmp.ne.s32.totalorder %s7145_s2, %s5896_s27  ;;  %p5900_p1 = scmp.lt.u32.totalorder %s5896_s27, %s7145_s2 }
   0x8   :  { %p5902_p2 = pnand %p5900_p1, %p5897_p0 }
   0xa   :  { %5905 = shalt.err (!%p5902_p2)
}
   0xb   :  { %s5906_s14 = scalar_lea.vmem %s41_s22, 256  ;;  %p5911_p4 = scmp.lt.s32.totalorder %s41_s22, %s41_s22 }
   0xc   :  { %p5907_p3 = scmp.ne.s32.totalorder %s41_s22, %s5906_s14  ;;  %p5912_p5 = scmp.lt.s32.totalorder %s5906_s14, %s5906_s14 }
   0xe   :  { %p5913_p6 = por %p5912_p5, %p5911_p4 }
  0x10   :  { %p5914_p7 = pnand %p5913_p6, %p5907_p3 }
  0x12   :  { %5917 = shalt.err (!%p5914_p7)
}
  0x13   :  { %s6016_s15 = smov 128   ;;  %s6017_s16 = smov 8  }
  0x14   :  { %46 = dma.hbm_to_vmem [thread:$0]  %s7145_s2, 256, %s41_s22, [#allocation6], %s6016_s15, %s6016_s15, %s6017_s16  }
  0x15   :  { %s5918_s21 = scalar_lea.hbm %s7144_s1, 1024 }
  0x16   :  { %p5919_p8 = scmp.ne.s32.totalorder %s7144_s1, %s5918_s21  ;;  %p5922_p9 = scmp.lt.u32.totalorder %s5918_s21, %s7144_s1 }
  0x18   :  { %p5924_p10 = pnand %p5922_p9, %p5919_p8 }
  0x1a   :  { %5927 = shalt.err (!%p5924_p10)
}
  0x1b   :  { %s5928_s28 = scalar_lea.vmem %s6092_s24, 1024  ;;  %p5933_p12 = scmp.lt.s32.totalorder %s6092_s24, %s6092_s24 }
  0x1c   :  { %p5929_p11 = scmp.ne.s32.totalorder %s6092_s24, %s5928_s28  ;;  %p5934_p13 = scmp.lt.s32.totalorder %s5928_s28, %s5928_s28 }
  0x1e   :  { %p5935_p0 = por %p5934_p13, %p5933_p12 }
  0x20   :  { %p5936_p1 = pnand %p5935_p0, %p5929_p11 }
  0x22   :  { %5939 = shalt.err (!%p5936_p1)
}
  0x23   :  { %34 = dma.hbm_to_vmem [thread:$0]  %s7144_s1, 1024, %s6092_s24, [#allocation3], %s6016_s15, %s6016_s15, %s6017_s16  }
  0x24   :  { %s6018_s29 = smov [#allocation7]   ;;  %s6019_s13 = smov [#allocation8]  }
  0x25   :  { %s54_s30 = sshll.u32 %s6018_s29, 4  ;;  %s72_s14 = sshll.u32 %s6019_s13, 4  ;;  %s55_s30 = int_to_ptr.vmem [resolvable:$true] %s54_s30  ;;  %s6129_s14 = int_to_ptr.vmem [resolvable:$true] %s72_s14 }
  0x26   :  { %s5940_s19 = scalar_lea.hbm %s7147_s4, 3072 }
  0x27   :  { %p5941_p2 = scmp.ne.s32.totalorder %s7147_s4, %s5940_s19  ;;  %p5944_p3 = scmp.lt.u32.totalorder %s5940_s19, %s7147_s4 }
  0x29   :  { %p5946_p4 = pnand %p5944_p3, %p5941_p2 }
  0x2b   :  { %5949 = shalt.err (!%p5946_p4)
}
  0x2c   :  { %s5950_s1 = scalar_lea.vmem %s55_s30, 3072  ;;  %p5955_p6 = scmp.lt.s32.totalorder %s55_s30, %s55_s30 }
  0x2d   :  { %p5951_p5 = scmp.ne.s32.totalorder %s55_s30, %s5950_s1  ;;  %p5956_p7 = scmp.lt.s32.totalorder %s5950_s1, %s5950_s1 }
  0x2f   :  { %p5957_p8 = por %p5956_p7, %p5955_p6 }
  0x31   :  { %p5958_p9 = pnand %p5957_p8, %p5951_p5 }
  0x33   :  { %5961 = shalt.err (!%p5958_p9)
}
  0x34   :  { %60 = dma.hbm_to_vmem [thread:$0]  %s7147_s4, 3072, %s55_s30, [#allocation6], %s6016_s15, %s6016_s15, %s6017_s16  }
  0x35   :  { %s5962_s2 = scalar_lea.hbm %s7151_s8, 1024 }
  0x36   :  { %p5963_p10 = scmp.ne.s32.totalorder %s7151_s8, %s5962_s2  ;;  %p5966_p11 = scmp.lt.u32.totalorder %s5962_s2, %s7151_s8 }
  0x38   :  { %p5968_p12 = pnand %p5966_p11, %p5963_p10 }
  0x3a   :  { %5971 = shalt.err (!%p5968_p12)
}
  0x3b   :  { %s5972_s18 = scalar_lea.vmem %s6129_s14, 1024  ;;  %p5977_p0 = scmp.lt.s32.totalorder %s6129_s14, %s6129_s14 }
  0x3c   :  { %p5973_p13 = scmp.ne.s32.totalorder %s6129_s14, %s5972_s18  ;;  %p5978_p1 = scmp.lt.s32.totalorder %s5972_s18, %s5972_s18 }
  0x3e   :  { %p5979_p2 = por %p5978_p1, %p5977_p0 }
  0x40   :  { %p5980_p3 = pnand %p5979_p2, %p5973_p13 }
  0x42   :  { %5983 = shalt.err (!%p5980_p3)
}
  0x43   :  { %78 = dma.hbm_to_vmem [thread:$0]  %s7151_s8, 1024, %s6129_s14, [#allocation9], %s6016_s15, %s6016_s15, %s6017_s16  }
  0x44   :  { %6006 = dma.done.wait [#allocation3], 1024  }
  0x45   :  { %6007 = vsyncadd [#allocation3], 4294966272 }
  0x46   :  { %6008 = dma.done.wait [#allocation6], 3328  }
  0x47   :  { %6009 = vsyncadd [#allocation6], 4294963968 }
  0x48   :  { %6010 = dma.done.wait [#allocation9], 1024  }
  0x49   :  { %6011 = vsyncadd [#allocation9], 4294966272  ;;  %vm140_vm0 = vcmask 1040384   ;;  %vm248_vm1 = vcmask 64512   ;;  %v484_v0 = vlaneseq  ;;  %vm6020_vm2 = vmmov 1   ;;  %v247_v2 = vld [vmem:[%s7146_s3] sm:$0xff] }
  0x4a   :  { %vm6166_vm3 = vmpackc.low %vm140_vm0, %vm6020_vm2  ;;  %v97_v3 = vld [vmem:[#allocation2] sm:$0xff]  ;;  %4912 = vmatprep.subr.mxu1 %v247_v2  ;;  %v114_v5 = vld [vmem:[#allocation5 + $0x8] sm:$0x1]  ;;  %vm115_vm4 = vcmask 72704   ;;  %v6021_v12 = vmov 0.0|0.0   ;;  %s6022_s2 = smov 64  }
  0x4b   :  { %v113_v4 = vld [vmem:[#allocation5] sm:$0xff]  ;;  %4914 = vmatprep.mubr.msk.f32.mxu1 %vm248_vm1, %v97_v3  ;;  %v98_v6 = vld [vmem:[#allocation2 + $0x8] sm:$0xff]  ;;  %v377_v7 = vld [vmem:[#allocation7] sm:$0xff]  ;;  %4913 = vmatpush3.msra.mxu1 %v247_v2  ;;  %v6177_v11 = vshrl.u32 %v484_v0, 7  ;;  %vm6023_vm5 = vmmov 0   ;;  %v6024_v41 = vmov 0.0  }
  0x4c   :  { %v5450_v8 = vpack.c.bf16 %v114_v5, %v113_v4  ;;  %v378_v9 = vld [vmem:[#allocation7 + $0x8] sm:$0xff]  ;;  %v105_v10 = vld [vmem:[%s7143_s0] sm:$0xff]  ;;  %4915 = vmatmul.mubr.msk.f32.vlgmr.msra.gmra.mrb[0].mxu1 %vm248_vm1, %v98_v6  ;;  %5456 = vmatprep.subr.bf16.mxu1 %v6021_v12  ;;  %v99_v14 = vld [vmem:[#allocation2 + $0x10] sm:$0xff]  ;;  %vm409_vm6 = vcmask 261120   ;;  %vm4355_vm7 = vcmask 523264   ;;  %vm4525_vm9 = vcmask 0  }
  0x4d   :  { %v6181_v13 = vpack.c.bf16 %v378_v9, %v377_v7  ;;  %4900 = vmatprep.mubr.msk.f32.mxu0 %vm115_vm4, %v105_v10  ;;  %v106_v15 = vld [vmem:[%s7143_s0 + $0x8] sm:$0xff]  ;;  %v100_v16 = vld [vmem:[#allocation2 + $0x18] sm:$0xff]  ;;  %v101_v17 = vld [vmem:[#allocation2 + $0x20] sm:$0xff]  ;;  %4917 = vmatprep.mubr.msk.f32.mxu1 %vm248_vm1, %v99_v14  ;;  %v6200_v24 = vsub.s32 0, %v6177_v11  ;;  %v6219_v32 = vsub.s32 2, %v6177_v11  ;;  %vm4493_vm8 = vcmp.lt.s32.totalorder %v6177_v11, 4 }
  0x4e   :  { %5452 = vmatprep.subr.msk.bf16.mxu0 %vm6166_vm3, %v5450_v8  ;;  %v379_v18 = vld [vmem:[#allocation7 + $0x10] sm:$0xff]  ;;  %v380_v19 = vld [vmem:[#allocation7 + $0x18] sm:$0xff]  ;;  %v392_v20 = vld [vmem:[#allocation7 + $0x60] sm:$0xff] }
  0x4f   :  { %5455 = vmatpush3.bf16.msk.msra.mxu0 %vm6166_vm3, %v5450_v8  ;;  %5458 = vmatpush3.bf16.msra.mxu1 %v6181_v13  ;;  %v107_v21 = vld [vmem:[%s7143_s0 + $0x10] sm:$0xff]  ;;  %v6197_v22 = vpack.c.bf16 %v380_v19, %v379_v18  ;;  %v393_v23 = vld [vmem:[#allocation7 + $0x68] sm:$0xff]  ;;  %v102_v26 = vld [vmem:[#allocation2 + $0x28] sm:$0xff] }
  0x50   :  { %5459 = vmatprep.subr.bf16.mxu1 %v6021_v12  ;;  %4918 = vmatmul.mubr.msk.f32.gmra.mrb[2].mxu1 %vm248_vm1, %v100_v16  ;;  %v6204_v25 = vpack.c.bf16 %v393_v23, %v392_v20  ;;  %v394_v27 = vld [vmem:[#allocation7 + $0x70] sm:$0xff]  ;;  %v395_v28 = vld [vmem:[#allocation7 + $0x78] sm:$0xff]  ;;  %v108_v29 = vld [vmem:[%s7143_s0 + $0x18] sm:$0xff] }
  0x51   :  { %5462 = vmatprep.subr.bf16.mxu0 %v6021_v12  ;;  %4920 = vmatprep.mubr.msk.f32.mxu1 %vm248_vm1, %v101_v17  ;;  %v103_v30 = vld [vmem:[#allocation2 + $0x30] sm:$0xff]  ;;  %v6216_v31 = vld [vmem:[%s7150_s7] sm:$0xf]  ;;  %v6225_v34 = vpack.c.bf16 %v395_v28, %v394_v27  ;;  %v104_v36 = vld [vmem:[#allocation2 + $0x38] sm:$0xff] }
  0x52   :  { %4901 = vmatmul.mubr.msk.f32.vlgmr.msra.gmra.mrb[0].mxu0 %vm115_vm4, %v106_v15  ;;  %v109_v33 = vld [vmem:[%s7143_s0 + $0x20] sm:$0xff]  ;;  %v507_v35 = vrot.slane %v6216_v31, %v6200_v24  ;;  %v110_v37 = vld [vmem:[%s7143_s0 + $0x28] sm:$0xff]  ;;  %v626_v38 = vrot.slane %v6216_v31, %v6219_v32  ;;  %v111_v39 = vld [vmem:[%s7143_s0 + $0x30] sm:$0xff] }
  0x53   :  { %4903 = vmatprep.mubr.msk.f32.mxu0 %vm115_vm4, %v107_v21  ;;  %5461 = vmatpush3.bf16.msra.mxu1 %v6197_v22  ;;  %v6247_v40 = vld [vmem:[%s7149_s6] sm:$0xf]  ;;  %v112_v42 = vld [vmem:[%s7143_s0 + $0x38] sm:$0xff] }
  0x54   :  { %5464 = vmatpush3.bf16.msra.mxu0 %v6204_v25  ;;  %4921 = vmatmul.mubr.msk.f32.gmra.mrb[4].mxu1 %vm248_vm1, %v102_v26  ;;  %v498_v43 = vrot.slane %v6247_v40, %v6200_v24  ;;  %v617_v44 = vrot.slane %v6247_v40, %v6219_v32  ;;  %v6314_v7 = vld [vmem:[%s7148_s5] sm:$0xf]  ;;  %s6025_s5 = smov 96  }
  0x55   :  { %5465 = vmatprep.subr.bf16.mxu0 %v6021_v12  ;;  %4923 = vmatprep.mubr.msk.f32.mxu1 %vm248_vm1, %v103_v30  ;;  %v6318_v8 = vrot.slane %v6314_v7, %v6200_v24  ;;  %v6323_v10 = vrot.slane %v6314_v7, %v6219_v32  ;;  %v383_v30 = vld [vmem:[#allocation7 + $0x28] sm:$0xff]  ;;  %v384_v32 = vld [vmem:[#allocation7 + $0x30] sm:$0xff] }
  0x56   :  { %4904 = vmatmul.mubr.msk.f32.gmra.mrb[2].mxu0 %vm115_vm4, %v108_v29  ;;  %509 = vrot.lane.b32.xlu0 %v507_v35, %s6022_s2  ;;  %v382_v29 = vld [vmem:[#allocation7 + $0x20] sm:$0xff]  ;;  %v385_v35 = vld [vmem:[#allocation7 + $0x38] sm:$0xff] }
  0x57   :  { %4906 = vmatprep.mubr.msk.f32.mxu0 %vm115_vm4, %v109_v33  ;;  %5468 = vmatprep.subr.bf16.mxu1 %v6021_v12  ;;  %v6334_v33 = vpack.c.bf16 %v383_v30, %v382_v29 }
  0x58   :  { %5467 = vmatpush3.bf16.msra.mxu0 %v6225_v34  ;;  %4924 = vmatmul.mubr.msk.f32.gmra.mrb[6].mxu1 %vm248_vm1, %v104_v36  ;;  %v6337_v36 = vpack.c.bf16 %v385_v35, %v384_v32 }
  0x59   :  { %5474 = vmatprep.subr.bf16.mxu0 %v6021_v12  ;;  %4934 = vmatprep.mubr.msk.f32.mxu1 %vm6023_vm5, %v6024_v41 }
  0x5a   :  { %4907 = vmatmul.mubr.msk.f32.gmra.mrb[4].mxu0 %vm115_vm4, %v110_v37  ;;  %628 = vrot.lane.b32.xlu0 %v626_v38, %s6022_s2  ;;  %v397_v37 = vld [vmem:[#allocation7 + $0x80] sm:$0xff]  ;;  %v398_v38 = vld [vmem:[#allocation7 + $0x88] sm:$0xff] }
  0x5b   :  { %4909 = vmatprep.mubr.msk.f32.mxu0 %vm115_vm4, %v111_v39  ;;  %v6341_v39 = vpack.c.bf16 %v398_v38, %v397_v37 }
  0x5c   :  { %4935 = vmatmul.mubr.f32.vlgmr.msra.gmra.mrb[8].mxu1 %v6024_v41 }
  0x5d   :  { %4956 = vmatprep.mubr.msk.f32.mxu1 %vm6023_vm5, %v6024_v41 }
  0x5e   :  { %4910 = vmatmul.mubr.msk.f32.gmra.mrb[6].mxu0 %vm115_vm4, %v112_v42  ;;  %500 = vrot.lane.b32.xlu0 %v498_v43, %s6022_s2  ;;  %v399_v42 = vld [vmem:[#allocation7 + $0x90] sm:$0xff]  ;;  %v400_v43 = vld [vmem:[#allocation7 + $0x98] sm:$0xff] }
  0x5f   :  { %4945 = vmatprep.mubr.msk.f32.mxu0 %vm6023_vm5, %v6024_v41 }
  0x62   :  { %4946 = vmatmul.mubr.f32.vlgmr.msra.gmra.mrb[8].mxu0 %v6024_v41  ;;  %619 = vrot.lane.b32.xlu0 %v617_v44, %s6022_s2  ;;  %v6346_v44 = vpack.c.bf16 %v400_v43, %v399_v42 }
  0x63   :  { %4967 = vmatprep.mubr.msk.f32.mxu0 %vm6023_vm5, %v6024_v41  ;;  %5476 = vmatpush3.bf16.msra.mxu0 %v6334_v33 }
  0x64   :  { %5477 = vmatprep.subr.bf16.mxu0 %v6021_v12 }
  0x67   :  { %5479 = vmatpush3.bf16.msra.mxu0 %v6337_v36 }
  0x68   :  { %5486 = vmatprep.subr.bf16.mxu0 %v6021_v12 }
  0x6a   :  { %4968 = vmatmul.mubr.f32.vlgmr.msra.gmra.mrb[10].mxu0 %v6024_v41 }
  0x6b   :  { %5488 = vmatpush3.bf16.msra.mxu0 %v6341_v39  ;;  %4989 = vmatprep.mubr.msk.f32.mxu0 %vm6023_vm5, %v6024_v41 }
  0x6c   :  { %5489 = vmatprep.subr.bf16.mxu0 %v6021_v12 }
  0x6f   :  { %5491 = vmatpush3.bf16.msra.mxu0 %v6346_v44 }
  0x70   :  { %5498 = vmatprep.subr.bf16.mxu0 %v6021_v12 }
  0x72   :  { %4990 = vmatmul.mubr.f32.vlgmr.msra.gmra.mrb[12].mxu0 %v6024_v41 }
  0x73   :  { %5500 = vmatpush3.bf16.msra.mxu0 %v6204_v25  ;;  %5011 = vmatprep.mubr.msk.f32.mxu0 %vm6023_vm5, %v6024_v41 }
  0x74   :  { %5501 = vmatprep.subr.bf16.mxu0 %v6021_v12 }
  0x77   :  { %5503 = vmatpush3.bf16.msra.mxu0 %v6225_v34 }
  0x78   :  { %5510 = vmatprep.subr.bf16.mxu0 %v6021_v12 }
  0xc8   :  { %v6297_v59 = vpop.permute.xlu0 %509 }
  0xcc   :  { %v6306_v2 = vpop.permute.xlu0 %628 }
 0x11f   :  { %v6275_v45 = vpop.f32.mrb[0].mxu1 }
 0x120   :  { %v6277_v46 = vpop.f32.mrb[1].mxu1 }
 0x123   :  { %v6279_v47 = vpop.f32.mrb[2].mxu1 }
 0x124   :  { %v6281_v48 = vpop.f32.mrb[3].mxu1 }
 0x125   :  { %v4902_v49 = vpop.f32.mrb[0].mxu0 }
 0x126   :  { %v210_v50 = vpop.f32.mrb[1].mxu0  ;;  %v6360_v49 = vpop.permute.xlu0 %500 }
 0x127   :  { %v6283_v51 = vpop.f32.mrb[4].mxu1 }
 0x128   :  { %v6285_v52 = vpop.f32.mrb[5].mxu1 }
 0x129   :  { %v6287_v53 = vpop.f32.mrb[2].mxu0 }
 0x12a   :  { %v6289_v54 = vpop.f32.mrb[3].mxu0 }
 0x12b   :  { %v4925_v55 = vpop.f32.mrb[6].mxu1 }
 0x12c   :  { %v6291_v56 = vpop.f32.mrb[7].mxu1 }
 0x12d   :  { %v6293_v57 = vpop.f32.mrb[4].mxu0 }
 0x12e   :  { %v6295_v58 = vpop.f32.mrb[5].mxu0 }
 0x12f   :  { %v479_v60 = vpop.f32.mrb[8].mxu1 }
 0x130   :  { %v4936_v62 = vpop.f32.mrb[9].mxu1  ;;  %v512_v63 = vadd.f32 %v6297_v59, %v479_v60 }
 0x131   :  { %v6299_v61 = vpop.f32.mrb[6].mxu0 }
 0x132   :  { %v483_v0 = vadd.f32 %v6299_v61, %v479_v60  ;;  %v6303_v1 = vpop.f32.mrb[7].mxu0  ;;  %514 = vrot.lane.b32.xlu1 %v512_v63, %s6022_s2  ;;  %v503_v50 = vadd.f32 %v6299_v61, %v6360_v49  ;;  %v6364_v60 = vpop.permute.xlu0 %619  ;;  %v390_v61 = vld [vmem:[#allocation7 + $0x58] sm:$0xff] }
 0x133   :  { %v622_v63 = vadd.f32 %v6364_v60, %v6277_v46 }
 0x134   :  { %v488_v9 = vadd.f32 %v6318_v8, %v483_v0 }
 0x135   :  { %v598_v3 = vpop.f32.mrb[8].mxu0 }
 0x136   :  { %v602_v4 = vadd.f32 %v598_v3, %v6277_v46  ;;  %v631_v5 = vadd.f32 %v6306_v2, %v598_v3  ;;  %v4947_v6 = vpop.f32.mrb[9].mxu0  ;;  %v4561_v14 = vmul.f32 -1.442695, %v488_v9  ;;  %v389_v9 = vld [vmem:[#allocation7 + $0x50] sm:$0xff] }
 0x137   :  { %v388_v6 = vld [vmem:[#allocation7 + $0x48] sm:$0xff] }
 0x138   :  { %633 = vrot.lane.b32.xlu1 %v631_v5, %s6022_s2  ;;  %v607_v15 = vadd.f32 %v6323_v10, %v602_v4  ;;  %5733 = vpow2.f32 %v4561_v14  ;;  %v387_v5 = vld [vmem:[#allocation7 + $0x40] sm:$0xff] }
 0x139   :  { %v6369_v14 = vpack.c.bf16 %v388_v6, %v387_v5 }
 0x13a   :  { %v4562_v16 = vmul.f32 -1.442695, %v607_v15  ;;  %v6372_v15 = vpack.c.bf16 %v390_v61, %v389_v9 }
 0x13b   :  { %5470 = vmatpush3.bf16.msra.mxu1 %v6369_v14 }
 0x13c   :  { %5735 = vpow2.f32 %v4562_v16  ;;  %5471 = vmatprep.subr.bf16.mxu1 %v6021_v12 }
 0x13d   :  { %v792_v35 = vpop.f32.mrb[10].mxu0 }
 0x13e   :  { %v4969_v37 = vpop.f32.mrb[11].mxu0 }
 0x13f   :  { %5473 = vmatpush3.bf16.msra.mxu1 %v6372_v15 }
 0x140   :  { %5480 = vmatprep.subr.bf16.mxu1 %v6021_v12 }
 0x142   :  { %v5734_v17 = vpop.eup %5733 }
 0x143   :  { %v492_v18 = vadd.f32 1.0, %v5734_v17 }
 0x145   :  { %5737 = vrcp.f32 %v492_v18  ;;  %v986_v42 = vpop.f32.mrb[12].mxu0 }
 0x146   :  { %v5736_v19 = vpop.eup %5735  ;;  %v4991_v43 = vpop.f32.mrb[13].mxu0 }
 0x147   :  { %v611_v20 = vadd.f32 1.0, %v5736_v19 }
 0x149   :  { %5739 = vrcp.f32 %v611_v20  ;;  %v6381_v20 = vsub.s32 1, %v6177_v11 }
 0x14b   :  { %v811_v61 = vrot.slane %v6247_v40, %v6381_v20 }
 0x14f   :  { %v6326_v21 = vpop.eup %5737 }
 0x150   :  { %v524_v46 = vsub.f32 1.0, %v6326_v21  ;;  %v530_v18 = vmul.f32 0.0, %v6326_v21 }
 0x153   :  { %v6330_v26 = vpop.eup %5739 }
 0x154   :  { %v649_v29 = vmul.f32 0.0, %v6330_v26 }
 0x1a4   :  { %v515_v23 = vpop.permute.xlu1 %514 }
 0x1a5   :  { %v517_v24 = vmul.f32 %v6326_v21, %v515_v23  ;;  %v6392_v21 = vsub.s32 3, %v6177_v11 }
 0x1a7   :  { %519 = vrot.lane.b32.xlu1 %v517_v24, %s6022_s2  ;;  %v643_v24 = vsub.f32 1.0, %v6330_v26  ;;  %v1014_v38 = vrot.slane %v6216_v31, %v6392_v21 }
 0x1aa   :  { %v634_v27 = vpop.permute.xlu1 %633 }
 0x1ab   :  { %v636_v28 = vmul.f32 %v6330_v26, %v634_v27  ;;  %v402_v26 = vld [vmem:[#allocation7 + $0xa0] sm:$0xff] }
 0x1ad   :  { %638 = vrot.lane.b32.xlu1 %v636_v28, %s6022_s2  ;;  %v820_v28 = vrot.slane %v6216_v31, %v6381_v20 }
 0x219   :  { %v520_v55 = vpop.permute.xlu1 %519 }
 0x21a   :  { %v522_v62 = vadd.f32 %v520_v55, %v503_v50  ;;  %v403_v50 = vld [vmem:[#allocation7 + $0xa8] sm:$0xff] }
 0x21b   :  { %v6402_v55 = vpack.c.bf16 %v403_v50, %v402_v26  ;;  %v6459_v26 = vrot.slane %v6314_v7, %v6381_v20 }
 0x21c   :  { %5741 = vtanh.f32 %v522_v62  ;;  %v404_v62 = vld [vmem:[#allocation7 + $0xb0] sm:$0xff] }
 0x21f   :  { %v639_v0 = vpop.permute.xlu1 %638 }
 0x220   :  { %v641_v3 = vadd.f32 %v639_v0, %v622_v63  ;;  %v405_v63 = vld [vmem:[#allocation7 + $0xb8] sm:$0xff] }
 0x222   :  { %5743 = vtanh.f32 %v641_v3  ;;  %v6406_v3 = vpack.c.bf16 %v405_v63, %v404_v62 }
 0x226   :  { %v5742_v4 = vpop.eup %5741 }
 0x227   :  { %526 = vrot.lane.b32.xlu0 %v5742_v4, %s6025_s5 }
 0x22c   :  { %v5744_v16 = vpop.eup %5743 }
 0x22d   :  { %645 = vrot.lane.b32.xlu1 %v5744_v16, %s6025_s5 }
 0x299   :  { %v527_v17 = vpop.permute.xlu0 %526 }
 0x29a   :  { %v529_v19 = vmul.f32 %v527_v17, %v524_v46 }
 0x29c   :  { %v6383_v23 = vadd.f32 %v530_v18, %v529_v19 }
 0x29e   :  { %652 = vrot.lane.b32.xlu0 %v6383_v23, %s6025_s5 }
 0x29f   :  { %v646_v27 = vpop.permute.xlu1 %645 }
 0x2a0   :  { %v648_v30 = vmul.f32 %v646_v27, %v643_v24 }
 0x2a2   :  { %v6394_v32 = vadd.f32 %v649_v29, %v648_v30  ;;  %822 = vrot.lane.b32.xlu0 %v820_v28, %s6022_s2 }
 0x2a4   :  { %846 = vrot.lane.b32.xlu1 %v6394_v32, %s6025_s5 }
 0x2a8   :  { %1016 = vrot.lane.b32.xlu1 %v1014_v38, %s6022_s2 }
 0x310   :  { %v653_v0 = vpop.permute.xlu0 %652 }
 0x311   :  { %4957 = vmatmul.mubr.msk.f32.vlgmr.msra.gmra.mrb[10].mxu1 %vm409_vm6, %v653_v0 }
 0x312   :  { %5482 = vmatpush3.bf16.msra.mxu1 %v6402_v55  ;;  %4978 = vmatprep.mubr.msk.f32.mxu1 %vm6023_vm5, %v6024_v41 }
 0x313   :  { %5483 = vmatprep.subr.bf16.mxu1 %v6021_v12 }
 0x314   :  { %v6411_v31 = vpop.permute.xlu0 %822 }
 0x315   :  { %v825_v5 = vadd.f32 %v6411_v31, %v792_v35 }
 0x316   :  { %v847_v4 = vpop.permute.xlu1 %846  ;;  %5485 = vmatpush3.bf16.msra.mxu1 %v6406_v3 }
 0x317   :  { %5012 = vmatmul.mubr.msk.f32.vlgmr.msra.gmra.mrb[14].mxu0 %vm409_vm6, %v847_v4  ;;  %5492 = vmatprep.subr.bf16.mxu1 %v6021_v12 }
 0x318   :  { %827 = vrot.lane.b32.xlu1 %v825_v5, %s6022_s2  ;;  %5512 = vmatpush3.bf16.msra.mxu0 %v6334_v33 }
 0x319   :  { %5033 = vmatprep.mubr.msk.f32.mxu0 %vm6023_vm5, %v6024_v41  ;;  %4979 = vmatmul.mubr.msk.f32.vlgmr.msra.gmra.mrb[12].mxu1 %vm409_vm6, %v847_v4 }
 0x31a   :  { %v6422_v6 = vpop.permute.xlu1 %1016  ;;  %5513 = vmatprep.subr.bf16.mxu0 %v6021_v12  ;;  %5494 = vmatpush3.bf16.msra.mxu1 %v6181_v13 }
 0x31b   :  { %5000 = vmatprep.mubr.msk.f32.mxu1 %vm6023_vm5, %v6024_v41  ;;  %v1019_v9 = vadd.f32 %v6422_v6, %v986_v42  ;;  %5495 = vmatprep.subr.bf16.mxu1 %v6021_v12 }
 0x31c   :  { %5515 = vmatpush3.bf16.msra.mxu0 %v6337_v36 }
 0x31d   :  { %1021 = vrot.lane.b32.xlu1 %v1019_v9, %s6022_s2  ;;  %5522 = vmatprep.subr.bf16.mxu0 %v6021_v12 }
 0x31e   :  { %5497 = vmatpush3.bf16.msra.mxu1 %v6197_v22 }
 0x31f   :  { %5504 = vmatprep.subr.bf16.mxu1 %v6021_v12 }
 0x321   :  { %813 = vrot.lane.b32.xlu1 %v811_v61, %s6022_s2  ;;  %5001 = vmatmul.mubr.msk.f32.vlgmr.msra.gmra.mrb[14].mxu1 %vm409_vm6, %v653_v0 }
 0x322   :  { %5506 = vmatpush3.bf16.msra.mxu1 %v6369_v14  ;;  %5022 = vmatprep.mubr.msk.f32.mxu1 %vm6023_vm5, %v6024_v41 }
 0x323   :  { %5507 = vmatprep.subr.bf16.mxu1 %v6021_v12 }
 0x326   :  { %5509 = vmatpush3.bf16.msra.mxu1 %v6372_v15 }
 0x327   :  { %5516 = vmatprep.subr.bf16.mxu1 %v6021_v12 }
 0x3e4   :  { %v6445_v16 = vpop.f32.mrb[10].mxu1 }
 0x3e5   :  { %v796_v46 = vadd.f32 %v792_v35, %v6445_v16  ;;  %v4958_v17 = vpop.f32.mrb[11].mxu1 }
 0x3e7   :  { %v801_v62 = vadd.f32 %v6459_v26, %v796_v46 }
 0x3e9   :  { %v4564_v4 = vmul.f32 -1.442695, %v801_v62 }
 0x3ea   :  { %v1204_v18 = vpop.f32.mrb[14].mxu0 }
 0x3eb   :  { %v1208_v19 = vadd.f32 %v6275_v45, %v1204_v18  ;;  %v5013_v24 = vpop.f32.mrb[15].mxu0  ;;  %v1217_v35 = vadd.f32 %v1204_v18, %v6306_v2 }
 0x3ec   :  { %v6449_v27 = vpop.f32.mrb[12].mxu1 }
 0x3ed   :  { %v990_v28 = vadd.f32 %v986_v42, %v6449_v27  ;;  %v4980_v29 = vpop.f32.mrb[13].mxu1  ;;  %v6464_v42 = vrot.slane %v6314_v7, %v6392_v21  ;;  %v1209_v63 = vadd.f32 %v1208_v19, %v6323_v10 }
 0x3ef   :  { %v995_v5 = vadd.f32 %v6464_v42, %v990_v28  ;;  %v4570_v9 = vmul.f32 -1.442695, %v1209_v63 }
 0x3f1   :  { %v4566_v61 = vmul.f32 -1.442695, %v995_v5 }
 0x3f4   :  { %v1105_v30 = vpop.f32.mrb[14].mxu1 }
 0x3f5   :  { %v1109_v37 = vadd.f32 %v1105_v30, %v6303_v1  ;;  %v1118_v38 = vadd.f32 %v1105_v30, %v6297_v59  ;;  %v5002_v43 = vpop.f32.mrb[15].mxu1 }
 0x3f6   :  { %v828_v43 = vpop.permute.xlu1 %827 }
 0x3f7   :  { %1120 = vrot.lane.b32.xlu0 %v1118_v38, %s6022_s2  ;;  %v1110_v50 = vadd.f32 %v1109_v37, %v6318_v8 }
 0x3f9   :  { %v4568_v0 = vmul.f32 -1.442695, %v1110_v50 }
 0x3fa   :  { %v1022_v5 = vpop.permute.xlu1 %1021 }
 0x3fb   :  { %1219 = vrot.lane.b32.xlu0 %v1217_v35, %s6022_s2  ;;  %5745 = vpow2.f32 %v4568_v0 }
 0x3fc   :  { %5747 = vpow2.f32 %v4564_v4  ;;  %v1005_v4 = vrot.slane %v6247_v40, %v6392_v21  ;;  %v1216_v40 = vadd.f32 %v6275_v45, %v6364_v60 }
 0x3fd   :  { %5749 = vpow2.f32 %v4570_v9 }
 0x3fe   :  { %5751 = vpow2.f32 %v4566_v61  ;;  %v1117_v61 = vadd.f32 %v6360_v49, %v6303_v1 }
 0x405   :  { %v5746_v20 = vpop.eup %5745 }
 0x406   :  { %v5748_v17 = vpop.eup %5747  ;;  %v1114_v18 = vadd.f32 1.0, %v5746_v20  ;;  %v6478_v20 = vpop.permute.xlu1 %813 }
 0x407   :  { %v5750_v24 = vpop.eup %5749  ;;  %v805_v7 = vadd.f32 1.0, %v5748_v17 }
 0x408   :  { %v5752_v29 = vpop.eup %5751  ;;  %v1213_v30 = vadd.f32 1.0, %v5750_v24  ;;  %5753 = vrcp.f32 %v1114_v18  ;;  %v816_v24 = vadd.f32 %v6478_v20, %v6445_v16 }
 0x409   :  { %5755 = vrcp.f32 %v805_v7  ;;  %v999_v46 = vadd.f32 1.0, %v5752_v29 }
 0x40a   :  { %5757 = vrcp.f32 %v1213_v30 }
 0x40b   :  { %5759 = vrcp.f32 %v999_v46 }
 0x412   :  { %v5754_v19 = vpop.eup %5753 }
 0x413   :  { %v5756_v38 = vpop.eup %5755 }
 0x414   :  { %v5758_v35 = vpop.eup %5757  ;;  %v830_v63 = vmul.f32 %v5756_v38, %v828_v43 }
 0x415   :  { %v5760_v0 = vpop.eup %5759 }
 0x416   :  { %v1024_v9 = vmul.f32 %v5760_v0, %v1022_v5 }
 0x469   :  { %v1121_v28 = vpop.permute.xlu0 %1120 }
 0x46a   :  { %v1123_v37 = vmul.f32 %v5754_v19, %v1121_v28 }
 0x46c   :  { %1125 = vrot.lane.b32.xlu0 %v1123_v37, %s6022_s2 }
 0x46d   :  { %v1220_v50 = vpop.permute.xlu0 %1219 }
 0x46e   :  { %v1222_v62 = vmul.f32 %v5758_v35, %v1220_v50 }
 0x470   :  { %1224 = vrot.lane.b32.xlu1 %v1222_v62, %s6022_s2  ;;  %832 = vrot.lane.b32.xlu0 %v830_v63, %s6022_s2  ;;  %v1130_v62 = vsub.f32 1.0, %v5754_v19 }
 0x474   :  { %1026 = vrot.lane.b32.xlu1 %v1024_v9, %s6022_s2  ;;  %1007 = vrot.lane.b32.xlu0 %v1005_v4, %s6022_s2  ;;  %v1136_v4 = vmul.f32 %v5754_v19, %v6383_v23  ;;  %v1229_v9 = vsub.f32 1.0, %v5758_v35  ;;  %v1031_v23 = vsub.f32 1.0, %v5760_v0 }
 0x4de   :  { %v1126_v17 = vpop.permute.xlu0 %1125 }
 0x4df   :  { %v1128_v18 = vadd.f32 %v1126_v17, %v1117_v61  ;;  %v837_v61 = vsub.f32 1.0, %v5756_v38 }
 0x4e1   :  { %5761 = vtanh.f32 %v1128_v18 }
 0x4e2   :  { %v1225_v21 = vpop.permute.xlu1 %1224  ;;  %v833_v7 = vpop.permute.xlu0 %832 }
 0x4e3   :  { %v1227_v29 = vadd.f32 %v1225_v21, %v1216_v40  ;;  %v835_v30 = vadd.f32 %v833_v7, %v816_v24  ;;  %v1235_v24 = vmul.f32 %v5758_v35, %v6394_v32  ;;  %v843_v21 = vmul.f32 0.0, %v5756_v38 }
 0x4e5   :  { %5763 = vtanh.f32 %v1227_v29 }
 0x4e6   :  { %5765 = vtanh.f32 %v835_v30  ;;  %v6484_v46 = vpop.permute.xlu0 %1007  ;;  %v1027_v28 = vpop.permute.xlu1 %1026 }
 0x4e7   :  { %v1010_v1 = vadd.f32 %v6484_v46, %v6449_v27 }
 0x4e9   :  { %v1029_v37 = vadd.f32 %v1027_v28, %v1010_v1  ;;  %v1037_v1 = vmul.f32 0.0, %v5760_v0 }
 0x4eb   :  { %v5762_v43 = vpop.eup %5761  ;;  %5767 = vtanh.f32 %v1029_v37 }
 0x4ec   :  { %1132 = vrot.lane.b32.xlu0 %v5762_v43, %s6025_s5 }
 0x4ef   :  { %v5764_v16 = vpop.eup %5763 }
 0x4f0   :  { %v5766_v50 = vpop.eup %5765  ;;  %1231 = vrot.lane.b32.xlu0 %v5764_v16, %s6025_s5 }
 0x4f1   :  { %839 = vrot.lane.b32.xlu1 %v5766_v50, %s6025_s5 }
 0x4f5   :  { %v5768_v45 = vpop.eup %5767 }
 0x4f6   :  { %1033 = vrot.lane.b32.xlu1 %v5768_v45, %s6025_s5 }
 0x55e   :  { %v1133_v63 = vpop.permute.xlu0 %1132 }
 0x55f   :  { %v1135_v27 = vmul.f32 %v1133_v63, %v1130_v62 }
 0x561   :  { %v6493_v5 = vadd.f32 %v1136_v4, %v1135_v27 }
 0x562   :  { %v1232_v17 = vpop.permute.xlu0 %1231 }
 0x563   :  { %v840_v18 = vpop.permute.xlu1 %839  ;;  %v1234_v40 = vmul.f32 %v1232_v17, %v1229_v9  ;;  %1238 = vrot.lane.b32.xlu0 %v6493_v5, %s6025_s5 }
 0x564   :  { %v842_v7 = vmul.f32 %v840_v18, %v837_v61 }
 0x565   :  { %v6498_v29 = vadd.f32 %v1235_v24, %v1234_v40 }
 0x566   :  { %v6500_v30 = vadd.f32 %v843_v21, %v842_v7 }
 0x567   :  { %1417 = vrot.lane.b32.xlu0 %v6498_v29, %s6025_s5 }
 0x568   :  { %1313 = vrot.lane.b32.xlu1 %v6500_v30, %s6025_s5  ;;  %v1034_v19 = vpop.permute.xlu1 %1033 }
 0x569   :  { %v1036_v32 = vmul.f32 %v1034_v19, %v1031_v23 }
 0x56b   :  { %v6506_v35 = vadd.f32 %v1037_v1, %v1036_v32 }
 0x56d   :  { %1492 = vrot.lane.b32.xlu1 %v6506_v35, %s6025_s5 }
 0x5d5   :  { %v1239_v38 = vpop.permute.xlu0 %1238 }
 0x5d6   :  { %5023 = vmatmul.mubr.msk.f32.vlgmr.msra.gmra.mrb[16].mxu1 %vm409_vm6, %v1239_v38 }
 0x5d7   :  { %5518 = vmatpush3.bf16.msra.mxu1 %v6402_v55  ;;  %5044 = vmatprep.mubr.msk.f32.mxu1 %vm6023_vm5, %v6024_v41 }
 0x5d8   :  { %5519 = vmatprep.subr.bf16.mxu1 %v6021_v12 }
 0x5d9   :  { %v1418_v0 = vpop.permute.xlu0 %1417 }
 0x5da   :  { %v6515_v28 = vpop.permute.xlu1 %1313 }
 0x5db   :  { %5034 = vmatmul.mubr.msk.f32.vlgmr.msra.gmra.mrb[16].mxu0 %vm409_vm6, %v6515_v28  ;;  %5521 = vmatpush3.bf16.msra.mxu1 %v6406_v3 }
 0x5dc   :  { %5524 = vmatpush3.bf16.msra.mxu0 %v6341_v39  ;;  %5528 = vmatprep.subr.bf16.mxu1 %v6021_v12 }
 0x5dd   :  { %5525 = vmatprep.subr.bf16.mxu0 %v6021_v12  ;;  %5055 = vmatprep.mubr.msk.f32.mxu0 %vm6023_vm5, %v6024_v41 }
 0x5de   :  { %5045 = vmatmul.mubr.msk.f32.vlgmr.msra.gmra.mrb[18].mxu1 %vm409_vm6, %v1418_v0 }
 0x5df   :  { %5530 = vmatpush3.bf16.msra.mxu1 %v6181_v13  ;;  %5066 = vmatprep.mubr.msk.f32.mxu1 %vm6023_vm5, %v6024_v41  ;;  %v6530_v37 = vpop.permute.xlu1 %1492 }
 0x5e0   :  { %5527 = vmatpush3.bf16.msra.mxu0 %v6346_v44  ;;  %5531 = vmatprep.subr.bf16.mxu1 %v6021_v12 }
 0x5e1   :  { %5534 = vmatprep.subr.bf16.mxu0 %v6021_v12 }
 0x5e3   :  { %5056 = vmatmul.mubr.msk.f32.vlgmr.msra.gmra.mrb[18].mxu0 %vm409_vm6, %v6530_v37  ;;  %5533 = vmatpush3.bf16.msra.mxu1 %v6197_v22 }
 0x5e4   :  { %5536 = vmatpush3.bf16.msra.mxu0 %v6204_v25  ;;  %5077 = vmatprep.mubr.msk.f32.mxu0 %vm6023_vm5, %v6024_v41 }
 0x5e5   :  { %5537 = vmatprep.subr.bf16.mxu0 %v6021_v12  ;;  %5540 = vmatprep.subr.bf16.mxu1 %v6021_v12 }
 0x5e6   :  { %5067 = vmatmul.mubr.msk.f32.vlgmr.msra.gmra.mrb[20].mxu1 %vm409_vm6, %v1239_v38 }
 0x5e7   :  { %5542 = vmatpush3.bf16.msra.mxu1 %v6369_v14  ;;  %5088 = vmatprep.mubr.msk.f32.mxu1 %vm6023_vm5, %v6024_v41 }
 0x5e8   :  { %5539 = vmatpush3.bf16.msra.mxu0 %v6225_v34  ;;  %5543 = vmatprep.subr.bf16.mxu1 %v6021_v12 }
 0x5e9   :  { %5546 = vmatprep.subr.bf16.mxu0 %v6021_v12 }
 0x5eb   :  { %5078 = vmatmul.mubr.msk.f32.vlgmr.msra.gmra.mrb[20].mxu0 %vm409_vm6, %v1418_v0  ;;  %5545 = vmatpush3.bf16.msra.mxu1 %v6372_v15 }
 0x5ec   :  { %5548 = vmatpush3.bf16.msra.mxu0 %v6334_v33  ;;  %5099 = vmatprep.mubr.msk.f32.mxu0 %vm6023_vm5, %v6024_v41 }
 0x5ed   :  { %5549 = vmatprep.subr.bf16.mxu0 %v6021_v12  ;;  %5552 = vmatprep.subr.bf16.mxu1 %v6021_v12 }
 0x5f0   :  { %5551 = vmatpush3.bf16.msra.mxu0 %v6337_v36 }
 0x5f1   :  { %5558 = vmatprep.subr.bf16.mxu0 %v6021_v12 }
 0x6a9   :  { %v6558_v43 = vpop.f32.mrb[16].mxu1 }
 0x6aa   :  { %v5024_v16 = vpop.f32.mrb[17].mxu1 }
 0x6ae   :  { %v1383_v50 = vpop.f32.mrb[16].mxu0 }
 0x6af   :  { %v1387_v45 = vadd.f32 %v1383_v50, %v6558_v43  ;;  %v1396_v62 = vadd.f32 %v1383_v50, %v6411_v31  ;;  %v5035_v63 = vpop.f32.mrb[17].mxu0 }
 0x6b1   :  { %1398 = vrot.lane.b32.xlu1 %v1396_v62, %s6022_s2  ;;  %v1487_v4 = vpop.f32.mrb[18].mxu1  ;;  %v1388_v38 = vadd.f32 %v1387_v45, %v6459_v26 }
 0x6b2   :  { %v5046_v27 = vpop.f32.mrb[19].mxu1 }
 0x6b3   :  { %v4573_v0 = vmul.f32 -1.442695, %v1388_v38 }
 0x6b5   :  { %5769 = vpow2.f32 %v4573_v0 }
 0x6b6   :  { %v1562_v9 = vpop.f32.mrb[18].mxu0 }
 0x6b7   :  { %v1566_v61 = vadd.f32 %v1562_v9, %v1487_v4  ;;  %v1575_v17 = vadd.f32 %v1562_v9, %v6422_v6  ;;  %v5057_v18 = vpop.f32.mrb[19].mxu0 }
 0x6b9   :  { %1577 = vrot.lane.b32.xlu1 %v1575_v17, %s6022_s2  ;;  %v1661_v24 = vpop.f32.mrb[20].mxu1  ;;  %v1567_v16 = vadd.f32 %v1566_v61, %v6464_v42 }
 0x6ba   :  { %v1665_v40 = vadd.f32 %v6293_v57, %v1661_v24  ;;  %v1674_v21 = vadd.f32 %v1661_v24, %v6297_v59  ;;  %v5068_v7 = vpop.f32.mrb[21].mxu1 }
 0x6bb   :  { %v4576_v62 = vmul.f32 -1.442695, %v1567_v16 }
 0x6bc   :  { %1676 = vrot.lane.b32.xlu0 %v1674_v21, %s6022_s2  ;;  %v1666_v50 = vadd.f32 %v1665_v40, %v6318_v8 }
 0x6bd   :  { %5771 = vpow2.f32 %v4576_v62 }
 0x6be   :  { %v1760_v23 = vpop.f32.mrb[20].mxu0  ;;  %v4578_v63 = vmul.f32 -1.442695, %v1666_v50 }
 0x6bf   :  { %v1764_v19 = vadd.f32 %v1760_v23, %v6281_v48  ;;  %v1773_v1 = vadd.f32 %v1760_v23, %v6306_v2  ;;  %v5079_v32 = vpop.f32.mrb[21].mxu0  ;;  %v5770_v9 = vpop.eup %5769 }
 0x6c0   :  { %5773 = vpow2.f32 %v4578_v63  ;;  %v1392_v18 = vadd.f32 1.0, %v5770_v9 }
 0x6c1   :  { %1775 = vrot.lane.b32.xlu0 %v1773_v1, %s6022_s2  ;;  %v1765_v27 = vadd.f32 %v1764_v19, %v6323_v10 }
 0x6c3   :  { %v4580_v17 = vmul.f32 -1.442695, %v1765_v27 }
 0x6c5   :  { %5775 = vpow2.f32 %v4580_v17  ;;  %v1395_v17 = vadd.f32 %v6558_v43, %v6478_v20  ;;  %v1772_v43 = vadd.f32 %v6364_v60, %v6281_v48 }
 0x6c6   :  { %5777 = vrcp.f32 %v1392_v18 }
 0x6c7   :  { %v5772_v24 = vpop.eup %5771 }
 0x6c8   :  { %v1571_v45 = vadd.f32 1.0, %v5772_v24 }
 0x6ca   :  { %v5774_v21 = vpop.eup %5773  ;;  %5779 = vrcp.f32 %v1571_v45 }
 0x6cb   :  { %v1670_v7 = vadd.f32 1.0, %v5774_v21  ;;  %v1574_v21 = vadd.f32 %v1487_v4, %v6484_v46 }
 0x6cd   :  { %5781 = vrcp.f32 %v1670_v7 }
 0x6cf   :  { %v5776_v23 = vpop.eup %5775 }
 0x6d0   :  { %v5778_v61 = vpop.eup %5777  ;;  %v1769_v32 = vadd.f32 1.0, %v5776_v23  ;;  %v1673_v23 = vadd.f32 %v6293_v57, %v6360_v49 }
 0x6d2   :  { %5783 = vrcp.f32 %v1769_v32 }
 0x6d4   :  { %v5780_v19 = vpop.eup %5779 }
 0x6d5   :  { %v1587_v48 = vsub.f32 1.0, %v5780_v19 }
 0x6d7   :  { %v5782_v16 = vpop.eup %5781 }
 0x6dc   :  { %v5784_v63 = vpop.eup %5783 }
 0x723   :  { %v1399_v1 = vpop.permute.xlu1 %1398 }
 0x724   :  { %v1401_v40 = vmul.f32 %v5778_v61, %v1399_v1 }
 0x726   :  { %1403 = vrot.lane.b32.xlu1 %v1401_v40, %s6022_s2 }
 0x72b   :  { %v1578_v38 = vpop.permute.xlu1 %1577 }
 0x72c   :  { %v1580_v0 = vmul.f32 %v5780_v19, %v1578_v38 }
 0x72e   :  { %1582 = vrot.lane.b32.xlu1 %v1580_v0, %s6022_s2  ;;  %v1677_v50 = vpop.permute.xlu0 %1676 }
 0x72f   :  { %v1679_v62 = vmul.f32 %v5782_v16, %v1677_v50 }
 0x731   :  { %1681 = vrot.lane.b32.xlu0 %v1679_v62, %s6022_s2  ;;  %v1408_v62 = vsub.f32 1.0, %v5778_v61 }
 0x733   :  { %v1776_v27 = vpop.permute.xlu0 %1775 }
 0x734   :  { %v1778_v9 = vmul.f32 %v5784_v63, %v1776_v27 }
 0x736   :  { %1780 = vrot.lane.b32.xlu0 %v1778_v9, %s6022_s2  ;;  %v1414_v9 = vmul.f32 %v5778_v61, %v6500_v30  ;;  %v1785_v61 = vsub.f32 1.0, %v5784_v63 }
 0x798   :  { %v1404_v18 = vpop.permute.xlu1 %1403 }
 0x799   :  { %v1406_v24 = vadd.f32 %v1404_v18, %v1395_v17 }
 0x79b   :  { %5785 = vtanh.f32 %v1406_v24 }
 0x7a0   :  { %v1583_v45 = vpop.permute.xlu1 %1582 }
 0x7a1   :  { %v1585_v7 = vadd.f32 %v1583_v45, %v1574_v21  ;;  %v1593_v21 = vmul.f32 %v5780_v19, %v6506_v35  ;;  %v1791_v35 = vmul.f32 %v5784_v63, %v6498_v29 }
 0x7a3   :  { %5787 = vtanh.f32 %v1585_v7  ;;  %v1682_v1 = vpop.permute.xlu0 %1681  ;;  %v1686_v7 = vsub.f32 1.0, %v5782_v16 }
 0x7a4   :  { %v1684_v40 = vadd.f32 %v1682_v1, %v1673_v23 }
 0x7a5   :  { %v5786_v32 = vpop.eup %5785 }
 0x7a6   :  { %5789 = vtanh.f32 %v1684_v40  ;;  %1410 = vrot.lane.b32.xlu1 %v5786_v32, %s6025_s5  ;;  %v1692_v40 = vmul.f32 %v5782_v16, %v6493_v5 }
 0x7a8   :  { %v1781_v38 = vpop.permute.xlu0 %1780 }
 0x7a9   :  { %v1783_v0 = vadd.f32 %v1781_v38, %v1772_v43 }
 0x7ab   :  { %5791 = vtanh.f32 %v1783_v0 }
 0x7ad   :  { %v5788_v50 = vpop.eup %5787 }
 0x7ae   :  { %1589 = vrot.lane.b32.xlu1 %v5788_v50, %s6025_s5 }
 0x7b0   :  { %v5790_v4 = vpop.eup %5789 }
 0x7b1   :  { %1688 = vrot.lane.b32.xlu0 %v5790_v4, %s6025_s5 }
 0x7b5   :  { %v5792_v57 = vpop.eup %5791 }
 0x7b6   :  { %1787 = vrot.lane.b32.xlu0 %v5792_v57, %s6025_s5 }
 0x818   :  { %v1411_v27 = vpop.permute.xlu1 %1410 }
 0x819   :  { %v1413_v17 = vmul.f32 %v1411_v27, %v1408_v62 }
 0x81b   :  { %v6591_v18 = vadd.f32 %v1414_v9, %v1413_v17 }
 0x81d   :  { %1869 = vrot.lane.b32.xlu1 %v6591_v18, %s6025_s5 }
 0x820   :  { %v1590_v24 = vpop.permute.xlu1 %1589 }
 0x821   :  { %v1592_v45 = vmul.f32 %v1590_v24, %v1587_v48 }
 0x823   :  { %v6596_v23 = vadd.f32 %v1593_v21, %v1592_v45  ;;  %v1689_v1 = vpop.permute.xlu0 %1688 }
 0x824   :  { %v1691_v32 = vmul.f32 %v1689_v1, %v1686_v7 }
 0x825   :  { %2048 = vrot.lane.b32.xlu1 %v6596_v23, %s6025_s5 }
 0x826   :  { %v6601_v30 = vadd.f32 %v1692_v40, %v1691_v32 }
 0x828   :  { %v1788_v43 = vpop.permute.xlu0 %1787  ;;  %1794 = vrot.lane.b32.xlu0 %v6601_v30, %s6025_s5 }
 0x829   :  { %v1790_v19 = vmul.f32 %v1788_v43, %v1785_v61 }
 0x82b   :  { %v6606_v38 = vadd.f32 %v1791_v35, %v1790_v19 }
 0x82d   :  { %1973 = vrot.lane.b32.xlu0 %v6606_v38, %s6025_s5 }
 0x88f   :  { %v6610_v5 = vpop.permute.xlu1 %1869 }
 0x890   :  { %5100 = vmatmul.mubr.msk.f32.vlgmr.msra.gmra.mrb[22].mxu0 %vm409_vm6, %v6610_v5 }
 0x891   :  { %5560 = vmatpush3.bf16.msra.mxu0 %v6341_v39  ;;  %5121 = vmatprep.mubr.msk.f32.mxu0 %vm6023_vm5, %v6024_v41 }
 0x892   :  { %5561 = vmatprep.subr.bf16.mxu0 %v6021_v12 }
 0x895   :  { %5563 = vmatpush3.bf16.msra.mxu0 %v6346_v44 }
 0x896   :  { %5570 = vmatprep.subr.bf16.mxu0 %v6021_v12 }
 0x897   :  { %v6620_v29 = vpop.permute.xlu1 %2048 }
 0x898   :  { %5122 = vmatmul.mubr.msk.f32.vlgmr.msra.gmra.mrb[24].mxu0 %vm409_vm6, %v6620_v29 }
 0x899   :  { %5572 = vmatpush3.bf16.msra.mxu0 %v6204_v25  ;;  %5143 = vmatprep.mubr.msk.f32.mxu0 %vm6023_vm5, %v6024_v41 }
 0x89a   :  { %v1795_v16 = vpop.permute.xlu0 %1794  ;;  %5573 = vmatprep.subr.bf16.mxu0 %v6021_v12 }
 0x89b   :  { %5089 = vmatmul.mubr.msk.f32.vlgmr.msra.gmra.mrb[22].mxu1 %vm409_vm6, %v1795_v16 }
 0x89c   :  { %5554 = vmatpush3.bf16.msra.mxu1 %v6402_v55  ;;  %5110 = vmatprep.mubr.msk.f32.mxu1 %vm6023_vm5, %v6024_v41 }
 0x89d   :  { %5575 = vmatpush3.bf16.msra.mxu0 %v6225_v34  ;;  %5555 = vmatprep.subr.bf16.mxu1 %v6021_v12 }
 0x89e   :  { %5582 = vmatprep.subr.bf16.mxu0 %v6021_v12 }
 0x89f   :  { %v1974_v63 = vpop.permute.xlu0 %1973 }
 0x8a0   :  { %5557 = vmatpush3.bf16.msra.mxu1 %v6406_v3  ;;  %5144 = vmatmul.mubr.msk.f32.vlgmr.msra.gmra.mrb[26].mxu0 %vm409_vm6, %v1974_v63 }
 0x8a1   :  { %5564 = vmatprep.subr.bf16.mxu1 %v6021_v12  ;;  %5584 = vmatpush3.bf16.msra.mxu0 %v6334_v33 }
 0x8a2   :  { %5585 = vmatprep.subr.bf16.mxu0 %v6021_v12  ;;  %5165 = vmatprep.mubr.msk.f32.mxu0 %vm6023_vm5, %v6024_v41 }
 0x8a3   :  { %5111 = vmatmul.mubr.msk.f32.vlgmr.msra.gmra.mrb[24].mxu1 %vm409_vm6, %v1974_v63 }
 0x8a4   :  { %5566 = vmatpush3.bf16.msra.mxu1 %v6181_v13  ;;  %5132 = vmatprep.mubr.msk.f32.mxu1 %vm6023_vm5, %v6024_v41 }
 0x8a5   :  { %5567 = vmatprep.subr.bf16.mxu1 %v6021_v12  ;;  %5587 = vmatpush3.bf16.msra.mxu0 %v6337_v36 }
 0x8a6   :  { %5594 = vmatprep.subr.bf16.mxu0 %v6021_v12 }
 0x8a8   :  { %5569 = vmatpush3.bf16.msra.mxu1 %v6197_v22 }
 0x8a9   :  { %5576 = vmatprep.subr.bf16.mxu1 %v6021_v12 }
 0x8ab   :  { %5133 = vmatmul.mubr.msk.f32.vlgmr.msra.gmra.mrb[26].mxu1 %vm409_vm6, %v1795_v16 }
 0x8ac   :  { %5578 = vmatpush3.bf16.msra.mxu1 %v6369_v14  ;;  %5154 = vmatprep.mubr.msk.f32.mxu1 %vm6023_vm5, %v6024_v41 }
 0x8ad   :  { %5579 = vmatprep.subr.bf16.mxu1 %v6021_v12 }
 0x8b0   :  { %5581 = vmatpush3.bf16.msra.mxu1 %v6372_v15 }
 0x8b1   :  { %5588 = vmatprep.subr.bf16.mxu1 %v6021_v12 }
 0x963   :  { %v1939_v0 = vpop.f32.mrb[22].mxu0 }
 0x964   :  { %v1952_v50 = vadd.f32 %v1939_v0, %v6411_v31  ;;  %v5101_v4 = vpop.f32.mrb[23].mxu0 }
 0x966   :  { %1954 = vrot.lane.b32.xlu1 %v1952_v50, %s6022_s2 }
 0x96b   :  { %v2118_v57 = vpop.f32.mrb[24].mxu0 }
 0x96c   :  { %v2131_v62 = vadd.f32 %v2118_v57, %v6422_v6  ;;  %v5123_v27 = vpop.f32.mrb[25].mxu0 }
 0x96e   :  { %2133 = vrot.lane.b32.xlu1 %v2131_v62, %s6022_s2  ;;  %v1864_v9 = vpop.f32.mrb[22].mxu1 }
 0x96f   :  { %v1943_v17 = vadd.f32 %v1939_v0, %v1864_v9  ;;  %v5090_v48 = vpop.f32.mrb[23].mxu1 }
 0x971   :  { %v1944_v16 = vadd.f32 %v1943_v17, %v6459_v26 }
 0x973   :  { %v2316_v24 = vpop.f32.mrb[26].mxu0  ;;  %v4583_v63 = vmul.f32 -1.442695, %v1944_v16 }
 0x974   :  { %v2320_v21 = vadd.f32 %v6279_v47, %v2316_v24  ;;  %v5145_v45 = vpop.f32.mrb[27].mxu0  ;;  %v2329_v19 = vadd.f32 %v2316_v24, %v6306_v2 }
 0x975   :  { %5793 = vpow2.f32 %v4583_v63 }
 0x976   :  { %v2043_v7 = vpop.f32.mrb[24].mxu1  ;;  %v2321_v45 = vadd.f32 %v2320_v21, %v6323_v10 }
 0x977   :  { %v2122_v1 = vadd.f32 %v2118_v57, %v2043_v7  ;;  %v5112_v40 = vpop.f32.mrb[25].mxu1 }
 0x979   :  { %v2123_v0 = vadd.f32 %v2122_v1, %v6464_v42 }
 0x97b   :  { %v4586_v50 = vmul.f32 -1.442695, %v2123_v0 }
 0x97d   :  { %5795 = vpow2.f32 %v4586_v50 }
 0x97e   :  { %v2217_v32 = vpop.f32.mrb[26].mxu1 }
 0x97f   :  { %v2221_v61 = vadd.f32 %v2217_v32, %v6295_v58  ;;  %v2230_v43 = vadd.f32 %v2217_v32, %v6297_v59  ;;  %v5134_v35 = vpop.f32.mrb[27].mxu1  ;;  %v5794_v4 = vpop.eup %5793  ;;  %v4590_v32 = vmul.f32 -1.442695, %v2321_v45 }
 0x980   :  { %v1948_v57 = vadd.f32 1.0, %v5794_v4 }
 0x981   :  { %2232 = vrot.lane.b32.xlu0 %v2230_v43, %s6022_s2  ;;  %v2222_v27 = vadd.f32 %v2221_v61, %v6318_v8 }
 0x982   :  { %5797 = vrcp.f32 %v1948_v57 }
 0x983   :  { %v4588_v24 = vmul.f32 -1.442695, %v2222_v27 }
 0x985   :  { %2331 = vrot.lane.b32.xlu0 %v2329_v19, %s6022_s2 }
 0x987   :  { %v5796_v62 = vpop.eup %5795 }
 0x988   :  { %v2127_v48 = vadd.f32 1.0, %v5796_v62 }
 0x98a   :  { %5799 = vrcp.f32 %v2127_v48  ;;  %v1951_v48 = vadd.f32 %v1864_v9, %v6478_v20  ;;  %v2328_v9 = vadd.f32 %v6279_v47, %v6364_v60 }
 0x98b   :  { %5801 = vpow2.f32 %v4588_v24 }
 0x98c   :  { %v5798_v40 = vpop.eup %5797  ;;  %5803 = vpow2.f32 %v4590_v32  ;;  %v2130_v32 = vadd.f32 %v2043_v7, %v6484_v46 }
 0x994   :  { %v5800_v1 = vpop.eup %5799 }
 0x995   :  { %v5802_v16 = vpop.eup %5801  ;;  %v2143_v47 = vsub.f32 1.0, %v5800_v1 }
 0x996   :  { %v2226_v61 = vadd.f32 1.0, %v5802_v16  ;;  %v5804_v63 = vpop.eup %5803  ;;  %v2229_v16 = vadd.f32 %v6360_v49, %v6295_v58 }
 0x997   :  { %v2325_v0 = vadd.f32 1.0, %v5804_v63 }
 0x998   :  { %5805 = vrcp.f32 %v2226_v61 }
 0x999   :  { %5807 = vrcp.f32 %v2325_v0 }
 0x9a2   :  { %v5806_v21 = vpop.eup %5805 }
 0x9a3   :  { %v5808_v57 = vpop.eup %5807 }
 0x9d8   :  { %v1955_v17 = vpop.permute.xlu1 %1954 }
 0x9d9   :  { %v1957_v43 = vmul.f32 %v5798_v40, %v1955_v17 }
 0x9db   :  { %1959 = vrot.lane.b32.xlu1 %v1957_v43, %s6022_s2 }
 0x9e0   :  { %v2134_v35 = vpop.permute.xlu1 %2133 }
 0x9e1   :  { %v2136_v19 = vmul.f32 %v5800_v1, %v2134_v35 }
 0x9e3   :  { %2138 = vrot.lane.b32.xlu1 %v2136_v19, %s6022_s2 }
 0x9f3   :  { %v2233_v50 = vpop.permute.xlu0 %2232 }
 0x9f4   :  { %v2235_v4 = vmul.f32 %v5806_v21, %v2233_v50 }
 0x9f6   :  { %2237 = vrot.lane.b32.xlu0 %v2235_v4, %s6022_s2 }
 0x9f7   :  { %v2332_v62 = vpop.permute.xlu0 %2331 }
 0x9f8   :  { %v2334_v27 = vmul.f32 %v5808_v57, %v2332_v62  ;;  %v1964_v62 = vsub.f32 1.0, %v5798_v40 }
 0x9fa   :  { %2336 = vrot.lane.b32.xlu0 %v2334_v27, %s6022_s2 }
 0xa4d   :  { %v1960_v45 = vpop.permute.xlu1 %1959 }
 0xa4e   :  { %v1962_v24 = vadd.f32 %v1960_v45, %v1951_v48  ;;  %v1970_v48 = vmul.f32 %v5798_v40, %v6591_v18  ;;  %v2248_v18 = vmul.f32 %v5806_v21, %v6601_v30 }
 0xa50   :  { %5809 = vtanh.f32 %v1962_v24 }
 0xa55   :  { %v2139_v17 = vpop.permute.xlu1 %2138 }
 0xa56   :  { %v2141_v43 = vadd.f32 %v2139_v17, %v2130_v32  ;;  %v2149_v32 = vmul.f32 %v5800_v1, %v6596_v23 }
 0xa58   :  { %5811 = vtanh.f32 %v2141_v43 }
 0xa5a   :  { %v5810_v35 = vpop.eup %5809 }
 0xa5b   :  { %1966 = vrot.lane.b32.xlu1 %v5810_v35, %s6025_s5  ;;  %v2242_v35 = vsub.f32 1.0, %v5806_v21 }
 0xa62   :  { %v5812_v19 = vpop.eup %5811 }
 0xa63   :  { %2145 = vrot.lane.b32.xlu1 %v5812_v19, %s6025_s5 }
 0xa68   :  { %v2238_v61 = vpop.permute.xlu0 %2237 }
 0xa69   :  { %v2240_v63 = vadd.f32 %v2238_v61, %v2229_v16  ;;  %v2341_v61 = vsub.f32 1.0, %v5808_v57 }
 0xa6b   :  { %5813 = vtanh.f32 %v2240_v63 }
 0xa6c   :  { %v2337_v0 = vpop.permute.xlu0 %2336 }
 0xa6d   :  { %v2339_v7 = vadd.f32 %v2337_v0, %v2328_v9  ;;  %v2347_v9 = vmul.f32 %v5808_v57, %v6606_v38 }
 0xa6f   :  { %5815 = vtanh.f32 %v2339_v7 }
 0xa75   :  { %v5814_v50 = vpop.eup %5813 }
 0xa76   :  { %2244 = vrot.lane.b32.xlu0 %v5814_v50, %s6025_s5 }
 0xa79   :  { %v5816_v4 = vpop.eup %5815 }
 0xa7a   :  { %2343 = vrot.lane.b32.xlu0 %v5816_v4, %s6025_s5 }
 0xacd   :  { %v1967_v27 = vpop.permute.xlu1 %1966 }
 0xace   :  { %v1969_v58 = vmul.f32 %v1967_v27, %v1964_v62 }
 0xad0   :  { %v6687_v45 = vadd.f32 %v1970_v48, %v1969_v58 }
 0xad2   :  { %2425 = vrot.lane.b32.xlu1 %v6687_v45, %s6025_s5 }
 0xad5   :  { %v2146_v24 = vpop.permute.xlu1 %2145 }
 0xad6   :  { %v2148_v17 = vmul.f32 %v2146_v24, %v2143_v47 }
 0xad8   :  { %v6692_v43 = vadd.f32 %v2149_v32, %v2148_v17 }
 0xada   :  { %2604 = vrot.lane.b32.xlu1 %v6692_v43, %s6025_s5 }
 0xae8   :  { %v2245_v19 = vpop.permute.xlu0 %2244 }
 0xae9   :  { %v2247_v40 = vmul.f32 %v2245_v19, %v2242_v35 }
 0xaeb   :  { %v6697_v16 = vadd.f32 %v2248_v18, %v2247_v40 }
 0xaec   :  { %v2344_v63 = vpop.permute.xlu0 %2343 }
 0xaed   :  { %v2346_v0 = vmul.f32 %v2344_v63, %v2341_v61  ;;  %2350 = vrot.lane.b32.xlu0 %v6697_v16, %s6025_s5 }
 0xaef   :  { %v6702_v23 = vadd.f32 %v2347_v9, %v2346_v0 }
 0xaf1   :  { %2529 = vrot.lane.b32.xlu0 %v6702_v23, %s6025_s5 }
 0xb44   :  { %v6706_v1 = vpop.permute.xlu1 %2425 }
 0xb45   :  { %5166 = vmatmul.mubr.msk.f32.vlgmr.msra.gmra.mrb[28].mxu0 %vm409_vm6, %v6706_v1 }
 0xb46   :  { %5596 = vmatpush3.bf16.msra.mxu0 %v6341_v39  ;;  %5187 = vmatprep.mubr.msk.f32.mxu0 %vm6023_vm5, %v6024_v41 }
 0xb47   :  { %5597 = vmatprep.subr.bf16.mxu0 %v6021_v12 }
 0xb4a   :  { %5599 = vmatpush3.bf16.msra.mxu0 %v6346_v44 }
 0xb4b   :  { %5606 = vmatprep.subr.bf16.mxu0 %v6021_v12 }
 0xb4c   :  { %v6716_v30 = vpop.permute.xlu1 %2604 }
 0xb4d   :  { %5188 = vmatmul.mubr.msk.f32.vlgmr.msra.gmra.mrb[30].mxu0 %vm409_vm6, %v6716_v30 }
 0xb4e   :  { %5608 = vmatpush3.bf16.msra.mxu0 %v6204_v25  ;;  %5209 = vmatprep.mubr.msk.f32.mxu0 %vm6023_vm5, %v6024_v41 }
 0xb4f   :  { %5609 = vmatprep.subr.bf16.mxu0 %v6021_v12 }
 0xb52   :  { %5611 = vmatpush3.bf16.msra.mxu0 %v6225_v34 }
 0xb53   :  { %5618 = vmatprep.subr.bf16.mxu0 %v6021_v12 }
 0xb5f   :  { %v2351_v38 = vpop.permute.xlu0 %2350 }
 0xb60   :  { %5155 = vmatmul.mubr.msk.f32.vlgmr.msra.gmra.mrb[28].mxu1 %vm409_vm6, %v2351_v38 }
 0xb61   :  { %5590 = vmatpush3.bf16.msra.mxu1 %v6402_v55  ;;  %5176 = vmatprep.mubr.msk.f32.mxu1 %vm6023_vm5, %v6024_v41 }
 0xb62   :  { %5591 = vmatprep.subr.bf16.mxu1 %v6021_v12 }
 0xb63   :  { %v2530_v21 = vpop.permute.xlu0 %2529 }
 0xb64   :  { %5210 = vmatmul.mubr.msk.f32.vlgmr.msra.gmra.mrb[32].mxu0 %vm409_vm6, %v2530_v21 }
 0xb65   :  { %5593 = vmatpush3.bf16.msra.mxu1 %v6406_v3  ;;  %5620 = vmatpush3.bf16.msra.mxu0 %v6334_v33 }
 0xb66   :  { %5600 = vmatprep.subr.bf16.mxu1 %v6021_v12  ;;  %5621 = vmatprep.subr.bf16.mxu0 %v6021_v12 }
 0xb67   :  { %5231 = vmatprep.mubr.msk.f32.mxu0 %vm6023_vm5, %v6024_v41 }
 0xb68   :  { %5177 = vmatmul.mubr.msk.f32.vlgmr.msra.gmra.mrb[30].mxu1 %vm409_vm6, %v2530_v21 }
 0xb69   :  { %5602 = vmatpush3.bf16.msra.mxu1 %v6181_v13  ;;  %5198 = vmatprep.mubr.msk.f32.mxu1 %vm6023_vm5, %v6024_v41 }
 0xb6a   :  { %5603 = vmatprep.subr.bf16.mxu1 %v6021_v12  ;;  %5623 = vmatpush3.bf16.msra.mxu0 %v6337_v36 }
 0xb6b   :  { %5630 = vmatprep.subr.bf16.mxu0 %v6021_v12 }
 0xb6d   :  { %5605 = vmatpush3.bf16.msra.mxu1 %v6197_v22 }
 0xb6e   :  { %5612 = vmatprep.subr.bf16.mxu1 %v6021_v12 }
 0xb70   :  { %5199 = vmatmul.mubr.msk.f32.vlgmr.msra.gmra.mrb[32].mxu1 %vm409_vm6, %v2351_v38 }
 0xb71   :  { %5614 = vmatpush3.bf16.msra.mxu1 %v6369_v14  ;;  %5220 = vmatprep.mubr.msk.f32.mxu1 %vm6023_vm5, %v6024_v41 }
 0xb72   :  { %5615 = vmatprep.subr.bf16.mxu1 %v6021_v12 }
 0xb75   :  { %5617 = vmatpush3.bf16.msra.mxu1 %v6372_v15 }
 0xb76   :  { %5624 = vmatprep.subr.bf16.mxu1 %v6021_v12 }
 0xc18   :  { %v2495_v57 = vpop.f32.mrb[28].mxu0 }
 0xc19   :  { %v2508_v7 = vadd.f32 %v2495_v57, %v6411_v31  ;;  %v5167_v50 = vpop.f32.mrb[29].mxu0 }
 0xc1b   :  { %2510 = vrot.lane.b32.xlu0 %v2508_v7, %s6022_s2 }
 0xc20   :  { %v2674_v4 = vpop.f32.mrb[30].mxu0 }
 0xc21   :  { %v2687_v62 = vadd.f32 %v2674_v4, %v6422_v6  ;;  %v5189_v27 = vpop.f32.mrb[31].mxu0 }
 0xc23   :  { %2689 = vrot.lane.b32.xlu1 %v2687_v62, %s6022_s2 }
 0xc33   :  { %v2420_v48 = vpop.f32.mrb[28].mxu1 }
 0xc34   :  { %v2499_v58 = vadd.f32 %v2495_v57, %v2420_v48  ;;  %v5156_v47 = vpop.f32.mrb[29].mxu1 }
 0xc36   :  { %v2500_v38 = vadd.f32 %v2499_v58, %v6459_v26 }
 0xc37   :  { %v2872_v24 = vpop.f32.mrb[32].mxu0 }
 0xc38   :  { %v2876_v32 = vadd.f32 %v2872_v24, %v6285_v52  ;;  %v2885_v17 = vadd.f32 %v2872_v24, %v6306_v2  ;;  %v5211_v35 = vpop.f32.mrb[33].mxu0  ;;  %v4593_v21 = vmul.f32 -1.442695, %v2500_v38 }
 0xc3a   :  { %2887 = vrot.lane.b32.xlu1 %v2885_v17, %s6022_s2  ;;  %5817 = vpow2.f32 %v4593_v21  ;;  %v2877_v47 = vadd.f32 %v2876_v32, %v6323_v10 }
 0xc3b   :  { %v2599_v19 = vpop.f32.mrb[30].mxu1 }
 0xc3c   :  { %v2678_v18 = vadd.f32 %v2674_v4, %v2599_v19  ;;  %v5178_v40 = vpop.f32.mrb[31].mxu1  ;;  %v4600_v17 = vmul.f32 -1.442695, %v2877_v47  ;;  %v2507_v47 = vadd.f32 %v2420_v48, %v6478_v20  ;;  %v2785_v48 = vadd.f32 %v6287_v53, %v6360_v49 }
 0xc3e   :  { %v2679_v57 = vadd.f32 %v2678_v18, %v6464_v42 }
 0xc40   :  { %v4596_v7 = vmul.f32 -1.442695, %v2679_v57 }
 0xc42   :  { %5819 = vpow2.f32 %v4596_v7 }
 0xc43   :  { %v2773_v61 = vpop.f32.mrb[32].mxu1 }
 0xc44   :  { %v2777_v63 = vadd.f32 %v6287_v53, %v2773_v61  ;;  %v2786_v9 = vadd.f32 %v2773_v61, %v6297_v59  ;;  %v5200_v0 = vpop.f32.mrb[33].mxu1  ;;  %v5818_v50 = vpop.eup %5817 }
 0xc45   :  { %v2504_v62 = vadd.f32 1.0, %v5818_v50 }
 0xc46   :  { %2788 = vrot.lane.b32.xlu0 %v2786_v9, %s6022_s2  ;;  %v2778_v18 = vadd.f32 %v2777_v63, %v6318_v8 }
 0xc47   :  { %5821 = vrcp.f32 %v2504_v62 }
 0xc48   :  { %v4598_v0 = vmul.f32 -1.442695, %v2778_v18 }
 0xc4c   :  { %v5820_v4 = vpop.eup %5819 }
 0xc4d   :  { %v2683_v27 = vadd.f32 1.0, %v5820_v4 }
 0xc4f   :  { %5823 = vrcp.f32 %v2683_v27 }
 0xc50   :  { %5825 = vpow2.f32 %v4600_v17 }
 0xc51   :  { %v5822_v24 = vpop.eup %5821  ;;  %5827 = vpow2.f32 %v4598_v0 }
 0xc59   :  { %v5824_v58 = vpop.eup %5823 }
 0xc5a   :  { %v5826_v38 = vpop.eup %5825  ;;  %v2699_v53 = vsub.f32 1.0, %v5824_v58 }
 0xc5b   :  { %v2881_v21 = vadd.f32 1.0, %v5826_v38  ;;  %v5828_v32 = vpop.eup %5827  ;;  %v2884_v38 = vadd.f32 %v6364_v60, %v6285_v52 }
 0xc5c   :  { %v2782_v57 = vadd.f32 1.0, %v5828_v32 }
 0xc5d   :  { %5829 = vrcp.f32 %v2881_v21 }
 0xc5e   :  { %5831 = vrcp.f32 %v2782_v57 }
 0xc67   :  { %v5830_v7 = vpop.eup %5829 }
 0xc68   :  { %v5832_v4 = vpop.eup %5831 }
 0xc8d   :  { %v2511_v35 = vpop.permute.xlu0 %2510 }
 0xc8e   :  { %v2513_v40 = vmul.f32 %v5822_v24, %v2511_v35 }
 0xc90   :  { %2515 = vrot.lane.b32.xlu0 %v2513_v40, %s6022_s2  ;;  %v2686_v40 = vadd.f32 %v2599_v19, %v6484_v46 }
 0xc95   :  { %v2690_v61 = vpop.permute.xlu1 %2689 }
 0xc96   :  { %v2692_v9 = vmul.f32 %v5824_v58, %v2690_v61 }
 0xc98   :  { %2694 = vrot.lane.b32.xlu1 %v2692_v9, %s6022_s2 }
 0xcac   :  { %v2888_v50 = vpop.permute.xlu1 %2887 }
 0xcad   :  { %v2890_v62 = vmul.f32 %v5830_v7, %v2888_v50 }
 0xcaf   :  { %2892 = vrot.lane.b32.xlu1 %v2890_v62, %s6022_s2 }
 0xcb8   :  { %v2789_v27 = vpop.permute.xlu0 %2788 }
 0xcb9   :  { %v2791_v63 = vmul.f32 %v5832_v4, %v2789_v27  ;;  %v2520_v27 = vsub.f32 1.0, %v5822_v24 }
 0xcbb   :  { %2793 = vrot.lane.b32.xlu0 %v2791_v63, %s6022_s2 }
 0xd02   :  { %v2516_v17 = vpop.permute.xlu0 %2515 }
 0xd03   :  { %v2518_v35 = vadd.f32 %v2516_v17, %v2507_v47  ;;  %v2526_v47 = vmul.f32 %v5822_v24, %v6687_v45  ;;  %v2897_v45 = vsub.f32 1.0, %v5830_v7  ;;  %v2804_v24 = vmul.f32 %v5832_v4, %v6697_v16 }
 0xd05   :  { %5833 = vtanh.f32 %v2518_v35 }
 0xd0a   :  { %v2695_v18 = vpop.permute.xlu1 %2694 }
 0xd0b   :  { %v2697_v61 = vadd.f32 %v2695_v18, %v2686_v40  ;;  %v2705_v40 = vmul.f32 %v5824_v58, %v6692_v43 }
 0xd0d   :  { %5835 = vtanh.f32 %v2697_v61 }
 0xd0f   :  { %v5834_v9 = vpop.eup %5833 }
 0xd10   :  { %2522 = vrot.lane.b32.xlu0 %v5834_v9, %s6025_s5  ;;  %v2798_v9 = vsub.f32 1.0, %v5832_v4 }
 0xd17   :  { %v5836_v0 = vpop.eup %5835 }
 0xd18   :  { %2701 = vrot.lane.b32.xlu1 %v5836_v0, %s6025_s5 }
 0xd21   :  { %v2893_v21 = vpop.permute.xlu1 %2892 }
 0xd22   :  { %v2895_v32 = vadd.f32 %v2893_v21, %v2884_v38 }
 0xd24   :  { %5837 = vtanh.f32 %v2895_v32 }
 0xd2d   :  { %v2794_v57 = vpop.permute.xlu0 %2793 }
 0xd2e   :  { %v5838_v19 = vpop.eup %5837  ;;  %v2796_v50 = vadd.f32 %v2794_v57, %v2785_v48  ;;  %v2903_v57 = vmul.f32 %v5830_v7, %v6702_v23 }
 0xd2f   :  { %2899 = vrot.lane.b32.xlu1 %v5838_v19, %s6025_s5 }
 0xd30   :  { %5839 = vtanh.f32 %v2796_v50 }
 0xd3a   :  { %v5840_v62 = vpop.eup %5839 }
 0xd3b   :  { %2800 = vrot.lane.b32.xlu0 %v5840_v62, %s6025_s5 }
 0xd82   :  { %v2523_v63 = vpop.permute.xlu0 %2522 }
 0xd83   :  { %v2525_v52 = vmul.f32 %v2523_v63, %v2520_v27 }
 0xd85   :  { %v6783_v17 = vadd.f32 %v2526_v47, %v2525_v52 }
 0xd87   :  { %2981 = vrot.lane.b32.xlu0 %v6783_v17, %s6025_s5 }
 0xd8a   :  { %v2702_v35 = vpop.permute.xlu1 %2701 }
 0xd8b   :  { %v2704_v18 = vmul.f32 %v2702_v35, %v2699_v53 }
 0xd8d   :  { %v6788_v61 = vadd.f32 %v2705_v40, %v2704_v18 }
 0xd8f   :  { %3160 = vrot.lane.b32.xlu0 %v6788_v61, %s6025_s5 }
 0xda1   :  { %v2900_v0 = vpop.permute.xlu1 %2899 }
 0xda2   :  { %v2902_v32 = vmul.f32 %v2900_v0, %v2897_v45 }
 0xda4   :  { %v6798_v43 = vadd.f32 %v2903_v57, %v2902_v32 }
 0xdad   :  { %v2801_v38 = vpop.permute.xlu0 %2800 }
 0xdae   :  { %v2803_v21 = vmul.f32 %v2801_v38, %v2798_v9 }
 0xdb0   :  { %v6793_v48 = vadd.f32 %v2804_v24, %v2803_v21 }
 0xdb2   :  { %2906 = vrot.lane.b32.xlu1 %v6793_v48, %s6025_s5 }
 0xdb6   :  { %3085 = vrot.lane.b32.xlu1 %v6798_v43, %s6025_s5 }
 0xdf9   :  { %v6802_v58 = vpop.permute.xlu0 %2981 }
 0xdfa   :  { %5232 = vmatmul.mubr.msk.f32.vlgmr.msra.gmra.mrb[34].mxu0 %vm409_vm6, %v6802_v58 }
 0xdfb   :  { %5632 = vmatpush3.bf16.msra.mxu0 %v6341_v39  ;;  %5253 = vmatprep.mubr.msk.f32.mxu0 %vm6023_vm5, %v6024_v41 }
 0xdfc   :  { %5633 = vmatprep.subr.bf16.mxu0 %v6021_v12 }
 0xdff   :  { %5635 = vmatpush3.bf16.msra.mxu0 %v6346_v44 }
 0xe00   :  { %5642 = vmatprep.subr.bf16.mxu0 %v6021_v12 }
 0xe01   :  { %v6812_v16 = vpop.permute.xlu0 %3160 }
 0xe02   :  { %5254 = vmatmul.mubr.msk.f32.vlgmr.msra.gmra.mrb[36].mxu0 %vm409_vm6, %v6812_v16 }
 0xe03   :  { %5644 = vmatpush3.bf16.msra.mxu0 %v6204_v25  ;;  %5275 = vmatprep.mubr.msk.f32.mxu0 %vm6023_vm5, %v6024_v41 }
 0xe04   :  { %5645 = vmatprep.subr.bf16.mxu0 %v6021_v12 }
 0xe07   :  { %5647 = vmatpush3.bf16.msra.mxu0 %v6225_v34 }
 0xe08   :  { %5654 = vmatprep.subr.bf16.mxu0 %v6021_v12 }
 0xe24   :  { %v2907_v23 = vpop.permute.xlu1 %2906 }
 0xe25   :  { %5221 = vmatmul.mubr.msk.f32.vlgmr.msra.gmra.mrb[34].mxu1 %vm409_vm6, %v2907_v23 }
 0xe26   :  { %5626 = vmatpush3.bf16.msra.mxu1 %v6402_v55  ;;  %5242 = vmatprep.mubr.msk.f32.mxu1 %vm6023_vm5, %v6024_v41 }
 0xe27   :  { %5627 = vmatprep.subr.bf16.mxu1 %v6021_v12 }
 0xe28   :  { %v3086_v7 = vpop.permute.xlu1 %3085 }
 0xe29   :  { %5276 = vmatmul.mubr.msk.f32.vlgmr.msra.gmra.mrb[38].mxu0 %vm409_vm6, %v3086_v7 }
 0xe2a   :  { %5629 = vmatpush3.bf16.msra.mxu1 %v6406_v3  ;;  %5656 = vmatpush3.bf16.msra.mxu0 %v6334_v33 }
 0xe2b   :  { %5636 = vmatprep.subr.bf16.mxu1 %v6021_v12  ;;  %5657 = vmatprep.subr.bf16.mxu0 %v6021_v12 }
 0xe2c   :  { %5297 = vmatprep.mubr.msk.f32.mxu0 %vm6023_vm5, %v6024_v41 }
 0xe2d   :  { %5243 = vmatmul.mubr.msk.f32.vlgmr.msra.gmra.mrb[36].mxu1 %vm409_vm6, %v3086_v7 }
 0xe2e   :  { %5638 = vmatpush3.bf16.msra.mxu1 %v6181_v13  ;;  %5264 = vmatprep.mubr.msk.f32.mxu1 %vm6023_vm5, %v6024_v41 }
 0xe2f   :  { %5639 = vmatprep.subr.bf16.mxu1 %v6021_v12  ;;  %5659 = vmatpush3.bf16.msra.mxu0 %v6337_v36 }
 0xe30   :  { %5666 = vmatprep.subr.bf16.mxu0 %v6021_v12 }
 0xe32   :  { %5641 = vmatpush3.bf16.msra.mxu1 %v6197_v22 }
 0xe33   :  { %5648 = vmatprep.subr.bf16.mxu1 %v6021_v12 }
 0xe35   :  { %5265 = vmatmul.mubr.msk.f32.vlgmr.msra.gmra.mrb[38].mxu1 %vm409_vm6, %v2907_v23 }
 0xe36   :  { %5650 = vmatpush3.bf16.msra.mxu1 %v6369_v14  ;;  %5286 = vmatprep.mubr.msk.f32.mxu1 %vm6023_vm5, %v6024_v41 }
 0xe37   :  { %5651 = vmatprep.subr.bf16.mxu1 %v6021_v12 }
 0xe3a   :  { %5653 = vmatpush3.bf16.msra.mxu1 %v6372_v15 }
 0xe3b   :  { %5660 = vmatprep.subr.bf16.mxu1 %v6021_v12 }
 0xecd   :  { %v3051_v13 = vpop.f32.mrb[34].mxu0 }
 0xece   :  { %v3064_v33 = vadd.f32 %v3051_v13, %v6411_v31  ;;  %v5233_v36 = vpop.f32.mrb[35].mxu0 }
 0xed0   :  { %3066 = vrot.lane.b32.xlu0 %v3064_v33, %s6022_s2 }
 0xed5   :  { %v3230_v22 = vpop.f32.mrb[36].mxu0 }
 0xed6   :  { %v3243_v4 = vadd.f32 %v3230_v22, %v6422_v6  ;;  %v5255_v19 = vpop.f32.mrb[37].mxu0 }
 0xed8   :  { %3245 = vrot.lane.b32.xlu1 %v3243_v4, %s6022_s2 }
 0xef8   :  { %v2976_v14 = vpop.f32.mrb[34].mxu1 }
 0xef9   :  { %v3055_v50 = vadd.f32 %v3051_v13, %v2976_v14  ;;  %v5222_v62 = vpop.f32.mrb[35].mxu1 }
 0xefb   :  { %v3056_v38 = vadd.f32 %v3055_v50, %v6459_v26 }
 0xefc   :  { %v3428_v27 = vpop.f32.mrb[38].mxu0 }
 0xefd   :  { %v3432_v15 = vadd.f32 %v6283_v51, %v3428_v27  ;;  %v3441_v63 = vadd.f32 %v3428_v27, %v6306_v2  ;;  %v5277_v47 = vpop.f32.mrb[39].mxu0  ;;  %v4603_v45 = vmul.f32 -1.442695, %v3056_v38 }
 0xeff   :  { %3443 = vrot.lane.b32.xlu1 %v3441_v63, %s6022_s2  ;;  %5841 = vpow2.f32 %v4603_v45  ;;  %v3433_v19 = vadd.f32 %v3432_v15, %v6323_v10 }
 0xf00   :  { %v3155_v52 = vpop.f32.mrb[36].mxu1 }
 0xf01   :  { %v3234_v53 = vadd.f32 %v3230_v22, %v3155_v52  ;;  %v5244_v35 = vpop.f32.mrb[37].mxu1  ;;  %v4610_v50 = vmul.f32 -1.442695, %v3433_v19 }
 0xf03   :  { %v3235_v24 = vadd.f32 %v3234_v53, %v6464_v42 }
 0xf05   :  { %v4606_v21 = vmul.f32 -1.442695, %v3235_v24 }
 0xf07   :  { %5843 = vpow2.f32 %v4606_v21  ;;  %v3242_v21 = vadd.f32 %v3155_v52, %v6484_v46 }
 0xf08   :  { %v3329_v40 = vpop.f32.mrb[38].mxu1 }
 0xf09   :  { %v3333_v18 = vadd.f32 %v3329_v40, %v6289_v54  ;;  %v3342_v9 = vadd.f32 %v3329_v40, %v6297_v59  ;;  %v5266_v0 = vpop.f32.mrb[39].mxu1  ;;  %v5842_v32 = vpop.eup %5841 }
 0xf0a   :  { %v3060_v57 = vadd.f32 1.0, %v5842_v32 }
 0xf0b   :  { %3344 = vrot.lane.b32.xlu0 %v3342_v9, %s6022_s2  ;;  %v3334_v62 = vadd.f32 %v3333_v18, %v6318_v8  ;;  %v3063_v8 = vadd.f32 %v2976_v14, %v6478_v20  ;;  %v3341_v14 = vadd.f32 %v6360_v49, %v6289_v54 }
 0xf0c   :  { %5845 = vrcp.f32 %v3060_v57 }
 0xf0d   :  { %v4608_v27 = vmul.f32 -1.442695, %v3334_v62 }
 0xf11   :  { %v5844_v23 = vpop.eup %5843 }
 0xf12   :  { %v3239_v7 = vadd.f32 1.0, %v5844_v23 }
 0xf14   :  { %5847 = vrcp.f32 %v3239_v7 }
 0xf15   :  { %5849 = vpow2.f32 %v4610_v50 }
 0xf16   :  { %v5846_v13 = vpop.eup %5845  ;;  %5851 = vpow2.f32 %v4608_v27 }
 0xf17   :  { %v3076_v62 = vsub.f32 1.0, %v5846_v13 }
 0xf1e   :  { %v5848_v36 = vpop.eup %5847 }
 0xf1f   :  { %v5850_v63 = vpop.eup %5849  ;;  %v3255_v54 = vsub.f32 1.0, %v5848_v36 }
 0xf20   :  { %v3437_v47 = vadd.f32 1.0, %v5850_v63  ;;  %v5852_v53 = vpop.eup %5851  ;;  %v3082_v63 = vmul.f32 %v5846_v13, %v6783_v17 }
 0xf21   :  { %v3338_v35 = vadd.f32 1.0, %v5852_v53  ;;  %v3261_v53 = vmul.f32 %v5848_v36, %v6788_v61 }
 0xf22   :  { %5853 = vrcp.f32 %v3437_v47 }
 0xf23   :  { %5855 = vrcp.f32 %v3338_v35 }
 0xf2c   :  { %v5854_v40 = vpop.eup %5853 }
 0xf2d   :  { %v5856_v38 = vpop.eup %5855  ;;  %v3459_v17 = vmul.f32 %v5854_v40, %v6798_v43 }
 0xf2e   :  { %v3360_v61 = vmul.f32 %v5856_v38, %v6793_v48 }
 0xf42   :  { %v3067_v33 = vpop.permute.xlu0 %3066 }
 0xf43   :  { %v3069_v59 = vmul.f32 %v5846_v13, %v3067_v33  ;;  %v3440_v33 = vadd.f32 %v6283_v51, %v6364_v60 }
 0xf45   :  { %3071 = vrot.lane.b32.xlu0 %v3069_v59, %s6022_s2 }
 0xf4a   :  { %v3246_v22 = vpop.permute.xlu1 %3245 }
 0xf4b   :  { %v3248_v4 = vmul.f32 %v5848_v36, %v3246_v22 }
 0xf4d   :  { %3250 = vrot.lane.b32.xlu1 %v3248_v4, %s6022_s2 }
 0xf71   :  { %v3444_v9 = vpop.permute.xlu1 %3443 }
 0xf72   :  { %v3446_v0 = vmul.f32 %v5854_v40, %v3444_v9 }
 0xf74   :  { %3448 = vrot.lane.b32.xlu1 %v3446_v0, %s6022_s2  ;;  %v3453_v0 = vsub.f32 1.0, %v5854_v40 }
 0xf7d   :  { %v3345_v45 = vpop.permute.xlu0 %3344 }
 0xf7e   :  { %v3347_v15 = vmul.f32 %v5856_v38, %v3345_v45 }
 0xf80   :  { %3349 = vrot.lane.b32.xlu0 %v3347_v15, %s6022_s2 }
 0xfb7   :  { %v3072_v18 = vpop.permute.xlu0 %3071 }
 0xfb8   :  { %v3074_v24 = vadd.f32 %v3072_v18, %v3063_v8  ;;  %v3354_v8 = vsub.f32 1.0, %v5856_v38 }
 0xfba   :  { %5857 = vtanh.f32 %v3074_v24 }
 0xfbf   :  { %v3251_v32 = vpop.permute.xlu1 %3250 }
 0xfc0   :  { %v3253_v57 = vadd.f32 %v3251_v32, %v3242_v21 }
 0xfc2   :  { %5859 = vtanh.f32 %v3253_v57 }
 0xfc4   :  { %v5858_v23 = vpop.eup %5857 }
 0xfc5   :  { %3078 = vrot.lane.b32.xlu0 %v5858_v23, %s6025_s5 }
 0xfcc   :  { %v5860_v7 = vpop.eup %5859 }
 0xfcd   :  { %3257 = vrot.lane.b32.xlu1 %v5860_v7, %s6025_s5 }
 0xfe6   :  { %v3449_v59 = vpop.permute.xlu1 %3448 }
 0xfe7   :  { %v3451_v22 = vadd.f32 %v3449_v59, %v3440_v33 }
 0xfe9   :  { %5861 = vtanh.f32 %v3451_v22 }
 0xff2   :  { %v3350_v4 = vpop.permute.xlu0 %3349 }
 0xff3   :  { %v5862_v52 = vpop.eup %5861  ;;  %v3352_v19 = vadd.f32 %v3350_v4, %v3341_v14 }
 0xff4   :  { %3455 = vrot.lane.b32.xlu1 %v5862_v52, %s6025_s5 }
 0xff5   :  { %5863 = vtanh.f32 %v3352_v19 }
 0xfff   :  { %v5864_v50 = vpop.eup %5863 }
0x1000   :  { %3356 = vrot.lane.b32.xlu0 %v5864_v50, %s6025_s5 }
0x1037   :  { %v3079_v27 = vpop.permute.xlu0 %3078 }
0x1038   :  { %v3081_v51 = vmul.f32 %v3079_v27, %v3076_v62 }
0x103a   :  { %v6879_v47 = vadd.f32 %v3082_v63, %v3081_v51 }
0x103c   :  { %3537 = vrot.lane.b32.xlu0 %v6879_v47, %s6025_s5 }
0x103f   :  { %v3258_v49 = vpop.permute.xlu1 %3257 }
0x1040   :  { %v3260_v35 = vmul.f32 %v3258_v49, %v3255_v54 }
0x1042   :  { %v6884_v9 = vadd.f32 %v3261_v53, %v3260_v35 }
0x1044   :  { %3716 = vrot.lane.b32.xlu1 %v6884_v9, %s6025_s5 }
0x1066   :  { %v3456_v45 = vpop.permute.xlu1 %3455 }
0x1067   :  { %v3458_v13 = vmul.f32 %v3456_v45, %v3453_v0 }
0x1069   :  { %v6889_v15 = vadd.f32 %v3459_v17, %v3458_v13 }
0x106b   :  { %3641 = vrot.lane.b32.xlu1 %v6889_v15, %s6025_s5 }
0x1072   :  { %v3357_v18 = vpop.permute.xlu0 %3356 }
0x1073   :  { %v3359_v36 = vmul.f32 %v3357_v18, %v3354_v8 }
0x1075   :  { %v3361_v24 = vadd.f32 %v3360_v61, %v3359_v36 }
0x1077   :  { %3462 = vrot.lane.b32.xlu0 %v3361_v24, %s6025_s5 }
0x10ae   :  { %v6895_v21 = vpop.permute.xlu0 %3537 }
0x10af   :  { %5298 = vmatmul.mubr.msk.f32.vlgmr.msra.gmra.mrb[40].mxu0 %vm409_vm6, %v6895_v21 }
0x10b0   :  { %5668 = vmatpush3.bf16.msra.mxu0 %v6341_v39  ;;  %5319 = vmatprep.mubr.msk.f32.mxu0 %vm6023_vm5, %v6024_v41 }
0x10b1   :  { %5669 = vmatprep.subr.bf16.mxu0 %v6021_v12 }
0x10b4   :  { %5671 = vmatpush3.bf16.msra.mxu0 %v6346_v44 }
0x10b5   :  { %5678 = vmatprep.subr.bf16.mxu0 %v6021_v12 }
0x10b6   :  { %v6905_v48 = vpop.permute.xlu1 %3716 }
0x10b7   :  { %5320 = vmatmul.mubr.msk.f32.vlgmr.msra.gmra.mrb[42].mxu0 %vm409_vm6, %v6905_v48 }
0x10b8   :  { %5680 = vmatpush3.bf16.msra.mxu0 %v6402_v55  ;;  %5341 = vmatprep.mubr.msk.f32.mxu0 %vm6023_vm5, %v6024_v41 }
0x10b9   :  { %5681 = vmatprep.subr.bf16.mxu0 %v6021_v12 }
0x10bc   :  { %5683 = vmatpush3.bf16.msra.mxu0 %v6406_v3 }
0x10bd   :  { %5690 = vmatprep.subr.bf16.mxu0 %v6021_v12 }
0x10dd   :  { %v3642_v40 = vpop.permute.xlu1 %3641 }
0x10e9   :  { %v3463_v43 = vpop.permute.xlu0 %3462 }
0x10ea   :  { %5287 = vmatmul.mubr.msk.f32.vlgmr.msra.gmra.mrb[40].mxu1 %vm409_vm6, %v3463_v43 }
0x10eb   :  { %5662 = vmatpush3.bf16.msra.mxu1 %v6402_v55  ;;  %5308 = vmatprep.mubr.msk.f32.mxu1 %vm6023_vm5, %v6024_v41 }
0x10ec   :  { %5663 = vmatprep.subr.bf16.mxu1 %v6021_v12 }
0x10ef   :  { %5665 = vmatpush3.bf16.msra.mxu1 %v6406_v3 }
0x10f0   :  { %5672 = vmatprep.subr.bf16.mxu1 %v6021_v12 }
0x10f2   :  { %5309 = vmatmul.mubr.msk.f32.vlgmr.msra.gmra.mrb[42].mxu1 %vm409_vm6, %v3642_v40 }
0x10f3   :  { %5674 = vmatpush3.bf16.msra.mxu1 %v6204_v25  ;;  %5330 = vmatprep.mubr.msk.f32.mxu1 %vm6023_vm5, %v6024_v41 }
0x10f4   :  { %5675 = vmatprep.subr.bf16.mxu1 %v6021_v12 }
0x10f7   :  { %5677 = vmatpush3.bf16.msra.mxu1 %v6225_v34 }
0x10f8   :  { %5684 = vmatprep.subr.bf16.mxu1 %v6021_v12 }
0x10fa   :  { %5331 = vmatmul.mubr.msk.f32.vlgmr.msra.gmra.mrb[44].mxu1 %vm409_vm6, %v3642_v40 }
0x10fb   :  { %5686 = vmatpush3.bf16.msra.mxu1 %v6341_v39  ;;  %5352 = vmatprep.mubr.msk.f32.mxu1 %vm6023_vm5, %v6024_v41 }
0x10fc   :  { %5687 = vmatprep.subr.bf16.mxu1 %v6021_v12 }
0x10ff   :  { %5689 = vmatpush3.bf16.msra.mxu1 %v6346_v44 }
0x1100   :  { %5714 = vmatprep.subr.bf16.mxu1 %v6021_v12 }
0x1182   :  { %v3607_v25 = vpop.f32.mrb[40].mxu0 }
0x1183   :  { %v5299_v55 = vpop.f32.mrb[41].mxu0 }
0x118a   :  { %v3786_v3 = vpop.f32.mrb[42].mxu0 }
0x118b   :  { %v3799_v34 = vadd.f32 %v3786_v3, %v6422_v6  ;;  %v5321_v38 = vpop.f32.mrb[43].mxu0 }
0x118d   :  { %3801 = vrot.lane.b32.xlu0 %v3799_v34, %s6022_s2  ;;  %v3620_v34 = vadd.f32 %v3607_v25, %v6411_v31 }
0x11bd   :  { %v6938_v32 = vpop.f32.mrb[40].mxu1 }
0x11be   :  { %v3611_v39 = vadd.f32 %v3607_v25, %v6938_v32  ;;  %v5288_v57 = vpop.f32.mrb[41].mxu1  ;;  %v4103_v25 = vld [vmem:[#allocation8 + $0x30] sm:$0xff] }
0x11c5   :  { %v3711_v23 = vpop.f32.mrb[42].mxu1 }
0x11c6   :  { %v3790_v7 = vadd.f32 %v3786_v3, %v3711_v23  ;;  %v5310_v33 = vpop.f32.mrb[43].mxu1  ;;  %v3798_v45 = vadd.f32 %v3711_v23, %v6484_v46 }
0x11c8   :  { %v3791_v4 = vadd.f32 %v3790_v7, %v6464_v42 }
0x11ca   :  { %v4616_v52 = vmul.f32 -1.442695, %v3791_v4 }
0x11cc   :  { %5865 = vpow2.f32 %v4616_v52 }
0x11cd   :  { %v3885_v59 = vpop.f32.mrb[44].mxu1 }
0x11ce   :  { %v3889_v44 = vadd.f32 %v3885_v59, %v6291_v56  ;;  %v3898_v22 = vadd.f32 %v3885_v59, %v6306_v2  ;;  %v5332_v14 = vpop.f32.mrb[45].mxu1 }
0x11cf   :  { %v4104_v14 = vld [vmem:[#allocation8 + $0x38] sm:$0xff] }
0x11d0   :  { %3900 = vrot.lane.b32.xlu1 %v3898_v22, %s6022_s2  ;;  %v3890_v51 = vadd.f32 %v3889_v44, %v6323_v10  ;;  %v3897_v10 = vadd.f32 %v6364_v60, %v6291_v56  ;;  %v4101_v44 = vld [vmem:[#allocation8 + $0x20] sm:$0xff]  ;;  %v4102_v22 = vld [vmem:[#allocation8 + $0x28] sm:$0xff] }
0x11d1   :  { %v5691_v31 = vpack.c.bf16 %v4102_v22, %v4101_v44 }
0x11d2   :  { %v4618_v54 = vmul.f32 -1.442695, %v3890_v51  ;;  %v4099_v51 = vld [vmem:[#allocation8 + $0x10] sm:$0xff] }
0x11d6   :  { %v5866_v19 = vpop.eup %5865 }
0x11d7   :  { %v3795_v50 = vadd.f32 1.0, %v5866_v19 }
0x11d9   :  { %5867 = vrcp.f32 %v3795_v50 }
0x11da   :  { %5869 = vpow2.f32 %v4618_v54  ;;  %v4100_v54 = vld [vmem:[#allocation8 + $0x18] sm:$0xff] }
0x11e3   :  { %v5868_v62 = vpop.eup %5867 }
0x11e4   :  { %v5870_v2 = vpop.eup %5869  ;;  %v3811_v24 = vsub.f32 1.0, %v5868_v62  ;;  %v3817_v40 = vmul.f32 %v5868_v62, %v6884_v9  ;;  %v3612_v9 = vadd.f32 %v3611_v39, %v6459_v26 }
0x11e5   :  { %v3894_v49 = vadd.f32 1.0, %v5870_v2  ;;  %v5700_v2 = vpack.c.bf16 %v4100_v54, %v4099_v51  ;;  %v4345_v54 = vld [vmem:[%s7153_s10 + $0x28] sm:$0xff] }
0x11e6   :  { %v4613_v7 = vmul.f32 -1.442695, %v3612_v9 }
0x11e7   :  { %5871 = vrcp.f32 %v3894_v49 }
0x11f1   :  { %v5872_v53 = vpop.eup %5871 }
0x11f2   :  { %v3910_v56 = vsub.f32 1.0, %v5872_v53  ;;  %v3916_v38 = vmul.f32 %v5872_v53, %v6889_v15  ;;  %v5694_v15 = vpack.c.bf16 %v4104_v14, %v4103_v25 }
0x11ff   :  { %v3802_v27 = vpop.permute.xlu0 %3801 }
0x1200   :  { %v3804_v63 = vmul.f32 %v5868_v62, %v3802_v27  ;;  %v4097_v62 = vld [vmem:[#allocation8] sm:$0xff]  ;;  %v4098_v27 = vld [vmem:[#allocation8 + $0x8] sm:$0xff] }
0x1202   :  { %3806 = vrot.lane.b32.xlu0 %v3804_v63, %s6022_s2  ;;  %v5697_v63 = vpack.c.bf16 %v4098_v27, %v4097_v62  ;;  %v4342_v27 = vld [vmem:[%s7153_s10 + $0x10] sm:$0xff] }
0x1242   :  { %v3901_v35 = vpop.permute.xlu1 %3900 }
0x1243   :  { %v3903_v0 = vmul.f32 %v5872_v53, %v3901_v35 }
0x1245   :  { %3905 = vrot.lane.b32.xlu1 %v3903_v0, %s6022_s2 }
0x1274   :  { %v3807_v17 = vpop.permute.xlu0 %3806 }
0x1275   :  { %v3809_v13 = vadd.f32 %v3807_v17, %v3798_v45 }
0x1277   :  { %5873 = vtanh.f32 %v3809_v13 }
0x1281   :  { %v5874_v8 = vpop.eup %5873 }
0x1282   :  { %3813 = vrot.lane.b32.xlu0 %v5874_v8, %s6025_s5 }
0x12b7   :  { %v3906_v18 = vpop.permute.xlu1 %3905 }
0x12b8   :  { %v3908_v61 = vadd.f32 %v3906_v18, %v3897_v10 }
0x12ba   :  { %5875 = vtanh.f32 %v3908_v61 }
0x12bb   :  { %5877 = vpow2.f32 %v4613_v7 }
0x12c4   :  { %v5876_v36 = vpop.eup %5875 }
0x12c5   :  { %3912 = vrot.lane.b32.xlu1 %v5876_v36, %s6025_s5  ;;  %v5878_v33 = vpop.eup %5877 }
0x12c6   :  { %v3616_v59 = vadd.f32 1.0, %v5878_v33 }
0x12c8   :  { %5879 = vrcp.f32 %v3616_v59 }
0x12d2   :  { %v6967_v26 = vpop.eup %5879 }
0x12f4   :  { %v3814_v43 = vpop.permute.xlu0 %3813 }
0x12f5   :  { %v3816_v55 = vmul.f32 %v3814_v43, %v3811_v24 }
0x12f7   :  { %v6954_v3 = vadd.f32 %v3817_v40, %v3816_v55  ;;  %v3632_v55 = vsub.f32 1.0, %v6967_v26 }
0x12f9   :  { %3994 = vrot.lane.b32.xlu0 %v6954_v3, %s6025_s5 }
0x12fd   :  { %3622 = vrot.lane.b32.xlu0 %v3620_v34, %s6022_s2 }
0x1337   :  { %v3913_v60 = vpop.permute.xlu1 %3912 }
0x1338   :  { %v3915_v57 = vmul.f32 %v3913_v60, %v3910_v56 }
0x133a   :  { %v3917_v23 = vadd.f32 %v3916_v38, %v3915_v57 }
0x133c   :  { %3919 = vrot.lane.b32.xlu1 %v3917_v23, %s6025_s5 }
0x136b   :  { %v3995_v4 = vpop.permute.xlu0 %3994 }
0x136c   :  { %5353 = vmatmul.mubr.msk.f32.vlgmr.msra.gmra.mrb[46].mxu1 %vm409_vm6, %v3995_v4 }
0x136d   :  { %5716 = vmatpush3.bf16.msra.mxu1 %v5691_v31  ;;  %5375 = vmatprep.mubr.msk.f32.mxu1 %vm6023_vm5, %v6024_v41 }
0x136e   :  { %5715 = vmatprep.subr.bf16.mxu1 %v6021_v12 }
0x136f   :  { %v3623_v39 = vpop.permute.xlu0 %3622 }
0x1370   :  { %v3625_v52 = vmul.f32 %v6967_v26, %v3623_v39  ;;  %v4340_v39 = vld [vmem:[%s7153_s10] sm:$0xff] }
0x1371   :  { %5717 = vmatpush3.bf16.msra.mxu1 %v5694_v15 }
0x1372   :  { %3627 = vrot.lane.b32.xlu0 %v3625_v52, %s6022_s2  ;;  %5696 = vmatprep.subr.bf16.mxu1 %v6021_v12  ;;  %v4341_v52 = vld [vmem:[%s7153_s10 + $0x8] sm:$0xff] }
0x1374   :  { %5376 = vmatmul.mubr.msk.f32.vlgmr.msra.gmra.mrb[48].mxu1 %vm409_vm6, %v6610_v5  ;;  %v3619_v5 = vadd.f32 %v6938_v32, %v6478_v20 }
0x1375   :  { %5378 = vmatprep.mubr.msk.f32.mxu1 %vm6023_vm5, %v6024_v41  ;;  %5698 = vmatpush3.bf16.msra.mxu1 %v5697_v63  ;;  %v4343_v63 = vld [vmem:[%s7153_s10 + $0x18] sm:$0xff] }
0x1376   :  { %5699 = vmatprep.subr.bf16.mxu1 %v6021_v12 }
0x1378   :  { %5379 = vmatmul.mubr.msk.f32.gmra.mrb[50].mxu1 %vm409_vm6, %v6515_v28 }
0x1379   :  { %5381 = vmatprep.mubr.msk.f32.mxu1 %vm6023_vm5, %v6024_v41  ;;  %5701 = vmatpush3.bf16.msra.mxu1 %v5700_v2 }
0x13ae   :  { %v3920_v19 = vpop.permute.xlu1 %3919 }
0x13af   :  { %5342 = vmatmul.mubr.msk.f32.vlgmr.msra.gmra.mrb[44].mxu0 %vm409_vm6, %v3920_v19 }
0x13b0   :  { %5692 = vmatpush3.bf16.msra.mxu0 %v5691_v31  ;;  %5363 = vmatprep.mubr.msk.f32.mxu0 %vm6023_vm5, %v6024_v41 }
0x13b1   :  { %5693 = vmatprep.subr.bf16.mxu0 %v6021_v12 }
0x13b4   :  { %5695 = vmatpush3.bf16.msra.mxu0 %v5694_v15 }
0x13b5   :  { %5702 = vmatprep.subr.bf16.mxu0 %v6021_v12 }
0x13e4   :  { %v3628_v50 = vpop.permute.xlu0 %3627 }
0x13e5   :  { %v3630_v28 = vadd.f32 %v3628_v50, %v3619_v5 }
0x13e7   :  { %5881 = vtanh.f32 %v3630_v28  ;;  %v5703_v28 = vpack.c.bf16 %v4341_v52, %v4340_v39 }
0x13f1   :  { %v5882_v49 = vpop.eup %5881 }
0x13f2   :  { %3634 = vrot.lane.b32.xlu0 %v5882_v49, %s6025_s5 }
0x13f6   :  { %4108 = vrot.lane.b32.xlu0 %v6024_v41, %s6025_s5 }
0x143f   :  { %v4064_v20 = vpop.f32.mrb[46].mxu1 }
0x1440   :  { %v4077_v32 = vadd.f32 %v4064_v20, %v6422_v6  ;;  %v5354_v53 = vpop.f32.mrb[47].mxu1 }
0x1442   :  { %4079 = vrot.lane.b32.xlu1 %v4077_v32, %s6022_s2 }
0x1447   :  { %v4200_v35 = vpop.f32.mrb[48].mxu1 }
0x1448   :  { %v5377_v0 = vpop.f32.mrb[49].mxu1 }
0x144b   :  { %v4205_v45 = vpop.f32.mrb[50].mxu1 }
0x144c   :  { %v5380_v17 = vpop.f32.mrb[51].mxu1 }
0x1464   :  { %v3635_v13 = vpop.permute.xlu0 %3634 }
0x1465   :  { %v3637_v34 = vmul.f32 %v3635_v13, %v3632_v55 }
0x1468   :  { %v4109_v8 = vpop.permute.xlu0 %4108 }
0x1469   :  { %5382 = vmatmul.mubr.msk.f32.gmra.mrb[52].mxu1 %vm409_vm6, %v4109_v8 }
0x146a   :  { %5392 = vmatprep.mubr.msk.f32.mxu1 %vm6023_vm5, %v6024_v41 }
0x146d   :  { %5393 = vmatmul.mubr.msk.f32.vlgmr.msra.gmra.mrb[54].mxu1 %vm409_vm6, %v6530_v37 }
0x146e   :  { %5395 = vmatprep.mubr.msk.f32.mxu1 %vm6023_vm5, %v6024_v41 }
0x1471   :  { %5396 = vmatmul.mubr.msk.f32.gmra.mrb[56].mxu1 %vm409_vm6, %v6620_v29 }
0x1472   :  { %5398 = vmatprep.mubr.msk.f32.mxu1 %vm6023_vm5, %v6024_v41 }
0x1475   :  { %5399 = vmatmul.mubr.msk.f32.gmra.mrb[58].mxu1 %vm409_vm6, %v6716_v30 }
0x1476   :  { %5401 = vmatprep.mubr.msk.f32.mxu1 %vm6023_vm5, %v6024_v41 }
0x1479   :  { %5402 = vmatmul.mubr.msk.f32.gmra.mrb[60].mxu1 %vm409_vm6, %v6812_v16 }
0x147a   :  { %5404 = vmatprep.mubr.msk.f32.mxu1 %vm6023_vm5, %v6024_v41 }
0x147d   :  { %5405 = vmatmul.mubr.msk.f32.gmra.mrb[62].mxu1 %vm409_vm6, %v6905_v48 }
0x147e   :  { %5407 = vmatprep.mubr.msk.f32.mxu1 %vm6023_vm5, %v6024_v41 }
0x1481   :  { %5408 = vmatmul.mubr.msk.f32.gmra.mrb[64].mxu1 %vm409_vm6, %v3995_v4 }
0x1482   :  { %v3989_v6 = vpop.f32.mrb[44].mxu0  ;;  %5410 = vmatprep.mubr.msk.f32.mxu1 %vm6023_vm5, %v6024_v41 }
0x1483   :  { %v4068_v37 = vadd.f32 %v4064_v20, %v3989_v6  ;;  %v5343_v29 = vpop.f32.mrb[45].mxu0  ;;  %v4076_v24 = vadd.f32 %v3989_v6, %v6484_v46 }
0x1485   :  { %v4069_v30 = vadd.f32 %v4068_v37, %v6464_v42  ;;  %v3638_v42 = vmul.f32 %v6967_v26, %v6879_v47 }
0x1487   :  { %v4621_v16 = vmul.f32 -1.442695, %v4069_v30  ;;  %v3639_v60 = vadd.f32 %v3638_v42, %v3637_v34 }
0x1489   :  { %5883 = vpow2.f32 %v4621_v16 }
0x1493   :  { %v5884_v10 = vpop.eup %5883 }
0x1494   :  { %v4073_v18 = vadd.f32 1.0, %v5884_v10 }
0x1496   :  { %5885 = vrcp.f32 %v4073_v18 }
0x14a0   :  { %v5886_v61 = vpop.eup %5885 }
0x14a1   :  { %v4089_v26 = vsub.f32 1.0, %v5886_v61  ;;  %v4095_v5 = vmul.f32 %v5886_v61, %v6954_v3  ;;  %v5706_v3 = vpack.c.bf16 %v4343_v63, %v4342_v27 }
0x14b4   :  { %v4080_v48 = vpop.permute.xlu1 %4079 }
0x14b5   :  { %v4082_v36 = vmul.f32 %v5886_v61, %v4080_v48 }
0x14b7   :  { %4084 = vrot.lane.b32.xlu1 %v4082_v36, %s6022_s2 }
0x1529   :  { %v4085_v43 = vpop.permute.xlu1 %4084 }
0x152a   :  { %v4087_v40 = vadd.f32 %v4085_v43, %v4076_v24 }
0x152c   :  { %5887 = vtanh.f32 %v4087_v40 }
0x1536   :  { %v5888_v56 = vpop.eup %5887 }
0x1537   :  { %4091 = vrot.lane.b32.xlu1 %v5888_v56, %s6025_s5 }
0x153b   :  { %4106 = vrot.lane.b32.xlu1 %v3639_v60, %s6025_s5 }
0x153c   :  { %v7027_v38 = vpop.f32.mrb[52].mxu1 }
0x153d   :  { %v5383_v57 = vpop.f32.mrb[53].mxu1 }
0x1540   :  { %v4285_v23 = vpop.f32.mrb[54].mxu1 }
0x1541   :  { %v5394_v46 = vpop.f32.mrb[55].mxu1 }
0x1544   :  { %v4290_v9 = vpop.f32.mrb[56].mxu1 }
0x1545   :  { %v5397_v7 = vpop.f32.mrb[57].mxu1 }
0x1548   :  { %v4295_v33 = vpop.f32.mrb[58].mxu1 }
0x1549   :  { %v5400_v59 = vpop.f32.mrb[59].mxu1 }
0x154c   :  { %v7029_v44 = vpop.f32.mrb[60].mxu1 }
0x154d   :  { %v5403_v22 = vpop.f32.mrb[61].mxu1 }
0x1550   :  { %v4305_v31 = vpop.f32.mrb[62].mxu1 }
0x1551   :  { %v7031_v25 = vadd.f32 %v4305_v31, %v4200_v35  ;;  %v5406_v47 = vpop.f32.mrb[63].mxu1 }
0x1554   :  { %v4310_v14 = vpop.f32.mrb[64].mxu1 }
0x1555   :  { %v7033_v4 = vadd.f32 %v4310_v14, %v4205_v45  ;;  %v5409_v15 = vpop.f32.mrb[65].mxu1 }
0x15a9   :  { %v4092_v19 = vpop.permute.xlu1 %4091 }
0x15aa   :  { %v4094_v50 = vmul.f32 %v4092_v19, %v4089_v26 }
0x15ac   :  { %v4096_v62 = vadd.f32 %v4095_v5, %v4094_v50  ;;  %v5891_v5 = vld [vmem:[#allocation2 + $0x18] sm:$0xff] }
0x15ad   :  { %v4107_v51 = vpop.permute.xlu1 %4106 }
0x15ae   :  { %4215 = vrot.lane.b32.xlu0 %v4096_v62, %s6025_s5  ;;  %5364 = vmatmul.mubr.msk.f32.vlgmr.msra.gmra.mrb[46].mxu0 %vm409_vm6, %v4107_v51 }
0x15af   :  { %5366 = vmatprep.mubr.msk.f32.mxu0 %vm6023_vm5, %v6024_v41  ;;  %5704 = vmatpush3.bf16.msra.mxu0 %v5703_v28 }
0x15b0   :  { %5705 = vmatprep.subr.bf16.mxu0 %v6021_v12 }
0x15b2   :  { %5367 = vmatmul.mubr.msk.f32.gmra.mrb[48].mxu0 %vm409_vm6, %v6895_v21  ;;  %v4344_v21 = vld [vmem:[%s7153_s10 + $0x20] sm:$0xff] }
0x15b3   :  { %5369 = vmatprep.mubr.msk.f32.mxu0 %vm6023_vm5, %v6024_v41  ;;  %5707 = vmatpush3.bf16.msra.mxu0 %v5706_v3  ;;  %v5709_v2 = vpack.c.bf16 %v4345_v54, %v4344_v21 }
0x15b4   :  { %5708 = vmatprep.subr.bf16.mxu0 %v6021_v12 }
0x15b6   :  { %5370 = vmatmul.mubr.msk.f32.gmra.mrb[50].mxu0 %vm409_vm6, %v6802_v58  ;;  %v4346_v58 = vld [vmem:[%s7153_s10 + $0x30] sm:$0xff] }
0x15b7   :  { %5372 = vmatprep.mubr.msk.f32.mxu0 %vm6023_vm5, %v6024_v41  ;;  %5710 = vmatpush3.bf16.msra.mxu0 %v5709_v2  ;;  %v5892_v2 = vld [vmem:[#allocation2 + $0x20] sm:$0xff] }
0x15b8   :  { %5711 = vmatprep.subr.bf16.mxu0 %v6021_v12  ;;  %v4636_v12 = vld [vmem:[%s7152_s9] ss:$0 sm:$0xff] }
0x15b9   :  { %v4330_v43 = vadd.f32 %v4636_v12, %v7031_v25  ;;  %v4331_v34 = vadd.f32 %v4636_v12, %v7033_v4 }
0x15ba   :  { %5373 = vmatmul.mubr.msk.f32.gmra.mrb[52].mxu0 %vm409_vm6, %v6706_v1  ;;  %v4347_v1 = vld [vmem:[%s7153_s10 + $0x38] sm:$0xff] }
0x15bb   :  { %5429 = vmatprep.mubr.msk.f32.mxu0 %vm6023_vm5, %v6024_v41  ;;  %v5712_v49 = vpack.c.bf16 %v4347_v1, %v4346_v58  ;;  %v4337_v55 = vmax.f32 %v4330_v43, 0.0  ;;  %v4338_v56 = vmax.f32 %v4331_v34, 0.0 }
0x15bd   :  { %5713 = vmatpush3.bf16.msra.mxu0 %v5712_v49 }
0x1620   :  { %v4216_v20 = vpop.permute.xlu0 %4215 }
0x1621   :  { %5411 = vmatmul.mubr.msk.f32.gmra.mrb[66].mxu1 %vm409_vm6, %v4216_v20 }
0x1681   :  { %v4180_v32 = vpop.f32.mrb[46].mxu0 }
0x1682   :  { %v4286_v53 = vadd.f32 %v4285_v23, %v4180_v32  ;;  %v5365_v35 = vpop.f32.mrb[47].mxu0 }
0x1684   :  { %v4326_v0 = vadd.f32 %v4636_v12, %v4286_v53 }
0x1685   :  { %v4185_v45 = vpop.f32.mrb[48].mxu0 }
0x1686   :  { %v4333_v17 = vmax.f32 %v4326_v0, 0.0  ;;  %v4291_v13 = vadd.f32 %v4290_v9, %v4185_v45  ;;  %v5368_v8 = vpop.f32.mrb[49].mxu0  ;;  %v4637_v9 = vld [vmem:[%s7154_s11] ss:$0 sm:$0xff]  ;;  %v5893_v0 = vld [vmem:[#allocation2 + $0x28] sm:$0xff]  ;;  %s6026_s11 = smov [#allocation10]  }
0x1687   :  { %s4533_s22 = sshll.u32 %s6026_s11, 4  ;;  %s4534_s22 = int_to_ptr.vmem [resolvable:$true] %s4533_s22 }
0x1688   :  { %v4327_v6 = vadd.f32 %v4636_v12, %v4291_v13  ;;  %5430 = vmatmul.mubr.msk.f32.vlgmr.msra.gmra.mrb[54].mxu0 %vm4355_vm7, %v4333_v17  ;;  %s5984_s13 = scalar_lea.vmem %s4534_s22, 16  ;;  %s5988_s17 = scalar_lea.vmem %s4534_s22, 32 }
0x1689   :  { %v4190_v37 = vpop.f32.mrb[50].mxu0  ;;  %5432 = vmatprep.mubr.msk.f32.mxu0 %vm6023_vm5, %v6024_v41  ;;  %p5985_p4 = scmp.ne.s32.totalorder %s4534_s22, %s5984_s13  ;;  %p5989_p5 = scmp.lt.s32.totalorder %s4534_s22, %s4534_s22 }
0x168a   :  { %v4334_v29 = vmax.f32 %v4327_v6, 0.0  ;;  %v4296_v30 = vadd.f32 %v4295_v33, %v4190_v37  ;;  %v5371_v16 = vpop.f32.mrb[51].mxu0  ;;  %p5990_p6 = scmp.lt.s32.totalorder %s5988_s17, %s5984_s13 }
0x168b   :  { %v5894_v16 = vld [vmem:[#allocation2 + $0x30] sm:$0xff] }
0x168c   :  { %v4328_v10 = vadd.f32 %v4636_v12, %v4296_v30  ;;  %5433 = vmatmul.mubr.msk.f32.gmra.mrb[56].mxu0 %vm4355_vm7, %v4334_v29  ;;  %p5991_p7 = por %p5990_p6, %p5989_p5 }
0x168d   :  { %v4195_v18 = vpop.f32.mrb[52].mxu0  ;;  %5435 = vmatprep.mubr.msk.f32.mxu0 %vm6023_vm5, %v6024_v41 }
0x168e   :  { %v4335_v61 = vmax.f32 %v4328_v10, 0.0  ;;  %v4301_v48 = vadd.f32 %v7029_v44, %v4195_v18  ;;  %v5374_v36 = vpop.f32.mrb[53].mxu0  ;;  %v5889_v44 = vld [vmem:[#allocation2 + $0x8] sm:$0xff]  ;;  %p5992_p8 = pnand %p5991_p7, %p5985_p4 }
0x1690   :  { %v4329_v24 = vadd.f32 %v4636_v12, %v4301_v48  ;;  %5436 = vmatmul.mubr.msk.f32.gmra.mrb[58].mxu0 %vm4355_vm7, %v4335_v61 }
0x1691   :  { %5438 = vmatprep.mubr.msk.f32.mxu0 %vm6023_vm5, %v6024_v41 }
0x1692   :  { %v4336_v40 = vmax.f32 %v4329_v24, 0.0 }
0x1694   :  { %5439 = vmatmul.mubr.msk.f32.gmra.mrb[60].mxu0 %vm4355_vm7, %v4336_v40 }
0x1695   :  { %5441 = vmatprep.mubr.msk.f32.mxu0 %vm6023_vm5, %v6024_v41 }
0x1698   :  { %5442 = vmatmul.mubr.msk.f32.gmra.mrb[62].mxu0 %vm4355_vm7, %v4337_v55 }
0x1699   :  { %5444 = vmatprep.mubr.msk.f32.mxu0 %vm6023_vm5, %v6024_v41 }
0x169c   :  { %5445 = vmatmul.mubr.msk.f32.gmra.mrb[64].mxu0 %vm4355_vm7, %v4338_v56  ;;  %v5895_v56 = vld [vmem:[#allocation2 + $0x38] sm:$0xff] }
0x169d   :  { %5447 = vmatprep.mubr.msk.f32.mxu0 %vm6023_vm5, %v6024_v41 }
0x16f4   :  { %v4315_v42 = vpop.f32.mrb[66].mxu1 }
0x16f5   :  { %v4316_v60 = vadd.f32 %v4315_v42, %v7027_v38  ;;  %v5412_v57 = vpop.f32.mrb[67].mxu1  ;;  %v5890_v38 = vld [vmem:[#allocation2 + $0x10] sm:$0xff] }
0x16f7   :  { %v4332_v23 = vadd.f32 %v4636_v12, %v4316_v60 }
0x16f9   :  { %v4339_v46 = vmax.f32 %v4332_v23, 0.0 }
0x16fb   :  { %5448 = vmatmul.mubr.msk.f32.gmra.mrb[66].mxu0 %vm4355_vm7, %v4339_v46 }
0x175b   :  { %v4443_v7 = vpop.f32.mrb[54].mxu0 }
0x175c   :  { %v4444_v33 = vadd.f32 %v4637_v9, %v4443_v7  ;;  %v5431_v59 = vpop.f32.mrb[55].mxu0 }
0x175e   :  { %v4477_v22 = vsub.f32 %v4444_v33, %v5889_v44 }
0x175f   :  { %v4448_v31 = vpop.f32.mrb[56].mxu0 }
0x1760   :  { %v4484_v25 = vmul.f32 %v4477_v22, %v4477_v22  ;;  %v4449_v41 = vadd.f32 %v4637_v9, %v4448_v31  ;;  %v5434_v47 = vpop.f32.mrb[57].mxu0 }
0x1762   :  { %v4478_v14 = vsub.f32 %v4449_v41, %v5890_v38  ;;  %v4494_v15 = vsel %vm4493_vm8, %v4484_v25, 0.0 }
0x1763   :  { %v4453_v4 = vpop.f32.mrb[58].mxu0  ;;  %v4501_v28 = vsel %vm248_vm1, %v4494_v15, 0.0 }
0x1764   :  { %v4485_v26 = vmul.f32 %v4478_v14, %v4478_v14  ;;  %v4454_v39 = vadd.f32 %v4637_v9, %v4453_v4  ;;  %v5437_v52 = vpop.f32.mrb[59].mxu0 }
0x1766   :  { %v4495_v19 = vsel %vm4493_vm8, %v4485_v26, 0.0  ;;  %v4479_v50 = vsub.f32 %v4454_v39, %v5891_v5 }
0x1767   :  { %v4502_v62 = vsel %vm248_vm1, %v4495_v19, 0.0  ;;  %v4458_v27 = vpop.f32.mrb[60].mxu0 }
0x1768   :  { %v4503_v63 = vadd.f32 %v4502_v62, %v4501_v28  ;;  %v4486_v51 = vmul.f32 %v4479_v50, %v4479_v50  ;;  %v4459_v3 = vadd.f32 %v4637_v9, %v4458_v27  ;;  %v5440_v21 = vpop.f32.mrb[61].mxu0 }
0x176a   :  { %v4496_v54 = vsel %vm4493_vm8, %v4486_v51, 0.0  ;;  %v4480_v58 = vsub.f32 %v4459_v3, %v5892_v2 }
0x176b   :  { %v4504_v1 = vsel %vm248_vm1, %v4496_v54, 0.0  ;;  %v4463_v49 = vpop.f32.mrb[62].mxu0 }
0x176c   :  { %v4505_v20 = vadd.f32 %v4504_v1, %v4503_v63  ;;  %v4487_v32 = vmul.f32 %v4480_v58, %v4480_v58  ;;  %v4464_v53 = vadd.f32 %v4637_v9, %v4463_v49  ;;  %v5443_v35 = vpop.f32.mrb[63].mxu0 }
0x176e   :  { %v4497_v12 = vsel %vm4493_vm8, %v4487_v32, 0.0  ;;  %v4481_v45 = vsub.f32 %v4464_v53, %v5893_v0 }
0x176f   :  { %v4506_v17 = vsel %vm248_vm1, %v4497_v12, 0.0  ;;  %v4468_v13 = vpop.f32.mrb[64].mxu0 }
0x1770   :  { %v4507_v8 = vadd.f32 %v4506_v17, %v4505_v20  ;;  %v4488_v6 = vmul.f32 %v4481_v45, %v4481_v45  ;;  %v4469_v37 = vadd.f32 %v4637_v9, %v4468_v13  ;;  %v5446_v29 = vpop.f32.mrb[65].mxu0 }
0x1772   :  { %v4498_v30 = vsel %vm4493_vm8, %v4488_v6, 0.0  ;;  %v4482_v10 = vsub.f32 %v4469_v37, %v5894_v16 }
0x1773   :  { %v4508_v18 = vsel %vm248_vm1, %v4498_v30, 0.0 }
0x1774   :  { %v4509_v61 = vadd.f32 %v4508_v18, %v4507_v8  ;;  %v4489_v48 = vmul.f32 %v4482_v10, %v4482_v10 }
0x1776   :  { %v4499_v36 = vsel %vm4493_vm8, %v4489_v48, 0.0 }
0x1777   :  { %v4510_v24 = vsel %vm248_vm1, %v4499_v36, 0.0 }
0x1778   :  { %v4511_v43 = vadd.f32 %v4510_v24, %v4509_v61 }
0x17ce   :  { %v4473_v40 = vpop.f32.mrb[66].mxu0 }
0x17cf   :  { %v4474_v55 = vadd.f32 %v4637_v9, %v4473_v40  ;;  %v5449_v34 = vpop.f32.mrb[67].mxu0 }
0x17d1   :  { %v4483_v42 = vsub.f32 %v4474_v55, %v5895_v56 }
0x17d3   :  { %v4490_v60 = vmul.f32 %v4483_v42, %v4483_v42 }
0x17d5   :  { %v4500_v57 = vsel %vm4493_vm8, %v4490_v60, 0.0 }
0x17d6   :  { %v4512_v23 = vsel %vm248_vm1, %v4500_v57, 0.0 }
0x17d7   :  { %v4513_v46 = vadd.f32 %v4512_v23, %v4511_v43 }
0x17d9   :  { %4514 = vadd.xlane.f32.xlu1 %v4513_v46 }
0x1866   :  { %v4515_v7 = vpop.xlane.xlu1 %4514 }
0x1867   :  { %v4516_v33 = vrot.slane %v4515_v7, 4 }
0x1869   :  { %v4517_v59 = vadd.f32 %v4516_v33, %v4515_v7 }
0x186b   :  { %v4518_v44 = vrot.slane %v4517_v59, 2 }
0x186d   :  { %v4519_v22 = vadd.f32 %v4518_v44, %v4517_v59 }
0x186f   :  { %v4520_v31 = vrot.slane %v4519_v22, 1 }
0x1871   :  { %v4521_v25 = vadd.f32 %v4520_v31, %v4519_v22 }
0x1873   :  { %5718 = vpush %v4521_v25 }
0x18a4   :  { %s5719_s29 = spop %5718 }
0x18a5   :  { %v4523_v9 = vstv %s5719_s29 }
0x18a6   :  { %v4524_v41 = vmul.f32 0.035714287, %v4523_v9 }
0x18a8   :  { %4526 = vst.msk [vmem:[#allocation10] sm:$0x1] %vm4525_vm9, %v4524_v41 }
0x18a9   :  { %5995 = shalt.err (!%p5992_p8)
}
0x18aa   :  { %s5996_s0 = scalar_lea.hbm %s7155_s12, 16 }
0x18ab   :  { %p5997_p9 = scmp.ne.s32.totalorder %s7155_s12, %s5996_s0  ;;  %p6000_p10 = scmp.lt.u32.totalorder %s5996_s0, %s7155_s12 }
0x18ad   :  { %p6002_p11 = pnand %p6000_p10, %p5997_p9 }
0x18af   :  { %6005 = shalt.err (!%p6002_p11)
}
0x18b0   :  { %4536 = dma.vmem_to_hbm [thread:$0]  %s4534_s22, 16, %s7155_s12, [#allocation4]  }
0x18b1   :  { %6012 = dma.done.wait [#allocation4], 16  }
0x18b2   :  { %6013 = vsyncadd [#allocation4], 4294967280 }
0x18b3   :  { %4540 = vsyncpa [#allocation3], 1 }
0x18b4   :  { %4541 = vsyncpa [#allocation6], 1 }
0x18b5   :  { %4542 = vsyncpa [#allocation9], 1 }
0x18b6   :  { %4543 = vsyncpa [#allocation4], 1 }

</bundles_post_ra>
